<compile_context>
chip_gen: v7x
topology: tpu7x:2x2x1
jax: 0.10.0
libtpu: 0.0.40
codegen_flags: <defaults>
</compile_context>

<pallas_src>
import functools

import jax
import jax.numpy as jnp
from jax.experimental import pallas as pl
from jax.experimental.pallas import tpu as pltpu


# ================================ Pallas kernel ================================

def _fused_backbone_kernel(x_ref, w1_ref, b1_ref, w2_ref, b2_ref,
                           wmu_ref, bmu_ref, mask_ref,
                           o_ref,
                           a_ref, pool_ref,
                           *, taps, lp, bb, inv_hw):
    """Fused conv1+ReLU -> conv2+ReLU -> global avg pool -> fc_mu for BB images.

    Layout: channels on the sublane axis, (image block x padded spatial) on the
    lane axis.  ng = bb * lp lanes; image b owns lanes [b*lp, (b+1)*lp), of which
    only interior pixels (mask == 1) are valid conv outputs.

    x_ref   : [Cp, ng]            bf16 zero-padded images (Cp = channels padded to 8)
    w1_ref  : [C1, 9*Cp]          bf16 conv1 weights, tap-major (tap k -> rows k*Cp..)
    b1_ref  : [C1, 1]             f32
    w2_ref  : [C2, 9*C1]          bf16 conv2 weights, tap-major
    b2_ref  : [C2, 1]             f32
    wmu_ref : [latent, C2]        f32  fc_mu weight (PyTorch [out, in] layout)
    bmu_ref : [latent, 1]         f32
    mask_ref: [1, ng]             f32  1.0 at interior pixels, 0.0 at halo/padding
    o_ref   : [latent, bb]        f32  column b = latent code of image b
    a_ref   : [9*max(Cp,C1), ng]  f32  VMEM scratch: lane-rolled im2col operand
    pool_ref: [C2, bb]            f32  VMEM scratch: per-image pooled features
    """
    ng = bb * lp
    cp = x_ref.shape[0]
    c1 = w1_ref.shape[0]
    mask = mask_ref[...]                                           # [1, ng]

    # ---------- conv1: lane-rolled im2col + ONE MXU dot (instead of 9) ----------
    x = x_ref[...].astype(jnp.float32)                             # [cp, ng]
    for k, s in enumerate(taps):
        # piece[c, g] = x[c, g + s]  (circular wrap only pollutes masked positions)
        piece = x if s == 0 else pltpu.roll(x, (-s) % ng, 1)
        a_ref[k * cp:(k + 1) * cp, :] = piece                      # tile-aligned store
    h1 = jnp.dot(w1_ref[...], a_ref[0:9 * cp, :].astype(jnp.bfloat16),
                 preferred_element_type=jnp.float32)               # [c1, ng] f32
    # bias + ReLU; the mask re-creates the zero "same" padding conv2's taps read
    # (and kills inter-image / lane-padding garbage).
    h1 = jnp.maximum(h1 + b1_ref[...], 0.0) * mask

    # ---------- conv2: same im2col trick on the conv1 output ----------
    for k, s in enumerate(taps):
        piece = h1 if s == 0 else pltpu.roll(h1, (-s) % ng, 1)
        a_ref[k * c1:(k + 1) * c1, :] = piece
    h2 = jnp.dot(w2_ref[...], a_ref[0:9 * c1, :].astype(jnp.bfloat16),
                 preferred_element_type=jnp.float32)               # [c2, ng] f32
    h2 = jnp.maximum(h2 + b2_ref[...], 0.0) * mask                 # garbage -> 0

    # ---------- adaptive_avg_pool2d(1) per image + fc_mu ----------
    # Per-image segments are lp lanes (lp % 128 == 0), so the slices are aligned.
    for b in range(bb):
        pool_ref[:, b:b + 1] = jnp.sum(h2[:, b * lp:(b + 1) * lp],
                                       axis=1, keepdims=True)      # [c2, 1]
    pooled = pool_ref[...] * inv_hw                                # [c2, bb] = spatial mean
    mu = jnp.dot(wmu_ref[...], pooled,
                 preferred_element_type=jnp.float32) + bmu_ref[...]
    o_ref[...] = mu                                                # [latent, bb]


# ============================ pallas_call wrapper ==============================

def fused_backbone_forward(xp, mask, kp, *, lp, bb, hw, taps):
    nsteps, cp, ng = xp.shape
    c1 = kp["w1"].shape[0]
    c2 = kp["w2"].shape[0]
    ld = kp["w_mu"].shape[0]

    kernel = functools.partial(_fused_backbone_kernel, taps=taps, lp=lp, bb=bb,
                               inv_hw=1.0 / float(hw))

    flops = nsteps * (2 * ng * (9 * cp * c1 + 9 * c1 * c2)
                      + ng * c2 + 2 * c2 * ld * bb)
    bytes_accessed = (xp.size * 2 + mask.size * 4 + nsteps * ld * bb * 4
                      + (kp["w1"].size + kp["w2"].size) * 2
                      + (kp["b1"].size + kp["b2"].size
                         + kp["w_mu"].size + kp["b_mu"].size) * 4)

    out = pl.pallas_call(
        kernel,
        out_shape=jax.ShapeDtypeStruct((nsteps, ld, bb), jnp.float32),
        grid_spec=pltpu.PrefetchScalarGridSpec(
            num_scalar_prefetch=0,
            grid=(nsteps,),
            in_specs=[
                pl.BlockSpec((None, cp, ng), lambda i: (i, 0, 0)),   # image block i
                pl.BlockSpec((c1, 9 * cp), lambda i: (0, 0)),        # w1 (resident)
                pl.BlockSpec((c1, 1), lambda i: (0, 0)),             # b1
                pl.BlockSpec((c2, 9 * c1), lambda i: (0, 0)),        # w2
                pl.BlockSpec((c2, 1), lambda i: (0, 0)),             # b2
                pl.BlockSpec((ld, c2), lambda i: (0, 0)),            # fc_mu weight
                pl.BlockSpec((ld, 1), lambda i: (0, 0)),             # fc_mu bias
                pl.BlockSpec((1, ng), lambda i: (0, 0)),             # interior mask
            ],
            out_specs=pl.BlockSpec((None, ld, bb), lambda i: (i, 0, 0)),
            scratch_shapes=[
                pltpu.VMEM((9 * max(cp, c1), ng), jnp.float32),      # im2col operand
                pltpu.VMEM((c2, bb), jnp.float32),                   # pooled features
            ],
        ),
        compiler_params=pltpu.CompilerParams(
            dimension_semantics=("parallel",)),                      # megacore over batch
        cost_estimate=pl.CostEstimate(flops=int(flops), transcendentals=0,
                                      bytes_accessed=int(bytes_accessed)),
    )(xp, kp["w1"], kp["b1"], kp["w2"], kp["b2"], kp["w_mu"], kp["b_mu"], mask)
    return out


# ========================= BackboneWrapper.forward ===========================

@functools.partial(jax.jit, static_argnames=("block_b",))
def backbone_wrapper_forward(packed_params, x_nchw, *, block_b=8):
    """Equivalent of BackboneWrapper.forward for NCHW float32 input."""
    B, cin, H, W = x_nchw.shape
    Hp, Wp = H + 2, W + 2
    L = Hp * Wp
    Lp = ((L + 127) // 128) * 128          # per-image lane length, 128-aligned
    Cp = ((cin + 7) // 8) * 8              # channels padded to a full sublane group
    BB = max(1, min(block_b, B))           # images per grid step
    nsteps = (B + BB - 1) // BB
    Bp = nsteps * BB
    ld = packed_params["w_mu"].shape[0]

    # Pad (batch, channels, spatial halo), flatten spatial, pad to Lp, and stack
    # BB images along the lane axis per grid step.  MXU operand is bf16.
    x = jnp.pad(x_nchw, ((0, Bp - B), (0, Cp - cin), (1, 1), (1, 1)))
    x = x.reshape(Bp, Cp, L)
    x = jnp.pad(x, ((0, 0), (0, 0), (0, Lp - L)))
    x = x.reshape(nsteps, BB, Cp, Lp)
    x = jnp.transpose(x, (0, 2, 1, 3)).reshape(nsteps, Cp, BB * Lp)
    x = x.astype(jnp.bfloat16)

    # Interior-pixel mask for one image block (1.0 = real conv output position).
    r = jnp.arange(Hp)
    c = jnp.arange(Wp)
    valid = (((r >= 1) & (r <= H))[:, None]
             & ((c >= 1) & (c <= W))[None, :]).reshape(L)
    valid = jnp.concatenate([valid, jnp.zeros((Lp - L,), dtype=bool)])
    mask = jnp.tile(valid, (BB,)).astype(jnp.float32).reshape(1, BB * Lp)

    # Flattened-index offsets of the nine 3x3 taps in the padded image.
    taps = tuple((di - 1) * Wp + (dj - 1) for di in range(3) for dj in range(3))

    out = fused_backbone_forward(x, mask, packed_params,
                                 lp=Lp, bb=BB, hw=H * W, taps=taps)
    out = jnp.transpose(out, (0, 2, 1)).reshape(Bp, ld)[:B]         # [B, latent]
    return out


# ============================ parameters & packing =============================

def init_params(key, latent_dim=8):
    """Synthetic backbone + fc_mu in natural PyTorch layouts (OIHW convs)."""
    ks = jax.random.split(key, 6)
    return {
        "conv1_w": 0.1 * jax.random.normal(ks[0], (8, 3, 3, 3), jnp.float32),
        "conv1_b": 0.1 * jax.random.normal(ks[1], (8,), jnp.float32),
        "conv2_w": 0.1 * jax.random.normal(ks[2], (16, 8, 3, 3), jnp.float32),
        "conv2_b": 0.1 * jax.random.normal(ks[3], (16,), jnp.float32),
        "fc_w": 0.1 * jax.random.normal(ks[4], (latent_dim, 16), jnp.float32),
        "fc_b": 0.1 * jax.random.normal(ks[5], (latent_dim,), jnp.float32),
    }


def pack_params(params):
    """Hoisted layout transforms: conv OIHW -> tap-major [Cout, 9*Cin_pad] bf16,
    biases as [C, 1] columns, fc_mu kept [latent, C2] f32."""
    def pack_conv(w):
        co, ci, kh, kw = w.shape
        cp = ((ci + 7) // 8) * 8
        w = jnp.pad(w, ((0, 0), (0, cp - ci), (0, 0), (0, 0)))
        w = jnp.transpose(w, (0, 2, 3, 1)).reshape(co, kh * kw * cp)
        return w.astype(jnp.bfloat16)

    return {
        "w1": pack_conv(params["conv1_w"]),
        "b1": params["conv1_b"].reshape(-1, 1).astype(jnp.float32),
        "w2": pack_conv(params["conv2_w"]),
        "b2": params["conv2_b"].reshape(-1, 1).astype(jnp.float32),
        "w_mu": params["fc_w"].astype(jnp.float32),
        "b_mu": params["fc_b"].reshape(-1, 1).astype(jnp.float32),
    }


# ============================== pure-JAX reference =============================

def reference_forward(params, x):
    """f32 XLA reference of the same forward pass (conv/relu/conv/relu/pool/fc)."""
    dn = ("NCHW", "OIHW", "NCHW")
    hi = jax.lax.Precision.HIGHEST
    y = jax.lax.conv_general_dilated(x, params["conv1_w"], (1, 1), ((1, 1), (1, 1)),
                                     dimension_numbers=dn, precision=hi)
    y = jax.nn.relu(y + params["conv1_b"][None, :, None, None])
    y = jax.lax.conv_general_dilated(y, params["conv2_w"], (1, 1), ((1, 1), (1, 1)),
                                     dimension_numbers=dn, precision=hi)
    y = jax.nn.relu(y + params["conv2_b"][None, :, None, None])
    pooled = y.mean(axis=(2, 3))
    return pooled @ params["fc_w"].T + params["fc_b"]


# ==================================== main =====================================

if __name__ == "__main__":
    key = jax.random.PRNGKey(0)
    pkey, xkey = jax.random.split(key)

    latent_dim = 8
    params = init_params(pkey, latent_dim=latent_dim)
    packed = pack_params(params)

    # NCHW input consistent with the module (3 channels, 16x16); batch 16 so the
    # grid has 2 "parallel" steps of 8 images each (v7x megacore, amortised overhead).
    B, H, W = 16, 16, 16
    x = jax.random.normal(xkey, (B, 3, H, W), jnp.float32)

    mu = backbone_wrapper_forward(packed, x, block_b=8)
    mu = jax.block_until_ready(mu)
    assert mu.shape == (B, latent_dim), mu.shape
    assert mu.dtype == jnp.float32

    # bf16-tolerance check against the f32 reference of the same forward pass.
    ref = reference_forward(params, x)
    err = float(jnp.max(jnp.abs(mu - ref)))
    assert err < 3e-2, f"kernel/reference mismatch: max abs err = {err}"

    print("KERNEL_OK")
</pallas_src>

<mosaic_0001>
module attributes {stable_mosaic.version = 11 : i64} {
  func.func @_fused_backbone_kernel(%arg0: i32, %arg1: memref<1x8x3072xbf16, #tpu.memory_space<vmem>>, %arg2: memref<8x72xbf16, #tpu.memory_space<vmem>>, %arg3: memref<8x1xf32, #tpu.memory_space<vmem>>, %arg4: memref<16x72xbf16, #tpu.memory_space<vmem>>, %arg5: memref<16x1xf32, #tpu.memory_space<vmem>>, %arg6: memref<8x16xf32, #tpu.memory_space<vmem>>, %arg7: memref<8x1xf32, #tpu.memory_space<vmem>>, %arg8: memref<1x3072xf32, #tpu.memory_space<vmem>>, %arg9: memref<1x8x8xf32, #tpu.memory_space<vmem>>, %arg10: memref<72x3072xf32, #tpu.memory_space<vmem>>, %arg11: memref<16x8xf32, #tpu.memory_space<vmem>>) attributes {dimension_semantics = [#tpu.dimension_semantics<parallel>], iteration_bounds = array<i64: 2>, scalar_prefetch = 0 : i64, scratch_operands = 2 : i64, tpu.core_type = #tpu.core_type<tc>, window_params = [{transform_indices = @transform_0, window_bounds = array<i64: 1, 8, 3072>}, {pipeline_mode = #tpu.pipeline_mode<synchronous>, transform_indices = @transform_1, window_bounds = array<i64: 8, 72>}, {pipeline_mode = #tpu.pipeline_mode<synchronous>, transform_indices = @transform_2, window_bounds = array<i64: 8, 1>}, {pipeline_mode = #tpu.pipeline_mode<synchronous>, transform_indices = @transform_3, window_bounds = array<i64: 16, 72>}, {pipeline_mode = #tpu.pipeline_mode<synchronous>, transform_indices = @transform_4, window_bounds = array<i64: 16, 1>}, {pipeline_mode = #tpu.pipeline_mode<synchronous>, transform_indices = @transform_5, window_bounds = array<i64: 8, 16>}, {pipeline_mode = #tpu.pipeline_mode<synchronous>, transform_indices = @transform_6, window_bounds = array<i64: 8, 1>}, {pipeline_mode = #tpu.pipeline_mode<synchronous>, transform_indices = @transform_7, window_bounds = array<i64: 1, 3072>}, {transform_indices = @transform_8, window_bounds = array<i64: 1, 8, 8>}]} {
    %c0 = arith.constant 0 : index
    %c0_0 = arith.constant 0 : index
    %0 = vector.load %arg8[%c0, %c0_0] : memref<1x3072xf32, #tpu.memory_space<vmem>>, vector<1x3072xf32>
    %c0_1 = arith.constant 0 : index
    %c0_2 = arith.constant 0 : index
    %c0_3 = arith.constant 0 : index
    %1 = vector.load %arg1[%c0_1, %c0_2, %c0_3] : memref<1x8x3072xbf16, #tpu.memory_space<vmem>>, vector<1x8x3072xbf16>
    %2 = vector.shape_cast %1 : vector<1x8x3072xbf16> to vector<8x3072xbf16>
    %3 = arith.extf %2 : vector<8x3072xbf16> to vector<8x3072xf32>
    %c19_i32 = arith.constant 19 : i32
    %4 = tpu.dynamic_rotate %3 by %c19_i32 dim 1 : vector<8x3072xf32>, i32 -> vector<8x3072xf32>
    %c0_4 = arith.constant 0 : index
    %c0_5 = arith.constant 0 : index
    %5 = vector.load %arg10[%c0_4, %c0_5] : memref<72x3072xf32, #tpu.memory_space<vmem>>, vector<8x3072xf32>
    tpu.vector_store %arg10[%c0_4, %c0_5], %4 {strides = array<i32>} : memref<72x3072xf32, #tpu.memory_space<vmem>>, vector<8x3072xf32>,
    %c18_i32 = arith.constant 18 : i32
    %6 = tpu.dynamic_rotate %3 by %c18_i32 dim 1 : vector<8x3072xf32>, i32 -> vector<8x3072xf32>
    %c8 = arith.constant 8 : index
    %c0_6 = arith.constant 0 : index
    %7 = vector.load %arg10[%c8, %c0_6] : memref<72x3072xf32, #tpu.memory_space<vmem>>, vector<8x3072xf32>
    tpu.vector_store %arg10[%c8, %c0_6], %6 {strides = array<i32>} : memref<72x3072xf32, #tpu.memory_space<vmem>>, vector<8x3072xf32>,
    %c17_i32 = arith.constant 17 : i32
    %8 = tpu.dynamic_rotate %3 by %c17_i32 dim 1 : vector<8x3072xf32>, i32 -> vector<8x3072xf32>
    %c16 = arith.constant 16 : index
    %c0_7 = arith.constant 0 : index
    %9 = vector.load %arg10[%c16, %c0_7] : memref<72x3072xf32, #tpu.memory_space<vmem>>, vector<8x3072xf32>
    tpu.vector_store %arg10[%c16, %c0_7], %8 {strides = array<i32>} : memref<72x3072xf32, #tpu.memory_space<vmem>>, vector<8x3072xf32>,
    %c1_i32 = arith.constant 1 : i32
    %10 = tpu.dynamic_rotate %3 by %c1_i32 dim 1 : vector<8x3072xf32>, i32 -> vector<8x3072xf32>
    %c24 = arith.constant 24 : index
    %c0_8 = arith.constant 0 : index
    %11 = vector.load %arg10[%c24, %c0_8] : memref<72x3072xf32, #tpu.memory_space<vmem>>, vector<8x3072xf32>
    tpu.vector_store %arg10[%c24, %c0_8], %10 {strides = array<i32>} : memref<72x3072xf32, #tpu.memory_space<vmem>>, vector<8x3072xf32>,
    %c32 = arith.constant 32 : index
    %c0_9 = arith.constant 0 : index
    %12 = vector.load %arg10[%c32, %c0_9] : memref<72x3072xf32, #tpu.memory_space<vmem>>, vector<8x3072xf32>
    tpu.vector_store %arg10[%c32, %c0_9], %3 {strides = array<i32>} : memref<72x3072xf32, #tpu.memory_space<vmem>>, vector<8x3072xf32>,
    %c3071_i32 = arith.constant 3071 : i32
    %13 = tpu.dynamic_rotate %3 by %c3071_i32 dim 1 : vector<8x3072xf32>, i32 -> vector<8x3072xf32>
    %c40 = arith.constant 40 : index
    %c0_10 = arith.constant 0 : index
    %14 = vector.load %arg10[%c40, %c0_10] : memref<72x3072xf32, #tpu.memory_space<vmem>>, vector<8x3072xf32>
    tpu.vector_store %arg10[%c40, %c0_10], %13 {strides = array<i32>} : memref<72x3072xf32, #tpu.memory_space<vmem>>, vector<8x3072xf32>,
    %c3055_i32 = arith.constant 3055 : i32
    %15 = tpu.dynamic_rotate %3 by %c3055_i32 dim 1 : vector<8x3072xf32>, i32 -> vector<8x3072xf32>
    %c48 = arith.constant 48 : index
    %c0_11 = arith.constant 0 : index
    %16 = vector.load %arg10[%c48, %c0_11] : memref<72x3072xf32, #tpu.memory_space<vmem>>, vector<8x3072xf32>
    tpu.vector_store %arg10[%c48, %c0_11], %15 {strides = array<i32>} : memref<72x3072xf32, #tpu.memory_space<vmem>>, vector<8x3072xf32>,
    %c3054_i32 = arith.constant 3054 : i32
    %17 = tpu.dynamic_rotate %3 by %c3054_i32 dim 1 : vector<8x3072xf32>, i32 -> vector<8x3072xf32>
    %c56 = arith.constant 56 : index
    %c0_12 = arith.constant 0 : index
    %18 = vector.load %arg10[%c56, %c0_12] : memref<72x3072xf32, #tpu.memory_space<vmem>>, vector<8x3072xf32>
    tpu.vector_store %arg10[%c56, %c0_12], %17 {strides = array<i32>} : memref<72x3072xf32, #tpu.memory_space<vmem>>, vector<8x3072xf32>,
    %c3053_i32 = arith.constant 3053 : i32
    %19 = tpu.dynamic_rotate %3 by %c3053_i32 dim 1 : vector<8x3072xf32>, i32 -> vector<8x3072xf32>
    %c64 = arith.constant 64 : index
    %c0_13 = arith.constant 0 : index
    %20 = vector.load %arg10[%c64, %c0_13] : memref<72x3072xf32, #tpu.memory_space<vmem>>, vector<8x3072xf32>
    tpu.vector_store %arg10[%c64, %c0_13], %19 {strides = array<i32>} : memref<72x3072xf32, #tpu.memory_space<vmem>>, vector<8x3072xf32>,
    %c0_14 = arith.constant 0 : index
    %c0_15 = arith.constant 0 : index
    %21 = vector.load %arg2[%c0_14, %c0_15] : memref<8x72xbf16, #tpu.memory_space<vmem>>, vector<8x72xbf16>
    %c0_16 = arith.constant 0 : index
    %c0_17 = arith.constant 0 : index
    %22 = vector.load %arg10[%c0_16, %c0_17] : memref<72x3072xf32, #tpu.memory_space<vmem>>, vector<72x3072xf32>
    %23 = arith.truncf %22 : vector<72x3072xf32> to vector<72x3072xbf16>
    %cst = arith.constant dense<0.000000e+00> : vector<8x3072xf32>
    %24 = tpu.matmul %21, %23, %cst {dimension_numbers = #tpu.dot_dimension_numbers<[1], [0], [0], [1], [0, 0, 1, 1], [], []>} : vector<8x72xbf16>, vector<72x3072xbf16>, vector<8x3072xf32> -> vector<8x3072xf32>
    %c0_18 = arith.constant 0 : index
    %c0_19 = arith.constant 0 : index
    %25 = vector.load %arg3[%c0_18, %c0_19] : memref<8x1xf32, #tpu.memory_space<vmem>>, vector<8x1xf32>
    %26 = vector.broadcast %25 : vector<8x1xf32> to vector<8x3072xf32>
    %27 = arith.addf %24, %26 : vector<8x3072xf32>
    %cst_20 = arith.constant 0.000000e+00 : f32
    %28 = vector.broadcast %cst_20 : f32 to vector<8x3072xf32>
    %29 = arith.maximumf %27, %28 : vector<8x3072xf32>
    %30 = vector.broadcast %0 : vector<1x3072xf32> to vector<8x3072xf32>
    %31 = arith.mulf %29, %30 : vector<8x3072xf32>
    %c19_i32_21 = arith.constant 19 : i32
    %32 = tpu.dynamic_rotate %31 by %c19_i32_21 dim 1 : vector<8x3072xf32>, i32 -> vector<8x3072xf32>
    %c0_22 = arith.constant 0 : index
    %c0_23 = arith.constant 0 : index
    %33 = vector.load %arg10[%c0_22, %c0_23] : memref<72x3072xf32, #tpu.memory_space<vmem>>, vector<8x3072xf32>
    tpu.vector_store %arg10[%c0_22, %c0_23], %32 {strides = array<i32>} : memref<72x3072xf32, #tpu.memory_space<vmem>>, vector<8x3072xf32>,
    %c18_i32_24 = arith.constant 18 : i32
    %34 = tpu.dynamic_rotate %31 by %c18_i32_24 dim 1 : vector<8x3072xf32>, i32 -> vector<8x3072xf32>
    %c8_25 = arith.constant 8 : index
    %c0_26 = arith.constant 0 : index
    %35 = vector.load %arg10[%c8_25, %c0_26] : memref<72x3072xf32, #tpu.memory_space<vmem>>, vector<8x3072xf32>
    tpu.vector_store %arg10[%c8_25, %c0_26], %34 {strides = array<i32>} : memref<72x3072xf32, #tpu.memory_space<vmem>>, vector<8x3072xf32>,
    %c17_i32_27 = arith.constant 17 : i32
    %36 = tpu.dynamic_rotate %31 by %c17_i32_27 dim 1 : vector<8x3072xf32>, i32 -> vector<8x3072xf32>
    %c16_28 = arith.constant 16 : index
    %c0_29 = arith.constant 0 : index
    %37 = vector.load %arg10[%c16_28, %c0_29] : memref<72x3072xf32, #tpu.memory_space<vmem>>, vector<8x3072xf32>
    tpu.vector_store %arg10[%c16_28, %c0_29], %36 {strides = array<i32>} : memref<72x3072xf32, #tpu.memory_space<vmem>>, vector<8x3072xf32>,
    %c1_i32_30 = arith.constant 1 : i32
    %38 = tpu.dynamic_rotate %31 by %c1_i32_30 dim 1 : vector<8x3072xf32>, i32 -> vector<8x3072xf32>
    %c24_31 = arith.constant 24 : index
    %c0_32 = arith.constant 0 : index
    %39 = vector.load %arg10[%c24_31, %c0_32] : memref<72x3072xf32, #tpu.memory_space<vmem>>, vector<8x3072xf32>
    tpu.vector_store %arg10[%c24_31, %c0_32], %38 {strides = array<i32>} : memref<72x3072xf32, #tpu.memory_space<vmem>>, vector<8x3072xf32>,
    %c32_33 = arith.constant 32 : index
    %c0_34 = arith.constant 0 : index
    %40 = vector.load %arg10[%c32_33, %c0_34] : memref<72x3072xf32, #tpu.memory_space<vmem>>, vector<8x3072xf32>
    tpu.vector_store %arg10[%c32_33, %c0_34], %31 {strides = array<i32>} : memref<72x3072xf32, #tpu.memory_space<vmem>>, vector<8x3072xf32>,
    %c3071_i32_35 = arith.constant 3071 : i32
    %41 = tpu.dynamic_rotate %31 by %c3071_i32_35 dim 1 : vector<8x3072xf32>, i32 -> vector<8x3072xf32>
    %c40_36 = arith.constant 40 : index
    %c0_37 = arith.constant 0 : index
    %42 = vector.load %arg10[%c40_36, %c0_37] : memref<72x3072xf32, #tpu.memory_space<vmem>>, vector<8x3072xf32>
    tpu.vector_store %arg10[%c40_36, %c0_37], %41 {strides = array<i32>} : memref<72x3072xf32, #tpu.memory_space<vmem>>, vector<8x3072xf32>,
    %c3055_i32_38 = arith.constant 3055 : i32
    %43 = tpu.dynamic_rotate %31 by %c3055_i32_38 dim 1 : vector<8x3072xf32>, i32 -> vector<8x3072xf32>
    %c48_39 = arith.constant 48 : index
    %c0_40 = arith.constant 0 : index
    %44 = vector.load %arg10[%c48_39, %c0_40] : memref<72x3072xf32, #tpu.memory_space<vmem>>, vector<8x3072xf32>
    tpu.vector_store %arg10[%c48_39, %c0_40], %43 {strides = array<i32>} : memref<72x3072xf32, #tpu.memory_space<vmem>>, vector<8x3072xf32>,
    %c3054_i32_41 = arith.constant 3054 : i32
    %45 = tpu.dynamic_rotate %31 by %c3054_i32_41 dim 1 : vector<8x3072xf32>, i32 -> vector<8x3072xf32>
    %c56_42 = arith.constant 56 : index
    %c0_43 = arith.constant 0 : index
    %46 = vector.load %arg10[%c56_42, %c0_43] : memref<72x3072xf32, #tpu.memory_space<vmem>>, vector<8x3072xf32>
    tpu.vector_store %arg10[%c56_42, %c0_43], %45 {strides = array<i32>} : memref<72x3072xf32, #tpu.memory_space<vmem>>, vector<8x3072xf32>,
    %c3053_i32_44 = arith.constant 3053 : i32
    %47 = tpu.dynamic_rotate %31 by %c3053_i32_44 dim 1 : vector<8x3072xf32>, i32 -> vector<8x3072xf32>
    %c64_45 = arith.constant 64 : index
    %c0_46 = arith.constant 0 : index
    %48 = vector.load %arg10[%c64_45, %c0_46] : memref<72x3072xf32, #tpu.memory_space<vmem>>, vector<8x3072xf32>
    tpu.vector_store %arg10[%c64_45, %c0_46], %47 {strides = array<i32>} : memref<72x3072xf32, #tpu.memory_space<vmem>>, vector<8x3072xf32>,
    %c0_47 = arith.constant 0 : index
    %c0_48 = arith.constant 0 : index
    %49 = vector.load %arg4[%c0_47, %c0_48] : memref<16x72xbf16, #tpu.memory_space<vmem>>, vector<16x72xbf16>
    %c0_49 = arith.constant 0 : index
    %c0_50 = arith.constant 0 : index
    %50 = vector.load %arg10[%c0_49, %c0_50] : memref<72x3072xf32, #tpu.memory_space<vmem>>, vector<72x3072xf32>
    %51 = arith.truncf %50 : vector<72x3072xf32> to vector<72x3072xbf16>
    %cst_51 = arith.constant dense<0.000000e+00> : vector<16x3072xf32>
    %52 = tpu.matmul %49, %51, %cst_51 {dimension_numbers = #tpu.dot_dimension_numbers<[1], [0], [0], [1], [0, 0, 1, 1], [], []>} : vector<16x72xbf16>, vector<72x3072xbf16>, vector<16x3072xf32> -> vector<16x3072xf32>
    %c0_52 = arith.constant 0 : index
    %c0_53 = arith.constant 0 : index
    %53 = vector.load %arg5[%c0_52, %c0_53] : memref<16x1xf32, #tpu.memory_space<vmem>>, vector<16x1xf32>
    %54 = vector.broadcast %53 : vector<16x1xf32> to vector<16x3072xf32>
    %55 = arith.addf %52, %54 : vector<16x3072xf32>
    %cst_54 = arith.constant 0.000000e+00 : f32
    %56 = vector.broadcast %cst_54 : f32 to vector<16x3072xf32>
    %57 = arith.maximumf %55, %56 : vector<16x3072xf32>
    %58 = vector.broadcast %0 : vector<1x3072xf32> to vector<16x3072xf32>
    %59 = arith.mulf %57, %58 : vector<16x3072xf32>
    %60 = vector.extract_strided_slice %59 {offsets = [0, 0], sizes = [16, 384], strides = [1, 1]} : vector<16x3072xf32> to vector<16x384xf32>
    %cst_55 = arith.constant dense<0.000000e+00> : vector<16xf32>
    %61 = vector.multi_reduction <add>, %60, %cst_55 [1] : vector<16x384xf32> to vector<16xf32>
    %62 = vector.shape_cast %61 : vector<16xf32> to vector<16x1xf32>
    %c0_56 = arith.constant 0 : index
    %c0_57 = arith.constant 0 : index
    %63 = vector.load %arg11[%c0_56, %c0_57] : memref<16x8xf32, #tpu.memory_space<vmem>>, vector<16x1xf32>
    tpu.vector_store %arg11[%c0_56, %c0_57], %62 {strides = array<i32>} : memref<16x8xf32, #tpu.memory_space<vmem>>, vector<16x1xf32>,
    %64 = vector.extract_strided_slice %59 {offsets = [0, 384], sizes = [16, 384], strides = [1, 1]} : vector<16x3072xf32> to vector<16x384xf32>
    %cst_58 = arith.constant dense<0.000000e+00> : vector<16xf32>
    %65 = vector.multi_reduction <add>, %64, %cst_58 [1] : vector<16x384xf32> to vector<16xf32>
    %66 = vector.shape_cast %65 : vector<16xf32> to vector<16x1xf32>
    %c0_59 = arith.constant 0 : index
    %c1 = arith.constant 1 : index
    %67 = vector.load %arg11[%c0_59, %c1] : memref<16x8xf32, #tpu.memory_space<vmem>>, vector<16x1xf32>
    tpu.vector_store %arg11[%c0_59, %c1], %66 {strides = array<i32>} : memref<16x8xf32, #tpu.memory_space<vmem>>, vector<16x1xf32>,
    %68 = vector.extract_strided_slice %59 {offsets = [0, 768], sizes = [16, 384], strides = [1, 1]} : vector<16x3072xf32> to vector<16x384xf32>
    %cst_60 = arith.constant dense<0.000000e+00> : vector<16xf32>
    %69 = vector.multi_reduction <add>, %68, %cst_60 [1] : vector<16x384xf32> to vector<16xf32>
    %70 = vector.shape_cast %69 : vector<16xf32> to vector<16x1xf32>
    %c0_61 = arith.constant 0 : index
    %c2 = arith.constant 2 : index
    %71 = vector.load %arg11[%c0_61, %c2] : memref<16x8xf32, #tpu.memory_space<vmem>>, vector<16x1xf32>
    tpu.vector_store %arg11[%c0_61, %c2], %70 {strides = array<i32>} : memref<16x8xf32, #tpu.memory_space<vmem>>, vector<16x1xf32>,
    %72 = vector.extract_strided_slice %59 {offsets = [0, 1152], sizes = [16, 384], strides = [1, 1]} : vector<16x3072xf32> to vector<16x384xf32>
    %cst_62 = arith.constant dense<0.000000e+00> : vector<16xf32>
    %73 = vector.multi_reduction <add>, %72, %cst_62 [1] : vector<16x384xf32> to vector<16xf32>
    %74 = vector.shape_cast %73 : vector<16xf32> to vector<16x1xf32>
    %c0_63 = arith.constant 0 : index
    %c3 = arith.constant 3 : index
    %75 = vector.load %arg11[%c0_63, %c3] : memref<16x8xf32, #tpu.memory_space<vmem>>, vector<16x1xf32>
    tpu.vector_store %arg11[%c0_63, %c3], %74 {strides = array<i32>} : memref<16x8xf32, #tpu.memory_space<vmem>>, vector<16x1xf32>,
    %76 = vector.extract_strided_slice %59 {offsets = [0, 1536], sizes = [16, 384], strides = [1, 1]} : vector<16x3072xf32> to vector<16x384xf32>
    %cst_64 = arith.constant dense<0.000000e+00> : vector<16xf32>
    %77 = vector.multi_reduction <add>, %76, %cst_64 [1] : vector<16x384xf32> to vector<16xf32>
    %78 = vector.shape_cast %77 : vector<16xf32> to vector<16x1xf32>
    %c0_65 = arith.constant 0 : index
    %c4 = arith.constant 4 : index
    %79 = vector.load %arg11[%c0_65, %c4] : memref<16x8xf32, #tpu.memory_space<vmem>>, vector<16x1xf32>
    tpu.vector_store %arg11[%c0_65, %c4], %78 {strides = array<i32>} : memref<16x8xf32, #tpu.memory_space<vmem>>, vector<16x1xf32>,
    %80 = vector.extract_strided_slice %59 {offsets = [0, 1920], sizes = [16, 384], strides = [1, 1]} : vector<16x3072xf32> to vector<16x384xf32>
    %cst_66 = arith.constant dense<0.000000e+00> : vector<16xf32>
    %81 = vector.multi_reduction <add>, %80, %cst_66 [1] : vector<16x384xf32> to vector<16xf32>
    %82 = vector.shape_cast %81 : vector<16xf32> to vector<16x1xf32>
    %c0_67 = arith.constant 0 : index
    %c5 = arith.constant 5 : index
    %83 = vector.load %arg11[%c0_67, %c5] : memref<16x8xf32, #tpu.memory_space<vmem>>, vector<16x1xf32>
    tpu.vector_store %arg11[%c0_67, %c5], %82 {strides = array<i32>} : memref<16x8xf32, #tpu.memory_space<vmem>>, vector<16x1xf32>,
    %84 = vector.extract_strided_slice %59 {offsets = [0, 2304], sizes = [16, 384], strides = [1, 1]} : vector<16x3072xf32> to vector<16x384xf32>
    %cst_68 = arith.constant dense<0.000000e+00> : vector<16xf32>
    %85 = vector.multi_reduction <add>, %84, %cst_68 [1] : vector<16x384xf32> to vector<16xf32>
    %86 = vector.shape_cast %85 : vector<16xf32> to vector<16x1xf32>
    %c0_69 = arith.constant 0 : index
    %c6 = arith.constant 6 : index
    %87 = vector.load %arg11[%c0_69, %c6] : memref<16x8xf32, #tpu.memory_space<vmem>>, vector<16x1xf32>
    tpu.vector_store %arg11[%c0_69, %c6], %86 {strides = array<i32>} : memref<16x8xf32, #tpu.memory_space<vmem>>, vector<16x1xf32>,
    %88 = vector.extract_strided_slice %59 {offsets = [0, 2688], sizes = [16, 384], strides = [1, 1]} : vector<16x3072xf32> to vector<16x384xf32>
    %cst_70 = arith.constant dense<0.000000e+00> : vector<16xf32>
    %89 = vector.multi_reduction <add>, %88, %cst_70 [1] : vector<16x384xf32> to vector<16xf32>
    %90 = vector.shape_cast %89 : vector<16xf32> to vector<16x1xf32>
    %c0_71 = arith.constant 0 : index
    %c7 = arith.constant 7 : index
    %91 = vector.load %arg11[%c0_71, %c7] : memref<16x8xf32, #tpu.memory_space<vmem>>, vector<16x1xf32>
    tpu.vector_store %arg11[%c0_71, %c7], %90 {strides = array<i32>} : memref<16x8xf32, #tpu.memory_space<vmem>>, vector<16x1xf32>,
    %c0_72 = arith.constant 0 : index
    %c0_73 = arith.constant 0 : index
    %92 = vector.load %arg11[%c0_72, %c0_73] : memref<16x8xf32, #tpu.memory_space<vmem>>, vector<16x8xf32>
    %cst_74 = arith.constant 3.906250e-03 : f32
    %93 = vector.broadcast %cst_74 : f32 to vector<16x8xf32>
    %94 = arith.mulf %92, %93 : vector<16x8xf32>
    %c0_75 = arith.constant 0 : index
    %c0_76 = arith.constant 0 : index
    %95 = vector.load %arg6[%c0_75, %c0_76] : memref<8x16xf32, #tpu.memory_space<vmem>>, vector<8x16xf32>
    %cst_77 = arith.constant dense<0.000000e+00> : vector<8x8xf32>
    %96 = tpu.matmul %95, %94, %cst_77 {dimension_numbers = #tpu.dot_dimension_numbers<[1], [0], [0], [1], [0, 0, 1, 1], [], []>} : vector<8x16xf32>, vector<16x8xf32>, vector<8x8xf32> -> vector<8x8xf32>
    %c0_78 = arith.constant 0 : index
    %c0_79 = arith.constant 0 : index
    %97 = vector.load %arg7[%c0_78, %c0_79] : memref<8x1xf32, #tpu.memory_space<vmem>>, vector<8x1xf32>
    %98 = vector.broadcast %97 : vector<8x1xf32> to vector<8x8xf32>
    %99 = arith.addf %96, %98 : vector<8x8xf32>
    %c0_80 = arith.constant 0 : index
    %c0_81 = arith.constant 0 : index
    %c0_82 = arith.constant 0 : index
    %100 = vector.load %arg9[%c0_80, %c0_81, %c0_82] : memref<1x8x8xf32, #tpu.memory_space<vmem>>, vector<1x8x8xf32>
    %101 = vector.shape_cast %100 : vector<1x8x8xf32> to vector<8x8xf32>
    %102 = vector.shape_cast %99 : vector<8x8xf32> to vector<1x8x8xf32>
    tpu.vector_store %arg9[%c0_80, %c0_81, %c0_82], %102 {strides = array<i32>} : memref<1x8x8xf32, #tpu.memory_space<vmem>>, vector<1x8x8xf32>,
    return
  }
  func.func @transform_0(%arg0: i32) -> (i32, i32, i32) {
    %c0_i32 = arith.constant 0 : i32
    %c0_i32_0 = arith.constant 0 : i32
    %c0_i32_1 = arith.constant 0 : i32
    return %arg0, %c0_i32, %c0_i32_0 : i32, i32, i32
  }
  func.func @transform_1(%arg0: i32) -> (i32, i32) {
    %c0_i32 = arith.constant 0 : i32
    %c0_i32_0 = arith.constant 0 : i32
    %c0_i32_1 = arith.constant 0 : i32
    return %c0_i32, %c0_i32_0 : i32, i32
  }
  func.func @transform_2(%arg0: i32) -> (i32, i32) {
    %c0_i32 = arith.constant 0 : i32
    %c0_i32_0 = arith.constant 0 : i32
    %c0_i32_1 = arith.constant 0 : i32
    return %c0_i32, %c0_i32_0 : i32, i32
  }
  func.func @transform_3(%arg0: i32) -> (i32, i32) {
    %c0_i32 = arith.constant 0 : i32
    %c0_i32_0 = arith.constant 0 : i32
    %c0_i32_1 = arith.constant 0 : i32
    return %c0_i32, %c0_i32_0 : i32, i32
  }
  func.func @transform_4(%arg0: i32) -> (i32, i32) {
    %c0_i32 = arith.constant 0 : i32
    %c0_i32_0 = arith.constant 0 : i32
    %c0_i32_1 = arith.constant 0 : i32
    return %c0_i32, %c0_i32_0 : i32, i32
  }
  func.func @transform_5(%arg0: i32) -> (i32, i32) {
    %c0_i32 = arith.constant 0 : i32
    %c0_i32_0 = arith.constant 0 : i32
    %c0_i32_1 = arith.constant 0 : i32
    return %c0_i32, %c0_i32_0 : i32, i32
  }
  func.func @transform_6(%arg0: i32) -> (i32, i32) {
    %c0_i32 = arith.constant 0 : i32
    %c0_i32_0 = arith.constant 0 : i32
    %c0_i32_1 = arith.constant 0 : i32
    return %c0_i32, %c0_i32_0 : i32, i32
  }
  func.func @transform_7(%arg0: i32) -> (i32, i32) {
    %c0_i32 = arith.constant 0 : i32
    %c0_i32_0 = arith.constant 0 : i32
    %c0_i32_1 = arith.constant 0 : i32
    return %c0_i32, %c0_i32_0 : i32, i32
  }
  func.func @transform_8(%arg0: i32) -> (i32, i32, i32) {
    %c0_i32 = arith.constant 0 : i32
    %c0_i32_0 = arith.constant 0 : i32
    %c0_i32_1 = arith.constant 0 : i32
    return %arg0, %c0_i32, %c0_i32_0 : i32, i32, i32
  }
}

</mosaic_0001>

<bundles_post_ra>
// kernel: backbone_wrapper_forward.1
= control target key start
LH: loop header
LB: loop body
LE: loop exit
PB: predicated region body
PF: predicated region fallthrough
CT: control target
= control target key end

     0   :  { %s5389_s27 = smov 0   ;;  %s8696_s0 = inlined_call_operand.vmem [shape: bf16[2,8,3072], index: 0, kind: input, shape index: {}]   ;;  %s8697_s1 = inlined_call_operand.vmem [shape: bf16[8,72], index: 1, kind: input, shape index: {}]   ;;  %s8698_s2 = inlined_call_operand.vmem [shape: f32[8,1], index: 2, kind: input, shape index: {}]   ;;  %s8699_s3 = inlined_call_operand.vmem [shape: bf16[16,72], index: 3, kind: input, shape index: {}]   ;;  %s8700_s4 = inlined_call_operand.vmem [shape: f32[16,1], index: 4, kind: input, shape index: {}]   ;;  %s8701_s5 = inlined_call_operand.vmem [shape: f32[8,16], index: 5, kind: input, shape index: {}]   ;;  %s8702_s6 = inlined_call_operand.vmem [shape: f32[8,1], index: 6, kind: input, shape index: {}]   ;;  %s8703_s7 = inlined_call_operand.vmem [shape: f32[1,3072], index: 7, kind: input, shape index: {}]   ;;  %s8704_s8 = inlined_call_operand.vmem [shape: f32[2,8,8], index: 8, kind: output, shape index: {}]  }
   0x1 LB: > { %s4291_s28 = sadd.s32 4294967295, %s5330_s27   ;;  %p4295_p0 = scmp.ge.s32.totalorder %s5330_s27, 1  ;;  %s5330_s27 = sphi %s5389_s27, %s18_s27  }
   0x2   : > { %p262_p1 = scmp.lt.s32.totalorder %s5330_s27, 3 }
   0x4   : > { %p263_p2 = pnand %p4295_p0, %p262_p1 }
   0x6   : > { %266 = sbr.rel (%p263_p2) target bundleno = 1440 (0x5a0), region = 52 }
   0xd   : > { %p295_p3 = scmp.lt.s32.totalorder %s4291_s28, 1  ;;  %s5332_s11 = smov 19   ;;  %v8733_v16 = vmov 0   ;;  %v8705_v56 = vlaneseq  ;;  %vm1493_vm8 = vcmask 1043456   ;;  %vm1489_vm9 = vcmask 588800  }
   0xe   : > { %s5333_s12 = smov 18   ;;  %s5334_s13 = smov 17   ;;  %1639 = vmatprep.mubr.bf16.mxu1 %v8733_v16  ;;  %1598 = vmatprep.mubr.bf16.mxu0 %v8733_v16  ;;  %vm5342_vm10 = vmmov 0   ;;  %vm4071_vm11 = vcmask 7168   ;;  %vm4082_vm12 = vcmask 15368   ;;  %vm4093_vm13 = vcmask 23568  }
   0xf   : > { %s9318_s28 = smov (!%p295_p3, %s4291_s28), 1  ;;  %s5335_s14 = smov 1   ;;  %4864 = vset.pattern.permute.xlu0 %v8733_v16  ;;  %5320 = vset.pattern.permute.xlu1 %v8733_v16  ;;  %v5582_v60 = vand.u32 127, %v8705_v56  ;;  %vm4104_vm14 = vcmask 31768   ;;  %vm4115_vm15 = vcmask 39968  }
  0x10   : > { %s4363_s29 = smul.u32 96, %s9318_s28  ;;  %s5336_s15 = smov 127  }
  0x11   : > { %s5337_s16 = smov 111   ;;  %s5338_s17 = smov 110   ;;  %vm394_vm0 = vcmp.lt.s32.totalorder %v5582_v60, 19  ;;  %vm491_vm1 = vcmp.lt.s32.totalorder %v5582_v60, 18  ;;  %vm588_vm2 = vcmp.lt.s32.totalorder %v5582_v60, 17  ;;  %vm685_vm3 = vcmp.lt.s32.totalorder %v5582_v60, 1 }
  0x12   : > { %s5403_s10 = scalar_lea.vmem %s8696_s0, %s4363_s29  ;;  %s5340_s18 = smov 109   ;;  %vm806_vm4 = vcmp.lt.s32.totalorder %v5582_v60, 127  ;;  %vm903_vm5 = vcmp.lt.s32.totalorder %v5582_v60, 111  ;;  %vm1000_vm6 = vcmp.lt.s32.totalorder %v5582_v60, 110  ;;  %vm1097_vm7 = vcmp.lt.s32.totalorder %v5582_v60, 109 }
  0x13   : > { %v309_v0 = vld [vmem:[%s5403_s10 + $0x8] sm:$0xff]  ;;  %v5407_v1 = vld [vmem:[%s5403_s10] sm:$0xff]  ;;  %v311_v2 = vld [vmem:[%s5403_s10 + $0x18] sm:$0xff]  ;;  %s4297_s23 = sshll.u32 %s9318_s28, 3 }
  0x14   : > { %v5410_v3 = vunpack.c.l.bf16 %v309_v0  ;;  %v5412_v4 = vunpack.c.h.bf16 %v309_v0  ;;  %v5415_v5 = vunpack.c.h.bf16 %v5407_v1  ;;  %v5417_v6 = vunpack.c.l.bf16 %v311_v2  ;;  %v310_v9 = vld [vmem:[%s5403_s10 + $0x10] sm:$0xff]  ;;  %v312_v18 = vld [vmem:[%s5403_s10 + $0x20] sm:$0xff]  ;;  %v313_v21 = vld [vmem:[%s5403_s10 + $0x28] sm:$0xff]  ;;  %s303_s26 = scalar_lea.vmem %s8704_s8, %s4297_s23 }
  0x15   : > { %v5428_v10 = vunpack.c.h.bf16 %v311_v2  ;;  %v5432_v11 = vunpack.c.l.bf16 %v310_v9  ;;  %v5448_v15 = vunpack.c.h.bf16 %v310_v9  ;;  %v5461_v19 = vunpack.c.l.bf16 %v312_v18  ;;  %v315_v25 = vld [vmem:[%s5403_s10 + $0x38] sm:$0xff]  ;;  %v314_v30 = vld [vmem:[%s5403_s10 + $0x30] sm:$0xff]  ;;  %v316_v38 = vld [vmem:[%s5403_s10 + $0x40] sm:$0xff] }
  0x16   : > { %v4384_v7 = vpack.i.bf16 %v5412_v4, %v5410_v3  ;;  %v4394_v8 = vpack.i.bf16 %v5417_v6, %v5415_v5  ;;  %v5472_v23 = vunpack.c.l.bf16 %v313_v21  ;;  %v5474_v24 = vunpack.c.h.bf16 %v313_v21  ;;  %v317_v41 = vld [vmem:[%s5403_s10 + $0x48] sm:$0xff]  ;;  %v318_v49 = vld [vmem:[%s5403_s10 + $0x50] sm:$0xff]  ;;  %v319_v51 = vld [vmem:[%s5403_s10 + $0x58] sm:$0xff] }
  0x17   : > { %v4424_v12 = vpack.i.bf16 %v5432_v11, %v5412_v4  ;;  %v4429_v13 = vpack.i.bf16 %v5428_v10, %v5410_v3  ;;  %v4459_v14 = vpack.i.bf16 %v5417_v6, %v5432_v11  ;;  %v4464_v17 = vpack.i.bf16 %v5448_v15, %v5428_v10 }
  0x18   : > { %4385 = vrot.lane.b32.xlu0 %v4384_v7, %s5332_s11  ;;  %4395 = vrot.lane.b32.xlu1 %v4394_v8, %s5332_s11  ;;  %v4484_v20 = vpack.i.bf16 %v5417_v6, %v5461_v19  ;;  %v4499_v22 = vpack.i.bf16 %v5461_v19, %v5428_v10  ;;  %v4504_v26 = vpack.i.bf16 %v5474_v24, %v5472_v23  ;;  %v5481_v27 = vunpack.c.h.bf16 %v312_v18 }
  0x19   : > { %v5483_v28 = vunpack.c.l.bf16 %v315_v25  ;;  %v5494_v31 = vunpack.c.l.bf16 %v314_v30  ;;  %v5496_v32 = vunpack.c.h.bf16 %v315_v25  ;;  %v5512_v36 = vunpack.c.h.bf16 %v314_v30 }
  0x1a   : > { %v5521_v39 = vunpack.c.l.bf16 %v316_v38  ;;  %v5532_v43 = vunpack.c.l.bf16 %v317_v41  ;;  %v5534_v44 = vunpack.c.h.bf16 %v317_v41  ;;  %v5537_v45 = vunpack.c.l.bf16 %v5407_v1 }
  0x1b   : > { %v4514_v29 = vpack.i.bf16 %v5483_v28, %v5481_v27  ;;  %8950 = vst [vmem:[#allocation4_spill] sm:$0xff] %v5494_v31  ;;  %v4544_v33 = vpack.i.bf16 %v5494_v31, %v5474_v24  ;;  %v4549_v34 = vpack.i.bf16 %v5496_v32, %v5472_v23  ;;  %v4579_v35 = vpack.i.bf16 %v5483_v28, %v5494_v31 }
  0x1c   : > { %4390 = vrot.lane.b32.xlu0 %v4384_v7, %s5333_s12  ;;  %4400 = vrot.lane.b32.xlu1 %v4394_v8, %s5333_s12  ;;  %8951 = vst [vmem:[#allocation5_spill] sm:$0xff] %v5512_v36  ;;  %v4584_v37 = vpack.i.bf16 %v5512_v36, %v5496_v32  ;;  %8952 = vst [vmem:[#allocation6_spill] sm:$0xff] %v5521_v39  ;;  %v4604_v40 = vpack.i.bf16 %v5483_v28, %v5521_v39  ;;  %v5545_v47 = vunpack.c.h.bf16 %v316_v38 }
  0x1d   : > { %v4619_v42 = vpack.i.bf16 %v5521_v39, %v5496_v32  ;;  %v5543_v46 = vpack.i.bf16 %v5534_v44, %v5532_v43  ;;  %v5560_v50 = vunpack.c.l.bf16 %v318_v49  ;;  %v4669_v52 = vpack.i.bf16 %v5415_v5, %v5532_v43 }
  0x1e   : > { %8953 = vst [vmem:[#allocation7_spill] sm:$0xff] %v5545_v47  ;;  %v4639_v48 = vpack.i.bf16 %v5537_v45, %v5545_v47  ;;  %v5569_v54 = vunpack.c.l.bf16 %v319_v51  ;;  %v5571_v55 = vunpack.c.h.bf16 %v319_v51 }
  0x1f   : > { %8954 = vst [vmem:[#allocation8_spill] sm:$0xff] %v5560_v50  ;;  %v4664_v53 = vpack.i.bf16 %v5560_v50, %v5534_v44  ;;  %v4719_v41 = vpack.i.bf16 %v5537_v45, %v5560_v50 }
  0x20   : > { %4405 = vrot.lane.b32.xlu0 %v4384_v7, %s5334_s13  ;;  %4410 = vrot.lane.b32.xlu1 %v4384_v7, %s5335_s14  ;;  %v4679_v57 = vpack.i.bf16 %v5569_v54, %v5571_v55 }
  0x24   : > { %4415 = vrot.lane.b32.xlu0 %v4394_v8, %s5334_s13  ;;  %4420 = vrot.lane.b32.xlu1 %v4394_v8, %s5335_s14 }
  0x28   : > { %4425 = vrot.lane.b32.xlu0 %v4424_v12, %s5336_s15  ;;  %4430 = vrot.lane.b32.xlu1 %v4429_v13, %s5336_s15 }
  0x2c   : > { %4435 = vrot.lane.b32.xlu0 %v4424_v12, %s5337_s16  ;;  %4440 = vrot.lane.b32.xlu1 %v4424_v12, %s5338_s17 }
  0x30   : > { %4445 = vrot.lane.b32.xlu0 %v4429_v13, %s5337_s16  ;;  %4450 = vrot.lane.b32.xlu1 %v4429_v13, %s5338_s17 }
  0x34   : > { %4455 = vrot.lane.b32.xlu0 %v4384_v7, %s5340_s18  ;;  %4460 = vrot.lane.b32.xlu1 %v4459_v14, %s5340_s18 }
  0x38   : > { %4465 = vrot.lane.b32.xlu0 %v4464_v17, %s5332_s11  ;;  %4470 = vrot.lane.b32.xlu1 %v4464_v17, %s5333_s12 }
  0x3c   : > { %4475 = vrot.lane.b32.xlu0 %v4464_v17, %s5334_s13  ;;  %4480 = vrot.lane.b32.xlu1 %v4464_v17, %s5335_s14 }
  0x40   : > { %4485 = vrot.lane.b32.xlu0 %v4484_v20, %s5336_s15  ;;  %4490 = vrot.lane.b32.xlu1 %v4484_v20, %s5337_s16 }
  0x44   : > { %4495 = vrot.lane.b32.xlu0 %v4484_v20, %s5338_s17  ;;  %4500 = vrot.lane.b32.xlu1 %v4499_v22, %s5340_s18 }
  0x48   : > { %4505 = vrot.lane.b32.xlu0 %v4504_v26, %s5332_s11  ;;  %4510 = vrot.lane.b32.xlu1 %v4504_v26, %s5333_s12 }
  0x4c   : > { %4515 = vrot.lane.b32.xlu0 %v4514_v29, %s5332_s11  ;;  %4520 = vrot.lane.b32.xlu1 %v4514_v29, %s5333_s12 }
  0x50   : > { %4525 = vrot.lane.b32.xlu0 %v4504_v26, %s5334_s13  ;;  %4530 = vrot.lane.b32.xlu1 %v4504_v26, %s5335_s14 }
  0x54   : > { %4535 = vrot.lane.b32.xlu0 %v4514_v29, %s5334_s13  ;;  %4540 = vrot.lane.b32.xlu1 %v4514_v29, %s5335_s14 }
  0x58   : > { %4545 = vrot.lane.b32.xlu0 %v4544_v33, %s5336_s15  ;;  %4550 = vrot.lane.b32.xlu1 %v4549_v34, %s5336_s15 }
  0x5c   : > { %4555 = vrot.lane.b32.xlu0 %v4544_v33, %s5337_s16  ;;  %4560 = vrot.lane.b32.xlu1 %v4544_v33, %s5338_s17 }
  0x60   : > { %4565 = vrot.lane.b32.xlu0 %v4549_v34, %s5337_s16  ;;  %4570 = vrot.lane.b32.xlu1 %v4549_v34, %s5338_s17 }
  0x64   : > { %4575 = vrot.lane.b32.xlu0 %v4504_v26, %s5340_s18  ;;  %4580 = vrot.lane.b32.xlu1 %v4579_v35, %s5340_s18 }
  0x68   : > { %4585 = vrot.lane.b32.xlu0 %v4584_v37, %s5332_s11  ;;  %4590 = vrot.lane.b32.xlu1 %v4584_v37, %s5333_s12 }
  0x6c   : > { %4595 = vrot.lane.b32.xlu0 %v4584_v37, %s5334_s13  ;;  %4600 = vrot.lane.b32.xlu1 %v4584_v37, %s5335_s14 }
  0x70   : > { %4605 = vrot.lane.b32.xlu0 %v4604_v40, %s5336_s15  ;;  %4610 = vrot.lane.b32.xlu1 %v4604_v40, %s5337_s16 }
  0x74   : > { %4615 = vrot.lane.b32.xlu0 %v4604_v40, %s5338_s17  ;;  %4620 = vrot.lane.b32.xlu1 %v4619_v42, %s5340_s18  ;;  %v5645_v42 = vunpack.c.h.bf16 %v318_v49 }
  0x76   : > { %8955 = vst [vmem:[#allocation9_spill] sm:$0xff] %v5645_v42 }
  0x78   : > { %4625 = vrot.lane.b32.xlu0 %v5543_v46, %s5332_s11  ;;  %4630 = vrot.lane.b32.xlu1 %v5543_v46, %s5333_s12 }
  0x7c   : > { %4640 = vrot.lane.b32.xlu1 %v4639_v48, %s5333_s12  ;;  %4635 = vrot.lane.b32.xlu0 %v4639_v48, %s5332_s11 }
  0x80   : > { %4650 = vrot.lane.b32.xlu1 %v5543_v46, %s5335_s14  ;;  %4645 = vrot.lane.b32.xlu0 %v5543_v46, %s5334_s13 }
  0x84   : > { %4660 = vrot.lane.b32.xlu1 %v4639_v48, %s5335_s14  ;;  %4655 = vrot.lane.b32.xlu0 %v4639_v48, %s5334_s13 }
  0x88   : > { %4670 = vrot.lane.b32.xlu1 %v4669_v52, %s5336_s15  ;;  %4665 = vrot.lane.b32.xlu0 %v4664_v53, %s5336_s15 }
  0x8a   : > { %v5577_v58 = vpop.permute.xlu0 %4385  ;;  %v5579_v59 = vpop.permute.xlu1 %4395 }
  0x8b   : > { %v8713_v61 = vunpack.i.h.bf16 %v5577_v58  ;;  %v4387_v62 = vunpack.i.l.bf16 %v5577_v58  ;;  %v8730_v63 = vunpack.i.l.bf16 %v5579_v59 }
  0x8c   : > { %4680 = vrot.lane.b32.xlu1 %v4679_v57, %s5333_s12  ;;  %4675 = vrot.lane.b32.xlu0 %v4679_v57, %s5332_s11 }
  0x8d   : > { %v415_v9 = vsel %vm394_vm0, %v4387_v62, %v8713_v61  ;;  %v416_v13 = vsel %vm394_vm0, %v8730_v63, %v4387_v62  ;;  %v4769_v61 = vpack.i.bf16 %v5448_v15, %v5569_v54 }
  0x8e   : > { %v5589_v0 = vpop.permute.xlu0 %4390  ;;  %v5591_v1 = vpop.permute.xlu1 %4400 }
  0x8f   : > { %v8712_v2 = vunpack.i.h.bf16 %v5589_v0  ;;  %v4392_v7 = vunpack.i.l.bf16 %v5589_v0  ;;  %v8729_v8 = vunpack.i.l.bf16 %v5591_v1 }
  0x90   : > { %4690 = vrot.lane.b32.xlu1 %v4664_v53, %s5338_s17  ;;  %4685 = vrot.lane.b32.xlu0 %v4664_v53, %s5337_s16 }
  0x91   : > { %v512_v12 = vsel %vm491_vm1, %v4392_v7, %v8712_v2  ;;  %v513_v14 = vsel %vm491_vm1, %v8729_v8, %v4392_v7 }
  0x92   : > { %v5616_v17 = vpop.permute.xlu0 %4405  ;;  %v5618_v18 = vpop.permute.xlu1 %4410  ;;  %v1366_v20 = vpack.c.bf16 %v512_v12, %v415_v9  ;;  %v1365_v21 = vpack.c.bf16 %v513_v14, %v416_v13  ;;  %v4729_v9 = vpack.i.bf16 %v5432_v11, %v5645_v42  ;;  %v4724_v13 = vpack.i.bf16 %v5571_v55, %v5537_v45 }
  0x93   : > { %v8711_v22 = vunpack.i.h.bf16 %v5616_v17  ;;  %v4407_v25 = vunpack.i.l.bf16 %v5616_v17  ;;  %v8709_v26 = vunpack.i.h.bf16 %v5618_v18  ;;  %v4412_v29 = vunpack.i.l.bf16 %v5618_v18 }
  0x94   : > { %1607 = vmatprep.subr.bf16.mxu1 %v1366_v20  ;;  %4700 = vrot.lane.b32.xlu1 %v4669_v52, %s5338_s17 }
  0x95   : > { %4695 = vrot.lane.b32.xlu0 %v4669_v52, %s5337_s16  ;;  %1608 = vmatpush1.bf16.msra.mxu1 %v1365_v21  ;;  %v609_v30 = vsel %vm588_vm2, %v4407_v25, %v8711_v22  ;;  %v706_v33 = vsel %vm685_vm3, %v4412_v29, %v8709_v26 }
  0x96   : > { %v5636_v34 = vpop.permute.xlu0 %4415  ;;  %v5638_v35 = vpop.permute.xlu1 %4420  ;;  %v1390_v37 = vpack.c.bf16 %v706_v33, %v609_v30 }
  0x97   : > { %v8725_v38 = vunpack.i.l.bf16 %v5636_v34  ;;  %v8721_v40 = vunpack.i.l.bf16 %v5638_v35 }
  0x98   : > { %1609 = vmatprep.subr.bf16.mxu1 %v1390_v37  ;;  %4710 = vrot.lane.b32.xlu1 %v4679_v57, %s5335_s14 }
  0x99   : > { %4705 = vrot.lane.b32.xlu0 %v4679_v57, %s5334_s13  ;;  %v610_v48 = vsel %vm588_vm2, %v8725_v38, %v4407_v25  ;;  %v707_v51 = vsel %vm685_vm3, %v8721_v40, %v4412_v29  ;;  %v4779_v40 = vpack.i.bf16 %v5448_v15, %v5571_v55 }
  0x9a   : > { %v5656_v52 = vpop.permute.xlu0 %4425  ;;  %v5658_v53 = vpop.permute.xlu1 %4430  ;;  %v1389_v62 = vpack.c.bf16 %v707_v51, %v610_v48 }
  0x9b   : > { %v8708_v49 = vunpack.i.h.bf16 %v5656_v52  ;;  %v4427_v57 = vunpack.i.l.bf16 %v5656_v52  ;;  %v8720_v7 = vunpack.i.l.bf16 %v5658_v53 }
  0x9c   : > { %1610 = vmatpush1.bf16.msra.mxu1 %v1389_v62  ;;  %4720 = vrot.lane.b32.xlu1 %v4719_v41, %s5340_s18 }
  0x9d   : > { %4715 = vrot.lane.b32.xlu0 %v5543_v46, %s5340_s18  ;;  %v826_v12 = vsel %vm806_vm4, %v4427_v57, %v8708_v49  ;;  %v827_v14 = vsel %vm806_vm4, %v8720_v7, %v4427_v57 }
  0x9e   : > { %v5679_v20 = vpop.permute.xlu0 %4435  ;;  %v5681_v21 = vpop.permute.xlu1 %4440  ;;  %v1414_v25 = vpack.c.bf16 %v826_v12, %v5412_v4  ;;  %v1413_v46 = vpack.c.bf16 %v827_v14, %v5410_v3 }
  0x9f   : > { %v8706_v29 = vunpack.i.h.bf16 %v5679_v20  ;;  %v4437_v30 = vunpack.i.l.bf16 %v5679_v20  ;;  %v8707_v33 = vunpack.i.h.bf16 %v5681_v21  ;;  %v4442_v37 = vunpack.i.l.bf16 %v5681_v21 }
  0xa0   : > { %1611 = vmatprep.subr.bf16.mxu1 %v1414_v25  ;;  %4730 = vrot.lane.b32.xlu1 %v4729_v9, %s5332_s11 }
  0xa1   : > { %4725 = vrot.lane.b32.xlu0 %v4724_v13, %s5336_s15  ;;  %1612 = vmatpush1.bf16.msra.mxu1 %v1413_v46  ;;  %v923_v3 = vsel %vm903_vm5, %v4437_v30, %v8706_v29  ;;  %v1020_v4 = vsel %vm1000_vm6, %v4442_v37, %v8707_v33 }
  0xa2   : > { %v5701_v41 = vpop.permute.xlu0 %4445  ;;  %v5703_v48 = vpop.permute.xlu1 %4450  ;;  %v1438_v51 = vpack.c.bf16 %v1020_v4, %v923_v3 }
  0xa3   : > { %v8718_v62 = vunpack.i.l.bf16 %v5701_v41  ;;  %v8719_v57 = vunpack.i.l.bf16 %v5703_v48 }
  0xa4   : > { %1613 = vmatprep.subr.bf16.mxu1 %v1438_v51  ;;  %4740 = vrot.lane.b32.xlu1 %v4724_v13, %s5337_s16 }
  0xa5   : > { %4735 = vrot.lane.b32.xlu0 %v4729_v9, %s5333_s12  ;;  %v924_v12 = vsel %vm903_vm5, %v8718_v62, %v4437_v30  ;;  %v1021_v14 = vsel %vm1000_vm6, %v8719_v57, %v4442_v37  ;;  %v4759_v30 = vpack.i.bf16 %v5569_v54, %v5415_v5 }
  0xa6   : > { %v5717_v25 = vpop.permute.xlu0 %4455  ;;  %v5719_v46 = vpop.permute.xlu1 %4460  ;;  %v1437_v3 = vpack.c.bf16 %v1021_v14, %v924_v12  ;;  %v4398_v14 = vunpack.i.h.bf16 %v5579_v59 }
  0xa7   : > { %v4458_v4 = vunpack.i.h.bf16 %v5717_v25  ;;  %v8715_v51 = vunpack.i.l.bf16 %v5717_v25  ;;  %v8710_v56 = vunpack.i.l.bf16 %v5719_v46 }
  0xa8   : > { %1614 = vmatpush1.bf16.msra.mxu1 %v1437_v3  ;;  %4750 = vrot.lane.b32.xlu1 %v4729_v9, %s5334_s13  ;;  %v4403_v3 = vunpack.i.h.bf16 %v5591_v1 }
  0xa9   : > { %4745 = vrot.lane.b32.xlu0 %v4724_v13, %s5338_s17  ;;  %v1117_v37 = vsel %vm1097_vm7, %v4458_v4, %v8710_v56  ;;  %v1118_v12 = vsel %vm1097_vm7, %v8715_v51, %v4458_v4 }
  0xaa   : > { %v5739_v29 = vpop.permute.xlu0 %4465  ;;  %v5741_v33 = vpop.permute.xlu1 %4470  ;;  %v1462_v13 = vpack.c.bf16 %v1117_v37, %v1117_v37  ;;  %v1461_v49 = vpack.c.bf16 %v1118_v12, %v1118_v12 }
  0xab   : > { %v8714_v26 = vunpack.i.h.bf16 %v5739_v29  ;;  %v8717_v56 = vunpack.i.l.bf16 %v5739_v29  ;;  %v8716_v22 = vunpack.i.h.bf16 %v5741_v33  ;;  %v8722_v2 = vunpack.i.l.bf16 %v5741_v33 }
  0xac   : > { %4300 = vmatprep.subr.msk.bf16.mxu1 %vm1493_vm8, %v1462_v13  ;;  %4760 = vrot.lane.b32.xlu1 %v4759_v30, %s5340_s18  ;;  %v1501_v4 = vsel %vm1493_vm8, %v1461_v49, 0  ;;  %v5768_v30 = vld [vmem:[%s8697_s1] sm:$0xf]  ;;  %v4418_v13 = vunpack.i.h.bf16 %v5636_v34 }
  0xad   : > { %v412_v37 = vsel %vm394_vm0, %v8714_v26, %v4398_v14  ;;  %v509_v12 = vsel %vm491_vm1, %v8716_v22, %v4403_v3  ;;  %4755 = vrot.lane.b32.xlu0 %v4729_v9, %s5335_s14  ;;  %1616 = vmatpush1.bf16.msra.mxu1 %v1501_v4  ;;  %v411_v49 = vsel %vm394_vm0, %v4398_v14, %v8717_v56  ;;  %v4423_v26 = vunpack.i.h.bf16 %v5638_v35 }
  0xae   : > { %v5772_v51 = vpop.permute.xlu0 %4475  ;;  %v5774_v22 = vpop.permute.xlu1 %4480  ;;  %v508_v9 = vsel %vm491_vm1, %v4403_v3, %v8722_v2  ;;  %v1369_v14 = vpack.c.bf16 %v509_v12, %v412_v37 }
  0xaf   : > { %v8723_v4 = vunpack.i.h.bf16 %v5772_v51  ;;  %v8726_v56 = vunpack.i.l.bf16 %v5772_v51  ;;  %v8724_v62 = vunpack.i.h.bf16 %v5774_v22  ;;  %v8727_v57 = vunpack.i.l.bf16 %v5774_v22 }
  0xb0   : > { %v1370_v7 = vpack.c.bf16 %v508_v9, %v411_v49  ;;  %4770 = vrot.lane.b32.xlu1 %v4769_v61, %s5337_s16  ;;  %4301 = vmatmul.mubr.msk.bf16.vlgmr.msra.gmra.mrb[0].mxu1 %vm1489_vm9, %v5768_v30 }
  0xb1   : > { %v606_v3 = vsel %vm588_vm2, %v8723_v4, %v4418_v13  ;;  %v703_v37 = vsel %vm685_vm3, %v8724_v62, %v4423_v26  ;;  %4765 = vrot.lane.b32.xlu0 %v4769_v61, %s5336_s15  ;;  %v605_v12 = vsel %vm588_vm2, %v4418_v13, %v8726_v56  ;;  %v702_v49 = vsel %vm685_vm3, %v4423_v26, %v8727_v57 }
  0xb2   : > { %1689 = vmatprep.subr.bf16.mxu1 %v1370_v7  ;;  %v5806_v9 = vpop.permute.xlu0 %4485  ;;  %v5808_v2 = vpop.permute.xlu1 %4490  ;;  %v1394_v4 = vpack.c.bf16 %v702_v49, %v605_v12  ;;  %1721 = vmatprep.mubr.bf16.mxu1 %v8733_v16  ;;  %v4433_v62 = vunpack.i.h.bf16 %v5658_v53  ;;  %v1393_v56 = vpack.c.bf16 %v703_v37, %v606_v3  ;;  %v4789_v26 = vpack.i.bf16 %v5494_v31, %v5461_v19 }
  0xb3   : > { %1690 = vmatpush1.bf16.msra.mxu1 %v1369_v14  ;;  %v8728_v38 = vunpack.i.h.bf16 %v5806_v9  ;;  %v8731_v13 = vunpack.i.l.bf16 %v5806_v9  ;;  %v8732_v12 = vunpack.i.h.bf16 %v5808_v2  ;;  %v8736_v14 = vunpack.i.l.bf16 %v5808_v2 }
  0xb4   : > { %1691 = vmatprep.subr.bf16.mxu1 %v1394_v4  ;;  %4780 = vrot.lane.b32.xlu1 %v4779_v40, %s5340_s18  ;;  %v4448_v40 = vunpack.i.h.bf16 %v5701_v41  ;;  %v4453_v3 = vunpack.i.h.bf16 %v5703_v48 }
  0xb5   : > { %v823_v7 = vsel %vm806_vm4, %v8728_v38, %v4433_v62  ;;  %4775 = vrot.lane.b32.xlu0 %v4769_v61, %s5338_s17  ;;  %v822_v4 = vsel %vm806_vm4, %v4433_v62, %v8731_v13  ;;  %v8739_v13 = vunpack.i.h.bf16 %v5719_v46 }
  0xb6   : > { %v5830_v37 = vpop.permute.xlu0 %4495  ;;  %v5832_v49 = vpop.permute.xlu1 %4500  ;;  %v1418_v57 = vpack.c.bf16 %v822_v4, %v5428_v10  ;;  %v1417_v38 = vpack.c.bf16 %v823_v7, %v5417_v6  ;;  %v920_v10 = vsel %vm903_vm5, %v8732_v12, %v4448_v40 }
  0xb7   : > { %1692 = vmatpush1.bf16.msra.mxu1 %v1393_v56  ;;  %v8735_v61 = vunpack.i.h.bf16 %v5830_v37  ;;  %v8737_v8 = vunpack.i.l.bf16 %v5830_v37  ;;  %v8738_v63 = vunpack.i.h.bf16 %v5832_v49  ;;  %v4502_v62 = vunpack.i.l.bf16 %v5832_v49 }
  0xb8   : > { %1693 = vmatprep.subr.bf16.mxu1 %v1418_v57  ;;  %4790 = vrot.lane.b32.xlu1 %v4789_v26, %s5333_s12  ;;  %v919_v56 = vsel %vm903_vm5, %v4448_v40, %v8736_v14 }
  0xb9   : > { %v1017_v6 = vsel %vm1000_vm6, %v8735_v61, %v4453_v3  ;;  %4785 = vrot.lane.b32.xlu0 %v4789_v26, %s5332_s11  ;;  %v1016_v57 = vsel %vm1000_vm6, %v4453_v3, %v8737_v8  ;;  %v1113_v61 = vsel %vm1097_vm7, %v4502_v62, %v8738_v63  ;;  %v1114_v40 = vsel %vm1097_vm7, %v8739_v13, %v4502_v62 }
  0xba   : > { %v5859_v7 = vpop.permute.xlu0 %4505  ;;  %v5861_v4 = vpop.permute.xlu1 %4510  ;;  %v1442_v12 = vpack.c.bf16 %v1016_v57, %v919_v56  ;;  %v1441_v16 = vpack.c.bf16 %v1017_v6, %v920_v10  ;;  %v4809_v10 = vpack.i.bf16 %v5512_v36, %v5481_v27  ;;  %v1465_v57 = vpack.c.bf16 %v1114_v40, %v1114_v40 }
  0xbb   : > { %8956 = vst [vmem:[#allocation10_spill] sm:$0xff] %v5859_v7  ;;  %8957 = vst [vmem:[#allocation11_spill] sm:$0xff] %v5861_v4  ;;  %1694 = vmatpush1.bf16.msra.mxu1 %v1417_v38  ;;  %v8740_v14 = vunpack.i.h.bf16 %v5859_v7  ;;  %v4507_v3 = vunpack.i.l.bf16 %v5859_v7  ;;  %v8741_v8 = vunpack.i.h.bf16 %v5861_v4  ;;  %v4512_v56 = vunpack.i.l.bf16 %v5861_v4 }
  0xbc   : > { %1695 = vmatprep.subr.bf16.mxu1 %v1442_v12  ;;  %4800 = vrot.lane.b32.xlu1 %v4789_v26, %s5335_s14  ;;  %v1466_v38 = vpack.c.bf16 %v1113_v61, %v1113_v61  ;;  %v1513_v40 = vsel %vm1493_vm8, %v1465_v57, 0 }
  0xbd   : > { %4795 = vrot.lane.b32.xlu0 %v4789_v26, %s5334_s13  ;;  %v407_v12 = vsel %vm394_vm0, %v4507_v3, %v8740_v14  ;;  %v504_v26 = vsel %vm491_vm1, %v4512_v56, %v8741_v8 }
  0xbe   : > { %v5879_v6 = vpop.permute.xlu0 %4515  ;;  %v5881_v62 = vpop.permute.xlu1 %4520 }
  0xbf   : > { %1696 = vmatpush1.bf16.msra.mxu1 %v1441_v16  ;;  %v8744_v63 = vunpack.i.l.bf16 %v5879_v6  ;;  %v8748_v13 = vunpack.i.l.bf16 %v5881_v62 }
  0xc0   : > { %4304 = vmatprep.subr.msk.bf16.mxu1 %vm1493_vm8, %v1466_v38  ;;  %4810 = vrot.lane.b32.xlu1 %v4809_v10, %s5337_s16  ;;  %v1374_v38 = vpack.c.bf16 %v504_v26, %v407_v12 }
  0xc1   : > { %v408_v16 = vsel %vm394_vm0, %v8744_v63, %v4507_v3  ;;  %v505_v61 = vsel %vm491_vm1, %v8748_v13, %v4512_v56  ;;  %4805 = vrot.lane.b32.xlu0 %v4809_v10, %s5336_s15  ;;  %v4829_v56 = vpack.i.bf16 %v5560_v50, %v5521_v39 }
  0xc2   : > { %v5905_v14 = vpop.permute.xlu0 %4525  ;;  %v5907_v8 = vpop.permute.xlu1 %4530  ;;  %v1373_v31 = vpack.c.bf16 %v505_v61, %v408_v16 }
  0xc3   : > { %8958 = vst [vmem:[#allocation12_spill] sm:$0xff] %v5905_v14  ;;  %8959 = vst [vmem:[#allocation13_spill] sm:$0xff] %v5907_v8  ;;  %1698 = vmatpush1.bf16.msra.mxu1 %v1513_v40  ;;  %v8746_v36 = vunpack.i.h.bf16 %v5905_v14  ;;  %v4527_v3 = vunpack.i.l.bf16 %v5905_v14  ;;  %v8747_v63 = vunpack.i.h.bf16 %v5907_v8  ;;  %v4532_v7 = vunpack.i.l.bf16 %v5907_v8 }
  0xc4   : > { %1771 = vmatprep.subr.bf16.mxu1 %v1374_v38  ;;  %4820 = vrot.lane.b32.xlu1 %v4809_v10, %s5340_s18  ;;  %v8960_v38 = vmov 0  }
  0xc5   : > { %4815 = vrot.lane.b32.xlu0 %v4809_v10, %s5338_s17  ;;  %v601_v57 = vsel %vm588_vm2, %v4527_v3, %v8746_v36  ;;  %v698_v12 = vsel %vm685_vm3, %v4532_v7, %v8747_v63 }
  0xc6   : > { %4305 = vmatmul.mubr.msk.bf16.vlgmr.msra.gmra.mrb[4].mxu1 %vm1489_vm9, %v5768_v30  ;;  %v5927_v26 = vpop.permute.xlu0 %4535  ;;  %v5929_v16 = vpop.permute.xlu1 %4540  ;;  %v1398_v61 = vpack.c.bf16 %v698_v12, %v601_v57 }
  0xc7   : > { %1772 = vmatpush1.bf16.msra.mxu1 %v1373_v31  ;;  %v8751_v10 = vunpack.i.l.bf16 %v5927_v26  ;;  %v8750_v40 = vunpack.i.l.bf16 %v5929_v16  ;;  %1803 = vmatprep.mubr.bf16.mxu1 %v8960_v38 }
  0xc8   : > { %1773 = vmatprep.subr.bf16.mxu1 %v1398_v61  ;;  %4830 = vrot.lane.b32.xlu1 %v4829_v56, %s5333_s12 }
  0xc9   : > { %v602_v36 = vsel %vm588_vm2, %v8751_v10, %v4527_v3  ;;  %v699_v57 = vsel %vm685_vm3, %v8750_v40, %v4532_v7  ;;  %4825 = vrot.lane.b32.xlu0 %v4829_v56, %s5332_s11  ;;  %v4849_v3 = vpack.i.bf16 %v5645_v42, %v5545_v47 }
  0xca   : > { %v5944_v31 = vpop.permute.xlu0 %4545  ;;  %v5946_v12 = vpop.permute.xlu1 %4550  ;;  %v1397_v63 = vpack.c.bf16 %v699_v57, %v602_v36 }
  0xcb   : > { %8961 = vst [vmem:[#allocation14_spill] sm:$0xff] %v5944_v31  ;;  %v8755_v61 = vunpack.i.h.bf16 %v5944_v31  ;;  %v4547_v13 = vunpack.i.l.bf16 %v5944_v31  ;;  %v8754_v50 = vunpack.i.l.bf16 %v5946_v12 }
  0xcc   : > { %1774 = vmatpush1.bf16.msra.mxu1 %v1397_v63  ;;  %4840 = vrot.lane.b32.xlu1 %v4829_v56, %s5335_s14 }
  0xcd   : > { %v819_v7 = vsel %vm806_vm4, %v8754_v50, %v4547_v13  ;;  %4835 = vrot.lane.b32.xlu0 %v4829_v56, %s5334_s13  ;;  %v818_v36 = vsel %vm806_vm4, %v4547_v13, %v8755_v61 }
  0xce   : > { %v5963_v57 = vpop.permute.xlu0 %4555  ;;  %v5965_v63 = vpop.permute.xlu1 %4560  ;;  %v1422_v40 = vpack.c.bf16 %v818_v36, %v5474_v24  ;;  %v1421_v10 = vpack.c.bf16 %v819_v7, %v5472_v23 }
  0xcf   : > { %8962 = vst [vmem:[#allocation15_spill] sm:$0xff] %v5963_v57  ;;  %8963 = vst [vmem:[#allocation16_spill] sm:$0xff] %v5965_v63  ;;  %v8756_v42 = vunpack.i.h.bf16 %v5963_v57  ;;  %v4557_v39 = vunpack.i.l.bf16 %v5963_v57  ;;  %v8757_v50 = vunpack.i.h.bf16 %v5965_v63  ;;  %v4562_v56 = vunpack.i.l.bf16 %v5965_v63 }
  0xd0   : > { %1775 = vmatprep.subr.bf16.mxu1 %v1422_v40  ;;  %4850 = vrot.lane.b32.xlu1 %v4849_v3, %s5337_s16 }
  0xd1   : > { %4845 = vrot.lane.b32.xlu0 %v4849_v3, %s5336_s15  ;;  %1776 = vmatpush1.bf16.msra.mxu1 %v1421_v10  ;;  %v915_v24 = vsel %vm903_vm5, %v4557_v39, %v8756_v42  ;;  %v1012_v23 = vsel %vm1000_vm6, %v4562_v56, %v8757_v50 }
  0xd2   : > { %v5983_v13 = vpop.permute.xlu0 %4565  ;;  %v5985_v7 = vpop.permute.xlu1 %4570  ;;  %v1446_v40 = vpack.c.bf16 %v1012_v23, %v915_v24 }
  0xd3   : > { %v8760_v36 = vunpack.i.l.bf16 %v5983_v13  ;;  %v8761_v61 = vunpack.i.l.bf16 %v5985_v7 }
  0xd4   : > { %1777 = vmatprep.subr.bf16.mxu1 %v1446_v40  ;;  %4860 = vrot.lane.b32.xlu1 %v4849_v3, %s5340_s18 }
  0xd5   : > { %v916_v10 = vsel %vm903_vm5, %v8760_v36, %v4557_v39  ;;  %v1013_v42 = vsel %vm1000_vm6, %v8761_v61, %v4562_v56  ;;  %4855 = vrot.lane.b32.xlu0 %v4849_v3, %s5338_s17  ;;  %v4518_v56 = vunpack.i.h.bf16 %v5879_v6 }
  0xd6   : > { %v5999_v24 = vpop.permute.xlu0 %4575  ;;  %v6001_v23 = vpop.permute.xlu1 %4580  ;;  %v1445_v50 = vpack.c.bf16 %v1013_v42, %v916_v10  ;;  %v4523_v42 = vunpack.i.h.bf16 %v5881_v62 }
  0xd7   : > { %8964 = vst [vmem:[#allocation17_spill] sm:$0xff] %v6001_v23  ;;  %v4578_v40 = vunpack.i.h.bf16 %v5999_v24  ;;  %v8766_v47 = vunpack.i.l.bf16 %v5999_v24  ;;  %v8764_v57 = vunpack.i.l.bf16 %v6001_v23 }
  0xd8   : > { %1778 = vmatpush1.bf16.msra.mxu1 %v1445_v50 }
  0xd9   : > { %v1109_v39 = vsel %vm1097_vm7, %v4578_v40, %v8764_v57  ;;  %v1110_v3 = vsel %vm1097_vm7, %v8766_v47, %v4578_v40 }
  0xda   : > { %v6016_v10 = vpop.permute.xlu0 %4585  ;;  %v6018_v36 = vpop.permute.xlu1 %4590  ;;  %v1470_v61 = vpack.c.bf16 %v1109_v39, %v1109_v39  ;;  %v1469_v50 = vpack.c.bf16 %v1110_v3, %v1110_v3 }
  0xdb   : > { %8965 = vst [vmem:[#allocation18_spill] sm:$0xff] %v6016_v10  ;;  %8966 = vst [vmem:[#allocation19_spill] sm:$0xff] %v6018_v36  ;;  %v8767_v63 = vunpack.i.h.bf16 %v6016_v10  ;;  %v8773_v31 = vunpack.i.l.bf16 %v6016_v10  ;;  %v8770_v57 = vunpack.i.h.bf16 %v6018_v36  ;;  %v8774_v14 = vunpack.i.l.bf16 %v6018_v36  ;;  %v1483_v10 = vld [vmem:[%s8698_s2] sm:$0xff] }
  0xdc   : > { %4308 = vmatprep.subr.msk.bf16.mxu1 %vm1493_vm8, %v1470_v61  ;;  %v1525_v40 = vsel %vm1493_vm8, %v1469_v50, 0  ;;  %v4538_v50 = vunpack.i.h.bf16 %v5927_v26  ;;  %1486 = vperm.xlu0 %4864, %v1483_v10  }
  0xdd   : > { %v404_v47 = vsel %vm394_vm0, %v8767_v63, %v4518_v56  ;;  %v501_v39 = vsel %vm491_vm1, %v8770_v57, %v4523_v42  ;;  %1780 = vmatpush1.bf16.msra.mxu1 %v1525_v40  ;;  %v403_v3 = vsel %vm394_vm0, %v4518_v56, %v8773_v31  ;;  %v500_v61 = vsel %vm491_vm1, %v4523_v42, %v8774_v14 }
  0xde   : > { %v4543_v63 = vunpack.i.h.bf16 %v5929_v16  ;;  %v6044_v8 = vpop.permute.xlu0 %4595  ;;  %v6046_v4 = vpop.permute.xlu1 %4600  ;;  %v1378_v57 = vpack.c.bf16 %v500_v61, %v403_v3  ;;  %v1377_v40 = vpack.c.bf16 %v501_v39, %v404_v47 }
  0xdf   : > { %8967 = vst [vmem:[#allocation20_spill] sm:$0xff] %v6044_v8  ;;  %8968 = vst [vmem:[#allocation21_spill] sm:$0xff] %v6046_v4  ;;  %v8775_v56 = vunpack.i.h.bf16 %v6044_v8  ;;  %v8781_v31 = vunpack.i.l.bf16 %v6044_v8  ;;  %v8778_v42 = vunpack.i.h.bf16 %v6046_v4  ;;  %v8782_v14 = vunpack.i.l.bf16 %v6046_v4 }
  0xe0   : > { %1853 = vmatprep.subr.bf16.mxu1 %v1378_v57  ;;  %4309 = vmatmul.mubr.msk.bf16.vlgmr.msra.gmra.mrb[8].mxu1 %vm1489_vm9, %v5768_v30 }
  0xe1   : > { %v598_v47 = vsel %vm588_vm2, %v8775_v56, %v4538_v50  ;;  %v695_v39 = vsel %vm685_vm3, %v8778_v42, %v4543_v63  ;;  %1854 = vmatpush1.bf16.msra.mxu1 %v1377_v40  ;;  %v597_v10 = vsel %vm588_vm2, %v4538_v50, %v8781_v31  ;;  %v694_v57 = vsel %vm685_vm3, %v4543_v63, %v8782_v14 }
  0xe2   : > { %v6073_v3 = vpop.permute.xlu0 %4605  ;;  %v6075_v61 = vpop.permute.xlu1 %4610  ;;  %v1402_v56 = vpack.c.bf16 %v694_v57, %v597_v10  ;;  %v1401_v36 = vpack.c.bf16 %v695_v39, %v598_v47  ;;  %1885 = vmatprep.mubr.bf16.mxu1 %v8960_v38  ;;  %v4553_v40 = vunpack.i.h.bf16 %v5946_v12  ;;  %v4568_v63 = vunpack.i.h.bf16 %v5983_v13 }
  0xe3   : > { %8969 = vst [vmem:[#allocation22_spill] sm:$0xff] %v6073_v3  ;;  %8970 = vst [vmem:[#allocation23_spill] sm:$0xff] %v6075_v61  ;;  %v8783_v42 = vunpack.i.h.bf16 %v6073_v3  ;;  %v8786_v8 = vunpack.i.l.bf16 %v6073_v3  ;;  %v4573_v10 = vunpack.i.h.bf16 %v5985_v7  ;;  %v8974_v4 = vunpack.i.l.bf16 %v6075_v61 }
  0xe4   : > { %1855 = vmatprep.subr.bf16.mxu1 %v1402_v56 }
  0xe5   : > { %v815_v47 = vsel %vm806_vm4, %v8783_v42, %v4553_v40  ;;  %1856 = vmatpush1.bf16.msra.mxu1 %v1401_v36  ;;  %v814_v39 = vsel %vm806_vm4, %v4553_v40, %v8786_v8  ;;  %v8973_v8 = vunpack.i.h.bf16 %v6075_v61 }
  0xe6   : > { %v6094_v14 = vpop.permute.xlu0 %4615  ;;  %v6096_v56 = vpop.permute.xlu1 %4620  ;;  %v1426_v31 = vpack.c.bf16 %v814_v39, %v5496_v32  ;;  %v1425_v50 = vpack.c.bf16 %v815_v47, %v5483_v28  ;;  %v911_v32 = vsel %vm903_vm5, %v4568_v63, %v8974_v4 }
  0xe7   : > { %8971 = vst [vmem:[#allocation24_spill] sm:$0xff] %v6094_v14  ;;  %8972 = vst [vmem:[#allocation25_spill] sm:$0xff] %v6096_v56  ;;  %v8789_v42 = vunpack.i.h.bf16 %v6094_v14  ;;  %v8792_v36 = vunpack.i.l.bf16 %v6094_v14  ;;  %v8794_v3 = vunpack.i.h.bf16 %v6096_v56  ;;  %v4622_v40 = vunpack.i.l.bf16 %v6096_v56 }
  0xe8   : > { %v912_v57 = vsel %vm903_vm5, %v8973_v8, %v4568_v63  ;;  %1857 = vmatprep.subr.bf16.mxu1 %v1426_v31  ;;  %v8975_v31 = vunpack.i.h.bf16 %v6001_v23 }
  0xe9   : > { %v1009_v28 = vsel %vm1000_vm6, %v8789_v42, %v4573_v10  ;;  %1858 = vmatpush1.bf16.msra.mxu1 %v1425_v50  ;;  %v1008_v47 = vsel %vm1000_vm6, %v4573_v10, %v8792_v36  ;;  %v1105_v8 = vsel %vm1097_vm7, %v4622_v40, %v8794_v3 }
  0xea   : > { %v1106_v4 = vsel %vm1097_vm7, %v8975_v31, %v4622_v40  ;;  %v6128_v63 = vpop.permute.xlu0 %4625  ;;  %v6130_v39 = vpop.permute.xlu1 %4630  ;;  %v1450_v50 = vpack.c.bf16 %v1008_v47, %v911_v32  ;;  %v1449_v42 = vpack.c.bf16 %v1009_v28, %v912_v57  ;;  %v1474_v3 = vpack.c.bf16 %v1105_v8, %v1105_v8 }
  0xeb   : > { %8976 = vst [vmem:[#allocation26_spill] sm:$0xff] %v6128_v63  ;;  %8977 = vst [vmem:[#allocation27_spill] sm:$0xff] %v6130_v39  ;;  %v8797_v61 = vunpack.i.h.bf16 %v6128_v63  ;;  %v4627_v10 = vunpack.i.l.bf16 %v6128_v63  ;;  %v8798_v36 = vunpack.i.h.bf16 %v6130_v39  ;;  %v4632_v56 = vunpack.i.l.bf16 %v6130_v39 }
  0xec   : > { %1859 = vmatprep.subr.bf16.mxu1 %v1450_v50  ;;  %v1473_v23 = vpack.c.bf16 %v1106_v4, %v1106_v4  ;;  %v8981_v39 = vunpack.i.l.bf16 %v5591_v1 }
  0xed   : > { %1860 = vmatpush1.bf16.msra.mxu1 %v1449_v42  ;;  %v399_v40 = vsel %vm394_vm0, %v4627_v10, %v8797_v61  ;;  %v496_v57 = vsel %vm491_vm1, %v4632_v56, %v8798_v36  ;;  %v8980_v36 = vunpack.i.l.bf16 %v5579_v59 }
  0xee   : > { %4312 = vmatprep.subr.msk.bf16.mxu1 %vm1493_vm8, %v1474_v3  ;;  %v6145_v32 = vpop.permute.xlu1 %4640  ;;  %v6147_v28 = vpop.permute.xlu0 %4635  ;;  %v1537_v4 = vsel %vm1493_vm8, %v1473_v23, 0  ;;  %v1382_v50 = vpack.c.bf16 %v496_v57, %v399_v40 }
  0xef   : > { %8978 = vst [vmem:[#allocation28_spill] sm:$0xff] %v6145_v32  ;;  %8979 = vst [vmem:[#allocation29_spill] sm:$0xff] %v6147_v28  ;;  %v4643_v47 = vunpack.i.h.bf16 %v6145_v32  ;;  %v8801_v42 = vunpack.i.l.bf16 %v6145_v32  ;;  %v4638_v8 = vunpack.i.h.bf16 %v6147_v28  ;;  %v8804_v31 = vunpack.i.l.bf16 %v6147_v28 }
  0xf1   : > { %v497_v3 = vsel %vm491_vm1, %v8801_v42, %v4632_v56  ;;  %v400_v61 = vsel %vm394_vm0, %v8804_v31, %v4627_v10  ;;  %1862 = vmatpush1.bf16.msra.mxu1 %v1537_v4  ;;  %v417_v63 = vsel %vm394_vm0, %v4638_v8, %v8980_v36  ;;  %v514_v23 = vsel %vm491_vm1, %v4643_v47, %v8981_v39 }
  0xf2   : > { %1935 = vmatprep.subr.bf16.mxu1 %v1382_v50  ;;  %v6170_v40 = vpop.permute.xlu1 %4650  ;;  %v6172_v56 = vpop.permute.xlu0 %4645  ;;  %v1364_v57 = vpack.c.bf16 %v514_v23, %v417_v63  ;;  %v1381_v42 = vpack.c.bf16 %v497_v3, %v400_v61 }
  0xf3   : > { %8982 = vst [vmem:[#allocation30_spill] sm:$0xff] %v6170_v40  ;;  %8983 = vst [vmem:[#allocation31_spill] sm:$0xff] %v6172_v56  ;;  %v8803_v10 = vunpack.i.h.bf16 %v6170_v40  ;;  %v4652_v4 = vunpack.i.l.bf16 %v6170_v40  ;;  %v8802_v59 = vunpack.i.h.bf16 %v6172_v56  ;;  %v4647_v36 = vunpack.i.l.bf16 %v6172_v56 }
  0xf4   : > { %1566 = vmatprep.subr.bf16.mxu0 %v1364_v57  ;;  %4313 = vmatmul.mubr.msk.bf16.vlgmr.msra.gmra.mrb[12].mxu1 %vm1489_vm9, %v5768_v30 }
  0xf5   : > { %1936 = vmatpush1.bf16.msra.mxu1 %v1381_v42  ;;  %v593_v1 = vsel %vm588_vm2, %v4647_v36, %v8802_v59  ;;  %v690_v61 = vsel %vm685_vm3, %v4652_v4, %v8803_v10  ;;  %1967 = vmatprep.mubr.bf16.mxu1 %v8960_v38 }
  0xf6   : > { %v6189_v63 = vpop.permute.xlu1 %4660  ;;  %v6191_v39 = vpop.permute.xlu0 %4655  ;;  %v1406_v50 = vpack.c.bf16 %v690_v61, %v593_v1 }
  0xf7   : > { %8984 = vst [vmem:[#allocation32_spill] sm:$0xff] %v6189_v63  ;;  %8985 = vst [vmem:[#allocation33_spill] sm:$0xff] %v6191_v39  ;;  %v8806_v3 = vunpack.i.l.bf16 %v6189_v63  ;;  %v8807_v42 = vunpack.i.l.bf16 %v6191_v39  ;;  %v4663_v59 = vunpack.i.h.bf16 %v6189_v63  ;;  %v4658_v31 = vunpack.i.h.bf16 %v6191_v39 }
  0xf8   : > { %1937 = vmatprep.subr.bf16.mxu1 %v1406_v50  ;;  %v8988_v39 = vunpack.i.l.bf16 %v5636_v34 }
  0xf9   : > { %v691_v23 = vsel %vm685_vm3, %v8806_v3, %v4652_v4  ;;  %v594_v57 = vsel %vm588_vm2, %v8807_v42, %v4647_v36 }
  0xfa   : > { %v6204_v10 = vpop.permute.xlu1 %4670  ;;  %v6206_v1 = vpop.permute.xlu0 %4665  ;;  %v1405_v61 = vpack.c.bf16 %v691_v23, %v594_v57 }
  0xfb   : > { %8986 = vst [vmem:[#allocation34_spill] sm:$0xff] %v6204_v10  ;;  %8987 = vst [vmem:[#allocation35_spill] sm:$0xff] %v6206_v1  ;;  %v8811_v50 = vunpack.i.l.bf16 %v6204_v10  ;;  %v8813_v56 = vunpack.i.h.bf16 %v6206_v1  ;;  %v4667_v4 = vunpack.i.l.bf16 %v6206_v1  ;;  %v8989_v1 = vunpack.i.l.bf16 %v5638_v35 }
  0xfc   : > { %1938 = vmatpush1.bf16.msra.mxu1 %v1405_v61 }
  0xfd   : > { %v811_v36 = vsel %vm806_vm4, %v8811_v50, %v4667_v4  ;;  %v810_v3 = vsel %vm806_vm4, %v4667_v4, %v8813_v56  ;;  %v611_v50 = vsel %vm588_vm2, %v4658_v31, %v8988_v39  ;;  %v708_v4 = vsel %vm685_vm3, %v4663_v59, %v8989_v1 }
  0xfe   : > { %v6220_v23 = vpop.permute.xlu1 %4680  ;;  %v6222_v57 = vpop.permute.xlu0 %4675  ;;  %v1430_v42 = vpack.c.bf16 %v810_v3, %v5534_v44  ;;  %v1429_v40 = vpack.c.bf16 %v811_v36, %v5532_v43  ;;  %v1388_v56 = vpack.c.bf16 %v708_v4, %v611_v50 }
  0xff   : > { %v4682_v61 = vunpack.i.l.bf16 %v6220_v23  ;;  %v4677_v63 = vunpack.i.l.bf16 %v6222_v57 }
 0x100   : > { %1939 = vmatprep.subr.bf16.mxu1 %v1430_v42 }
 0x101   : > { %1940 = vmatpush1.bf16.msra.mxu1 %v1429_v40  ;;  %v418_v44 = vsel %vm394_vm0, %v4677_v63, %v4638_v8  ;;  %v515_v43 = vsel %vm491_vm1, %v4682_v61, %v4643_v47 }
 0x102   : > { %v6240_v3 = vpop.permute.xlu1 %4690  ;;  %v6242_v36 = vpop.permute.xlu0 %4685  ;;  %v1363_v34 = vpack.c.bf16 %v515_v43, %v418_v44 }
 0x103   : > { %8990 = vst [vmem:[#allocation36_spill] sm:$0xff] %v6240_v3  ;;  %8991 = vst [vmem:[#allocation37_spill] sm:$0xff] %v6242_v36  ;;  %v8815_v39 = vunpack.i.h.bf16 %v6240_v3  ;;  %v4692_v35 = vunpack.i.l.bf16 %v6240_v3  ;;  %v8814_v1 = vunpack.i.h.bf16 %v6242_v36  ;;  %v4687_v40 = vunpack.i.l.bf16 %v6242_v36 }
 0x104   : > { %1567 = vmatpush1.bf16.msra.mxu0 %v1363_v34  ;;  %v4683_v3 = vunpack.i.h.bf16 %v6220_v23 }
 0x105   : > { %1568 = vmatprep.subr.bf16.mxu0 %v1388_v56  ;;  %v907_v47 = vsel %vm903_vm5, %v4687_v40, %v8814_v1  ;;  %v1004_v8 = vsel %vm1000_vm6, %v4692_v35, %v8815_v39  ;;  %v4673_v56 = vunpack.i.h.bf16 %v6204_v10  ;;  %v4678_v10 = vunpack.i.h.bf16 %v6222_v57 }
 0x106   : > { %v6256_v42 = vpop.permute.xlu1 %4700  ;;  %v1454_v50 = vpack.c.bf16 %v1004_v8, %v907_v47 }
 0x107   : > { %8992 = vst [vmem:[#allocation38_spill] sm:$0xff] %v6256_v42  ;;  %v8819_v4 = vunpack.i.l.bf16 %v6256_v42  ;;  %v6259_v44 = vpop.permute.xlu0 %4695  ;;  %v4703_v57 = vunpack.i.h.bf16 %v6256_v42  ;;  %v395_v28 = vsel %vm394_vm0, %v4678_v10, %v4677_v63 }
 0x108   : > { %8993 = vst [vmem:[#allocation39_spill] sm:$0xff] %v6259_v44  ;;  %v8820_v43 = vunpack.i.l.bf16 %v6259_v44  ;;  %1941 = vmatprep.subr.bf16.mxu1 %v1454_v50 }
 0x109   : > { %v1005_v34 = vsel %vm1000_vm6, %v8819_v4, %v4692_v35  ;;  %v8994_v4 = vunpack.i.l.bf16 %v5658_v53 }
 0x10a   : > { %v908_v1 = vsel %vm903_vm5, %v8820_v43, %v4687_v40  ;;  %v6271_v47 = vpop.permute.xlu1 %4710 }
 0x10b   : > { %v4712_v8 = vunpack.i.l.bf16 %v6271_v47  ;;  %v6274_v39 = vpop.permute.xlu0 %4705  ;;  %v1453_v36 = vpack.c.bf16 %v1005_v34, %v908_v1  ;;  %v828_v40 = vsel %vm806_vm4, %v4673_v56, %v8994_v4  ;;  %v4698_v4 = vunpack.i.h.bf16 %v6259_v44 }
 0x10c   : > { %v4707_v50 = vunpack.i.l.bf16 %v6274_v39  ;;  %v1412_v53 = vpack.c.bf16 %v828_v40, %v5415_v5  ;;  %v4713_v14 = vunpack.i.h.bf16 %v6271_v47 }
 0x10d   : > { %1942 = vmatpush1.bf16.msra.mxu1 %v1453_v36  ;;  %v709_v35 = vsel %vm685_vm3, %v4712_v8, %v4663_v59 }
 0x10e   : > { %v6285_v43 = vpop.permute.xlu1 %4720  ;;  %v612_v1 = vsel %vm588_vm2, %v4707_v50, %v4658_v31  ;;  %v492_v31 = vsel %vm491_vm1, %v4683_v3, %v4682_v61 }
 0x10f   : > { %8995 = vst [vmem:[#allocation40_spill] sm:$0xff] %v6285_v43  ;;  %v6290_v32 = vpop.permute.xlu0 %4715  ;;  %v1387_v23 = vpack.c.bf16 %v709_v35, %v612_v1  ;;  %v8997_v35 = vunpack.i.l.bf16 %v6285_v43  ;;  %v1386_v61 = vpack.c.bf16 %v492_v31, %v395_v28 }
 0x110   : > { %8996 = vst [vmem:[#allocation41_spill] sm:$0xff] %v6290_v32  ;;  %v4718_v36 = vunpack.i.h.bf16 %v6290_v32  ;;  %v8827_v59 = vunpack.i.l.bf16 %v6290_v32  ;;  %v9006_v32 = vunpack.i.h.bf16 %v5577_v58 }
 0x111   : > { %1569 = vmatpush1.bf16.msra.mxu0 %v1387_v23 }
 0x112   : > { %1570 = vmatprep.subr.bf16.mxu0 %v1412_v53  ;;  %v6301_v34 = vpop.permute.xlu1 %4730  ;;  %v1101_v1 = vsel %vm1097_vm7, %v4718_v36, %v8997_v35  ;;  %v1102_v5 = vsel %vm1097_vm7, %v8827_v59, %v4718_v36  ;;  %v8998_v53 = vunpack.i.l.bf16 %v5703_v48  ;;  %v4708_v35 = vunpack.i.h.bf16 %v6274_v39 }
 0x113   : > { %v6311_v40 = vpop.permute.xlu0 %4725  ;;  %v1478_v23 = vpack.c.bf16 %v1101_v1, %v1101_v1  ;;  %v1477_v63 = vpack.c.bf16 %v1102_v5, %v1102_v5  ;;  %v8999_v59 = vunpack.i.l.bf16 %v5701_v41  ;;  %v8829_v28 = vunpack.i.l.bf16 %v6301_v34 }
 0x114   : > { %v4727_v44 = vunpack.i.l.bf16 %v6311_v40  ;;  %v1022_v42 = vsel %vm1000_vm6, %v4703_v57, %v8998_v53  ;;  %v589_v41 = vsel %vm588_vm2, %v4708_v35, %v4707_v50  ;;  %v4728_v50 = vunpack.i.h.bf16 %v6311_v40 }
 0x115   : > { %4316 = vmatprep.subr.msk.bf16.mxu1 %vm1493_vm8, %v1478_v23  ;;  %v1549_v36 = vsel %vm1493_vm8, %v1477_v63, 0  ;;  %v925_v1 = vsel %vm903_vm5, %v4698_v4, %v8999_v59  ;;  %v686_v59 = vsel %vm685_vm3, %v4713_v14, %v4712_v8 }
 0x116   : > { %1944 = vmatpush1.bf16.msra.mxu1 %v1549_v36  ;;  %v6327_v48 = vpop.permute.xlu1 %4740  ;;  %v829_v31 = vsel %vm806_vm4, %v4727_v44, %v4673_v56  ;;  %v1436_v23 = vpack.c.bf16 %v1022_v42, %v925_v1  ;;  %v396_v56 = vsel %vm394_vm0, %v8829_v28, %v4678_v10  ;;  %v1410_v36 = vpack.c.bf16 %v686_v59, %v589_v41 }
 0x117   : > { %v6331_v47 = vpop.permute.xlu0 %4735  ;;  %2017 = vmatprep.subr.bf16.mxu1 %v1386_v61  ;;  %v1411_v39 = vpack.c.bf16 %v829_v31, %v5537_v45  ;;  %v4742_v45 = vunpack.i.l.bf16 %v6327_v48  ;;  %v4723_v1 = vunpack.i.h.bf16 %v6285_v43  ;;  %v830_v59 = vsel %vm806_vm4, %v4728_v50, %v4727_v44 }
 0x118   : > { %v8828_v5 = vunpack.i.l.bf16 %v6331_v47  ;;  %v4738_v53 = vunpack.i.h.bf16 %v6331_v47 }
 0x119   : > { %1571 = vmatpush1.bf16.msra.mxu0 %v1411_v39  ;;  %4317 = vmatmul.mubr.msk.bf16.vlgmr.msra.gmra.mrb[16].mxu1 %vm1489_vm9, %v5768_v30  ;;  %v926_v39 = vsel %vm903_vm5, %v4742_v45, %v4698_v4  ;;  %v9002_v4 = vunpack.i.h.bf16 %v5741_v33 }
 0x11a   : > { %v493_v42 = vsel %vm491_vm1, %v8828_v5, %v4683_v3  ;;  %1572 = vmatprep.subr.bf16.mxu0 %v1436_v23  ;;  %v6350_v63 = vpop.permute.xlu1 %4750  ;;  %2049 = vmatprep.mubr.bf16.mxu1 %v8960_v38  ;;  %v4733_v23 = vunpack.i.h.bf16 %v6301_v34 }
 0x11b   : > { %9000 = vst [vmem:[#allocation42_spill] sm:$0xff] %v6350_v63  ;;  %v6354_v8 = vpop.permute.xlu0 %4745  ;;  %v1385_v61 = vpack.c.bf16 %v493_v42, %v396_v56 }
 0x11c   : > { %v4747_v10 = vunpack.i.l.bf16 %v6354_v8  ;;  %v4748_v28 = vunpack.i.h.bf16 %v6354_v8 }
 0x11d   : > { %2018 = vmatpush1.bf16.msra.mxu1 %v1385_v61  ;;  %v4743_v61 = vunpack.i.h.bf16 %v6327_v48 }
 0x11e   : > { %2019 = vmatprep.subr.bf16.mxu1 %v1410_v36  ;;  %v6360_v31 = vpop.permute.xlu1 %4760  ;;  %v1023_v40 = vsel %vm1000_vm6, %v4747_v10, %v4703_v57  ;;  %v4753_v36 = vunpack.i.h.bf16 %v6350_v63  ;;  %v510_v57 = vsel %vm491_vm1, %v4738_v53, %v9002_v4 }
 0x11f   : > { %v4762_v56 = vunpack.i.l.bf16 %v6360_v31  ;;  %v6368_v42 = vpop.permute.xlu0 %4755  ;;  %v1435_v41 = vpack.c.bf16 %v1023_v40, %v926_v39  ;;  %v9003_v39 = vunpack.i.l.bf16 %v5717_v25  ;;  %v9004_v40 = vunpack.i.l.bf16 %v6350_v63 }
 0x120   : > { %9001 = vst [vmem:[#allocation43_spill] sm:$0xff] %v6368_v42  ;;  %v4758_v3 = vunpack.i.h.bf16 %v6368_v42  ;;  %v9005_v4 = vunpack.i.l.bf16 %v6368_v42  ;;  %v9008_v42 = vunpack.i.h.bf16 %v5739_v29 }
 0x121   : > { %1573 = vmatpush1.bf16.msra.mxu0 %v1435_v41  ;;  %v1119_v44 = vsel %vm1097_vm7, %v4762_v56, %v9003_v39  ;;  %v1120_v48 = vsel %vm1097_vm7, %v4723_v1, %v4762_v56  ;;  %v590_v5 = vsel %vm588_vm2, %v9004_v40, %v4708_v35  ;;  %v414_v39 = vsel %vm394_vm0, %v9006_v32, %v4733_v23 }
 0x122   : > { %v687_v8 = vsel %vm685_vm3, %v9005_v4, %v4713_v14  ;;  %v6395_v43 = vpop.permute.xlu1 %4770  ;;  %v1460_v41 = vpack.c.bf16 %v1119_v44, %v1119_v44  ;;  %v1459_v25 = vpack.c.bf16 %v1120_v48, %v1120_v48  ;;  %v9007_v56 = vunpack.i.h.bf16 %v5589_v0 }
 0x123   : > { %v6405_v35 = vpop.permute.xlu0 %4765  ;;  %v1409_v40 = vpack.c.bf16 %v687_v8, %v590_v5  ;;  %v413_v14 = vsel %vm394_vm0, %v4733_v23, %v9008_v42  ;;  %v1434_v32 = vpack.c.bf16 %v830_v59, %v5571_v55  ;;  %v927_v5 = vsel %vm903_vm5, %v4743_v61, %v4742_v45 }
 0x124   : > { %v511_v63 = vsel %vm491_vm1, %v9007_v56, %v4738_v53  ;;  %v4767_v44 = vunpack.i.l.bf16 %v6405_v35  ;;  %4298 = vmatprep.subr.msk.bf16.mxu0 %vm1493_vm8, %v1460_v41  ;;  %v1495_v58 = vsel %vm1493_vm8, %v1459_v25, 0  ;;  %v1368_v0 = vpack.c.bf16 %v510_v57, %v413_v14 }
 0x125   : > { %v4768_v48 = vunpack.i.h.bf16 %v6405_v35  ;;  %2020 = vmatpush1.bf16.msra.mxu1 %v1409_v40  ;;  %1575 = vmatpush1.bf16.msra.mxu0 %v1495_v58  ;;  %v1024_v53 = vsel %vm1000_vm6, %v4748_v28, %v4747_v10  ;;  %v9009_v23 = vunpack.i.h.bf16 %v5774_v22  ;;  %v9010_v4 = vunpack.i.h.bf16 %v5616_v17 }
 0x126   : > { %v4772_v59 = vunpack.i.l.bf16 %v6395_v43  ;;  %v807_v45 = vsel %vm806_vm4, %v4767_v44, %v4728_v50  ;;  %2021 = vmatprep.subr.bf16.mxu1 %v1434_v32  ;;  %v4781_v57 = vpop.permute.xlu1 %4780  ;;  %1648 = vmatprep.subr.bf16.mxu0 %v1368_v0  ;;  %v1367_v10 = vpack.c.bf16 %v511_v63, %v414_v39  ;;  %v4763_v8 = vunpack.i.h.bf16 %v6360_v31  ;;  %v9120_v31 = vld [vmem:[#allocation37_spill] sm:$0xff] }
 0x127   : > { %v704_v42 = vsel %vm685_vm3, %v4758_v3, %v9009_v23  ;;  %v608_v55 = vsel %vm588_vm2, %v9010_v4, %v4753_v36  ;;  %v4782_v41 = vunpack.i.l.bf16 %v4781_v57  ;;  %v6434_v25 = vpop.permute.xlu0 %4775  ;;  %v1433_v17 = vpack.c.bf16 %v807_v45, %v5569_v54 }
 0x128   : > { %v9011_v56 = vunpack.i.h.bf16 %v5772_v51  ;;  %v9012_v14 = vunpack.i.h.bf16 %v5618_v18  ;;  %v4777_v58 = vunpack.i.l.bf16 %v6434_v25  ;;  %4299 = vmatmul.mubr.msk.bf16.vlgmr.msra.gmra.mrb[0].mxu0 %vm1489_vm9, %v5768_v30  ;;  %v1458_v63 = vpack.c.bf16 %v1024_v53, %v927_v5 }
 0x129   : > { %v4778_v32 = vunpack.i.h.bf16 %v6434_v25  ;;  %2022 = vmatpush1.bf16.msra.mxu1 %v1433_v17  ;;  %1649 = vmatpush1.bf16.msra.mxu0 %v1367_v10  ;;  %v1121_v54 = vsel %vm1097_vm7, %v4782_v41, %v4723_v1  ;;  %v904_v0 = vsel %vm903_vm5, %v4772_v59, %v4743_v61  ;;  %v4773_v23 = vunpack.i.h.bf16 %v6395_v43  ;;  %v9057_v43 = vld [vmem:[#allocation12_spill] sm:$0xff] }
 0x12a   : > { %v607_v40 = vsel %vm588_vm2, %v4753_v36, %v9011_v56  ;;  %v705_v50 = vsel %vm685_vm3, %v9012_v14, %v4758_v3  ;;  %v9013_v36 = vunpack.i.h.bf16 %v5806_v9  ;;  %v1098_v3 = vsel %vm1097_vm7, %v4763_v8, %v4782_v41  ;;  %2023 = vmatprep.subr.bf16.mxu1 %v1458_v63  ;;  %v6467_v5 = vpop.permute.xlu1 %4790  ;;  %1680 = vmatprep.mubr.bf16.mxu0 %v8960_v38 }
 0x12b   : > { %v1392_v39 = vpack.c.bf16 %v704_v42, %v607_v40  ;;  %v1001_v1 = vsel %vm1000_vm6, %v4777_v58, %v4748_v28  ;;  %v1482_v53 = vpack.c.bf16 %v1121_v54, %v1121_v54  ;;  %v6470_v42 = vpop.permute.xlu0 %4785  ;;  %v1391_v45 = vpack.c.bf16 %v705_v50, %v608_v55 }
 0x12c   : > { %v824_v18 = vsel %vm806_vm4, %v4768_v48, %v9013_v36  ;;  %v1457_v4 = vpack.c.bf16 %v1001_v1, %v904_v0  ;;  %v9014_v61 = vunpack.i.h.bf16 %v5656_v52  ;;  %v1481_v41 = vpack.c.bf16 %v1098_v3, %v1098_v3 }
 0x12d   : > { %1650 = vmatprep.subr.bf16.mxu0 %v1392_v39  ;;  %v1416_v28 = vpack.c.bf16 %v824_v18, %v5448_v15  ;;  %v4783_v17 = vunpack.i.h.bf16 %v4781_v57  ;;  %v9015_v56 = vunpack.i.h.bf16 %v5830_v37  ;;  %v9016_v15 = vunpack.i.h.bf16 %v5808_v2 }
 0x12e   : > { %v825_v10 = vsel %vm806_vm4, %v9014_v61, %v4768_v48  ;;  %2024 = vmatpush1.bf16.msra.mxu1 %v1457_v4  ;;  %1651 = vmatpush1.bf16.msra.mxu0 %v1391_v45  ;;  %v6483_v55 = vpop.permute.xlu1 %4800  ;;  %v9017_v14 = vunpack.i.h.bf16 %v5681_v21  ;;  %v1561_v63 = vsel %vm1493_vm8, %v1481_v41, 0  ;;  %v4792_v54 = vunpack.i.l.bf16 %v6467_v5 }
 0x12f   : > { %v1018_v40 = vsel %vm1000_vm6, %v4778_v32, %v9015_v56  ;;  %4320 = vmatprep.subr.msk.bf16.mxu1 %vm1493_vm8, %v1482_v53  ;;  %1652 = vmatprep.subr.bf16.mxu0 %v1416_v28  ;;  %v6485_v52 = vpop.permute.xlu0 %4795  ;;  %v1415_v48 = vpack.c.bf16 %v825_v10, %v5432_v11  ;;  %v921_v57 = vsel %vm903_vm5, %v4773_v23, %v9016_v15  ;;  %v4787_v36 = vunpack.i.l.bf16 %v6470_v42 }
 0x130   : > { %v1019_v50 = vsel %vm1000_vm6, %v9017_v14, %v4778_v32  ;;  %v1440_v39 = vpack.c.bf16 %v1018_v40, %v921_v57  ;;  %v9018_v11 = vunpack.i.h.bf16 %v5719_v46  ;;  %v9019_v3 = vunpack.i.l.bf16 %v5719_v46 }
 0x131   : > { %v9020_v32 = vunpack.i.h.bf16 %v5679_v20  ;;  %v4802_v46 = vunpack.i.l.bf16 %v6483_v55  ;;  %v4797_v10 = vunpack.i.l.bf16 %v6485_v52  ;;  %v9021_v20 = vunpack.i.l.bf16 %v5879_v6 }
 0x132   : > { %2026 = vmatpush1.bf16.msra.mxu1 %v1561_v63  ;;  %1653 = vmatpush1.bf16.msra.mxu0 %v1415_v48  ;;  %v1115_v18 = vsel %vm1097_vm7, %v4783_v17, %v9018_v11  ;;  %v1116_v21 = vsel %vm1097_vm7, %v9019_v3, %v4783_v17  ;;  %v6511_v1 = vpop.permute.xlu1 %4810  ;;  %v9022_v28 = vunpack.i.l.bf16 %v5881_v62  ;;  %v9023_v56 = vunpack.i.l.bf16 %v5741_v33 }
 0x133   : > { %v922_v0 = vsel %vm903_vm5, %v9020_v32, %v4773_v23  ;;  %1654 = vmatprep.subr.bf16.mxu0 %v1440_v39  ;;  %v6513_v53 = vpop.permute.xlu0 %4805  ;;  %v1464_v45 = vpack.c.bf16 %v1115_v18, %v1115_v18  ;;  %v1463_v61 = vpack.c.bf16 %v1116_v21, %v1116_v21  ;;  %v409_v23 = vsel %vm394_vm0, %v4787_v36, %v9021_v20 }
 0x134   : > { %v1439_v4 = vpack.c.bf16 %v1019_v50, %v922_v0  ;;  %v506_v41 = vsel %vm491_vm1, %v4792_v54, %v9022_v28  ;;  %v507_v6 = vsel %vm491_vm1, %v9023_v56, %v4792_v54  ;;  %v9024_v40 = vunpack.i.l.bf16 %v5739_v29 }
 0x135   : > { %4321 = vmatmul.mubr.msk.bf16.vlgmr.msra.gmra.mrb[20].mxu1 %vm1489_vm9, %v5768_v30  ;;  %v1507_v48 = vsel %vm1493_vm8, %v1463_v61, 0  ;;  %v1372_v15 = vpack.c.bf16 %v506_v41, %v409_v23  ;;  %v4807_v57 = vunpack.i.l.bf16 %v6513_v53  ;;  %v9025_v14 = vunpack.i.l.bf16 %v5927_v26 }
 0x136   : > { %1655 = vmatpush1.bf16.msra.mxu0 %v1439_v4  ;;  %v6527_v17 = vpop.permute.xlu1 %4820  ;;  %3526 = vmatprep.mubr.bf16.mxu1 %v8960_v38  ;;  %v410_v62 = vsel %vm394_vm0, %v9024_v40, %v4787_v36  ;;  %v9026_v33 = vunpack.i.l.bf16 %v5929_v16  ;;  %v9027_v54 = vunpack.i.l.bf16 %v5774_v22  ;;  %v9028_v11 = vunpack.i.l.bf16 %v5772_v51  ;;  %v6566_v16 = vld [vmem:[%s8697_s1] sm:$0xf] }
 0x137   : > { %4302 = vmatprep.subr.msk.bf16.mxu0 %vm1493_vm8, %v1464_v45  ;;  %v6530_v30 = vpop.permute.xlu0 %4815  ;;  %v603_v50 = vsel %vm588_vm2, %v4797_v10, %v9025_v14  ;;  %v1371_v39 = vpack.c.bf16 %v507_v6, %v410_v62  ;;  %v9029_v21 = vunpack.i.l.bf16 %v5946_v12  ;;  %v4812_v32 = vunpack.i.l.bf16 %v6511_v1 }
 0x138   : > { %v700_v63 = vsel %vm685_vm3, %v4802_v46, %v9026_v33  ;;  %v701_v36 = vsel %vm685_vm3, %v9027_v54, %v4802_v46  ;;  %v604_v26 = vsel %vm588_vm2, %v9028_v11, %v4797_v10  ;;  %v4817_v22 = vunpack.i.l.bf16 %v6530_v30 }
 0x139   : > { %v1396_v3 = vpack.c.bf16 %v700_v63, %v603_v50  ;;  %v820_v51 = vsel %vm806_vm4, %v4807_v57, %v9029_v21  ;;  %v1395_v4 = vpack.c.bf16 %v701_v36, %v604_v26  ;;  %v9030_v45 = vunpack.i.l.bf16 %v5806_v9  ;;  %v9037_v36 = vld [vmem:[#allocation18_spill] sm:$0xff]  ;;  %v9039_v26 = vld [vmem:[#allocation19_spill] sm:$0xff] }
 0x13a   : > { %1657 = vmatpush1.bf16.msra.mxu0 %v1507_v48  ;;  %v6561_v18 = vpop.permute.xlu1 %4830  ;;  %v1420_v46 = vpack.c.bf16 %v820_v51, %v5481_v27  ;;  %v4822_v12 = vunpack.i.l.bf16 %v6527_v17  ;;  %v9031_v10 = vunpack.i.l.bf16 %v5985_v7  ;;  %v9032_v41 = vunpack.i.l.bf16 %v5983_v13  ;;  %v9041_v21 = vld [vmem:[#allocation11_spill] sm:$0xff] }
 0x13b   : > { %1730 = vmatprep.subr.bf16.mxu0 %v1372_v15  ;;  %v6551_v29 = vpop.permute.xlu0 %4825  ;;  %v821_v61 = vsel %vm806_vm4, %v9030_v45, %v4807_v57  ;;  %v9033_v56 = vunpack.i.l.bf16 %v5830_v37  ;;  %v4793_v40 = vunpack.i.h.bf16 %v6467_v5  ;;  %v4788_v62 = vunpack.i.h.bf16 %v6470_v42 }
 0x13c   : > { %v1014_v20 = vsel %vm1000_vm6, %v4817_v22, %v9031_v10  ;;  %v1419_v9 = vpack.c.bf16 %v821_v61, %v5461_v19  ;;  %v917_v27 = vsel %vm903_vm5, %v4812_v32, %v9032_v41  ;;  %v9034_v48 = vunpack.i.l.bf16 %v5999_v24 }
 0x13d   : > { %4303 = vmatmul.mubr.msk.bf16.vlgmr.msra.gmra.mrb[4].mxu0 %vm1489_vm9, %v6566_v16  ;;  %v1015_v7 = vsel %vm1000_vm6, %v9033_v56, %v4817_v22  ;;  %v1444_v6 = vpack.c.bf16 %v1014_v20, %v917_v27  ;;  %v9035_v13 = vunpack.i.h.bf16 %v5832_v49  ;;  %v9036_v37 = vunpack.i.l.bf16 %v5808_v2  ;;  %v9047_v56 = vld [vmem:[#allocation42_spill] sm:$0xff] }
 0x13e   : > { %1731 = vmatpush1.bf16.msra.mxu0 %v1371_v39  ;;  %1762 = vmatprep.mubr.bf16.mxu0 %v8960_v38  ;;  %v6589_v23 = vpop.permute.xlu1 %4840  ;;  %v1111_v19 = vsel %vm1097_vm7, %v4822_v12, %v9034_v48  ;;  %v4803_v5 = vunpack.i.h.bf16 %v6483_v55  ;;  %v4828_v42 = vunpack.i.h.bf16 %v6551_v29  ;;  %v4833_v24 = vunpack.i.h.bf16 %v6561_v18 }
 0x13f   : > { %1732 = vmatprep.subr.bf16.mxu0 %v1396_v3  ;;  %v6577_v0 = vpop.permute.xlu0 %4835  ;;  %v1112_v15 = vsel %vm1097_vm7, %v9035_v13, %v4822_v12  ;;  %v918_v57 = vsel %vm903_vm5, %v9036_v37, %v4812_v32  ;;  %v1468_v63 = vpack.c.bf16 %v1111_v19, %v1111_v19  ;;  %v4798_v2 = vunpack.i.h.bf16 %v6485_v52 }
 0x140   : > { %v1443_v14 = vpack.c.bf16 %v1015_v7, %v918_v57  ;;  %v4838_v50 = vunpack.i.h.bf16 %v6577_v0  ;;  %v1467_v39 = vpack.c.bf16 %v1112_v15, %v1112_v15  ;;  %v4843_v54 = vunpack.i.h.bf16 %v6589_v23  ;;  %v9053_v15 = vld [vmem:[#allocation43_spill] sm:$0xff] }
 0x141   : > { %v9038_v55 = vunpack.i.h.bf16 %v9037_v36  ;;  %v9040_v3 = vunpack.i.h.bf16 %v9039_v26  ;;  %v9042_v51 = vunpack.i.h.bf16 %v9041_v21  ;;  %v4808_v61 = vunpack.i.h.bf16 %v6513_v53 }
 0x142   : > { %1733 = vmatpush1.bf16.msra.mxu0 %v1395_v4  ;;  %v6620_v33 = vpop.permute.xlu1 %4850  ;;  %v9043_v4 = vld [vmem:[#allocation10_spill] sm:$0xff]  ;;  %v9045_v10 = vunpack.i.l.bf16 %v6301_v34  ;;  %v9046_v27 = vunpack.i.l.bf16 %v6331_v47  ;;  %v9048_v7 = vunpack.i.l.bf16 %v9047_v56  ;;  %v9054_v37 = vunpack.i.l.bf16 %v9053_v15  ;;  %v9064_v56 = vld [vmem:[#allocation24_spill] sm:$0xff] }
 0x143   : > { %1734 = vmatprep.subr.bf16.mxu0 %v1420_v46  ;;  %v6591_v28 = vpop.permute.xlu0 %4845  ;;  %v405_v11 = vsel %vm394_vm0, %v4788_v62, %v9038_v55  ;;  %v502_v22 = vsel %vm491_vm1, %v4793_v40, %v9040_v3  ;;  %v503_v32 = vsel %vm491_vm1, %v9042_v51, %v4793_v40  ;;  %v9044_v52 = vunpack.i.h.bf16 %v9043_v4 }
 0x144   : > { %v4853_v46 = vunpack.i.h.bf16 %v6620_v33  ;;  %v6652_v20 = vsel %vm394_vm0, %v4828_v42, %v9045_v10  ;;  %v1376_v41 = vpack.c.bf16 %v502_v22, %v405_v11  ;;  %v6661_v53 = vsel %vm491_vm1, %v4833_v24, %v9046_v27  ;;  %v9055_v11 = vld [vmem:[#allocation13_spill] sm:$0xff] }
 0x145   : > { %v406_v45 = vsel %vm394_vm0, %v9044_v52, %v4788_v62  ;;  %v6669_v34 = vsel %vm588_vm2, %v4838_v50, %v9048_v7  ;;  %v9051_v62 = vld [vmem:[#allocation21_spill] sm:$0xff]  ;;  %v1384_v13 = vpack.c.bf16 %v6661_v53, %v6652_v20  ;;  %v6687_v57 = vsel %vm685_vm3, %v4843_v54, %v9054_v37  ;;  %v9069_v37 = vld [vmem:[#allocation16_spill] sm:$0xff] }
 0x146   : > { %1735 = vmatpush1.bf16.msra.mxu0 %v1419_v9  ;;  %v1519_v9 = vsel %vm1493_vm8, %v1467_v39, 0  ;;  %v9052_v48 = vunpack.i.h.bf16 %v9051_v62  ;;  %v6697_v39 = vsel %vm903_vm5, %v4853_v46, %v4772_v59  ;;  %v9056_v3 = vunpack.i.h.bf16 %v9055_v11  ;;  %v9113_v53 = vld [vmem:[#allocation9_spill] sm:$0xff] }
 0x147   : > { %1736 = vmatprep.subr.bf16.mxu0 %v1444_v6  ;;  %v6622_v49 = vpop.permute.xlu0 %4855  ;;  %v9049_v6 = vld [vmem:[#allocation20_spill] sm:$0xff]  ;;  %v9058_v21 = vunpack.i.h.bf16 %v9057_v43  ;;  %v9065_v7 = vunpack.i.h.bf16 %v9064_v56  ;;  %v4832_v11 = vunpack.i.l.bf16 %v6561_v18 }
 0x148   : > { %v4858_v12 = vunpack.i.h.bf16 %v6622_v49  ;;  %v9050_v40 = vunpack.i.h.bf16 %v9049_v6  ;;  %v696_v19 = vsel %vm685_vm3, %v4803_v5, %v9052_v48  ;;  %v697_v22 = vsel %vm685_vm3, %v9056_v3, %v4803_v5 }
 0x149   : > { %v600_v51 = vsel %vm588_vm2, %v9058_v21, %v4798_v2  ;;  %v4827_v3 = vunpack.i.l.bf16 %v6551_v29 }
 0x14a   : > { %1737 = vmatpush1.bf16.msra.mxu0 %v1443_v14  ;;  %v599_v47 = vsel %vm588_vm2, %v4798_v2, %v9050_v40  ;;  %v1408_v14 = vpack.c.bf16 %v6687_v57, %v6669_v34  ;;  %v6705_v55 = vsel %vm1000_vm6, %v4858_v12, %v4777_v58  ;;  %v4818_v58 = vunpack.i.h.bf16 %v6530_v30  ;;  %v9116_v34 = vld [vmem:[#allocation36_spill] sm:$0xff] }
 0x14b   : > { %4306 = vmatprep.subr.msk.bf16.mxu0 %vm1493_vm8, %v1468_v63  ;;  %v1375_v63 = vpack.c.bf16 %v503_v32, %v406_v45  ;;  %v1400_v59 = vpack.c.bf16 %v696_v19, %v599_v47  ;;  %v1456_v25 = vpack.c.bf16 %v6705_v55, %v6697_v39  ;;  %v9059_v32 = vld [vmem:[#allocation22_spill] sm:$0xff]  ;;  %v4813_v2 = vunpack.i.h.bf16 %v6511_v1  ;;  %v9066_v47 = vld [vmem:[#allocation4_spill] sm:$0xff]  ;;  %v9067_v1 = vld [vmem:[#allocation23_spill] sm:$0xff] }
 0x14c   : > { %v9060_v4 = vunpack.i.h.bf16 %v9059_v32  ;;  %v1399_v52 = vpack.c.bf16 %v697_v22, %v600_v51  ;;  %v9061_v45 = vld [vmem:[#allocation14_spill] sm:$0xff]  ;;  %v4823_v30 = vunpack.i.h.bf16 %v6527_v17  ;;  %v1010_v40 = vsel %vm1000_vm6, %v4818_v58, %v9065_v7  ;;  %v9071_v22 = vld [vmem:[#allocation17_spill] sm:$0xff] }
 0x14d   : > { %v9062_v10 = vunpack.i.h.bf16 %v9061_v45  ;;  %v9068_v19 = vunpack.i.h.bf16 %v9067_v1  ;;  %v9072_v43 = vunpack.i.h.bf16 %v9071_v22  ;;  %v9073_v51 = vunpack.i.l.bf16 %v9071_v22  ;;  %v9082_v22 = vld [vmem:[#allocation33_spill] sm:$0xff] }
 0x14e   : > { %1739 = vmatpush1.bf16.msra.mxu0 %v1519_v9  ;;  %v816_v5 = vsel %vm806_vm4, %v4808_v61, %v9060_v4  ;;  %v9074_v4 = vld [vmem:[#allocation15_spill] sm:$0xff]  ;;  %v9117_v57 = vunpack.i.h.bf16 %v9116_v34 }
 0x14f   : > { %1812 = vmatprep.subr.bf16.mxu0 %v1376_v41  ;;  %v817_v9 = vsel %vm806_vm4, %v9062_v10, %v4808_v61  ;;  %v9063_v41 = vld [vmem:[#allocation5_spill] sm:$0xff]  ;;  %v913_v15 = vsel %vm903_vm5, %v4813_v2, %v9068_v19  ;;  %v9070_v61 = vunpack.i.h.bf16 %v9069_v37  ;;  %v1107_v21 = vsel %vm1097_vm7, %v4823_v30, %v9072_v43 }
 0x150   : > { %v1424_v27 = vpack.c.bf16 %v816_v5, %v9063_v41  ;;  %v1423_v48 = vpack.c.bf16 %v817_v9, %v9066_v47  ;;  %v1448_v17 = vpack.c.bf16 %v1010_v40, %v913_v15  ;;  %v9075_v5 = vunpack.i.h.bf16 %v9074_v4 }
 0x151   : > { %4307 = vmatmul.mubr.msk.bf16.vlgmr.msra.gmra.mrb[8].mxu0 %vm1489_vm9, %v6566_v16  ;;  %v1472_v45 = vpack.c.bf16 %v1107_v21, %v1107_v21  ;;  %v4842_v9 = vunpack.i.l.bf16 %v6589_v23  ;;  %v4837_v41 = vunpack.i.l.bf16 %v6577_v0  ;;  %v9081_v15 = vunpack.i.l.bf16 %v9037_v36 }
 0x152   : > { %1813 = vmatpush1.bf16.msra.mxu0 %v1375_v63  ;;  %1844 = vmatprep.mubr.bf16.mxu0 %v8960_v38  ;;  %v1011_v63 = vsel %vm1000_vm6, %v9070_v61, %v4818_v58  ;;  %v914_v58 = vsel %vm903_vm5, %v9075_v5, %v4813_v2  ;;  %v9080_v2 = vunpack.i.l.bf16 %v9039_v26  ;;  %v9083_v43 = vunpack.i.l.bf16 %v9082_v22  ;;  %v9084_v26 = vld [vmem:[#allocation32_spill] sm:$0xff] }
 0x153   : > { %1814 = vmatprep.subr.bf16.mxu0 %v1400_v59  ;;  %v1108_v59 = vsel %vm1097_vm7, %v9073_v51, %v4823_v30  ;;  %v9078_v30 = vld [vmem:[#allocation28_spill] sm:$0xff]  ;;  %v402_v37 = vsel %vm394_vm0, %v9081_v15, %v4827_v3  ;;  %v9085_v51 = vunpack.i.l.bf16 %v9084_v26  ;;  %v9087_v4 = vunpack.i.l.bf16 %v9049_v6  ;;  %v9094_v15 = vld [vmem:[#allocation6_spill] sm:$0xff] }
 0x154   : > { %v1471_v10 = vpack.c.bf16 %v1108_v59, %v1108_v59  ;;  %v9079_v47 = vunpack.i.l.bf16 %v9078_v30  ;;  %v499_v19 = vsel %vm491_vm1, %v9080_v2, %v4832_v11  ;;  %v595_v21 = vsel %vm588_vm2, %v4837_v41, %v9083_v43 }
 0x155   : > { %v1379_v36 = vpack.c.bf16 %v499_v19, %v402_v37  ;;  %v596_v5 = vsel %vm588_vm2, %v9087_v4, %v4837_v41  ;;  %v4852_v6 = vunpack.i.l.bf16 %v6620_v33  ;;  %v9090_v41 = vunpack.i.l.bf16 %v9059_v32 }
 0x156   : > { %1815 = vmatpush1.bf16.msra.mxu0 %v1399_v52  ;;  %v1447_v52 = vpack.c.bf16 %v1011_v63, %v914_v58  ;;  %v1531_v61 = vsel %vm1493_vm8, %v1471_v10, 0  ;;  %v9097_v22 = vunpack.i.l.bf16 %v9064_v56 }
 0x157   : > { %1816 = vmatprep.subr.bf16.mxu0 %v1424_v27  ;;  %v9076_v27 = vld [vmem:[#allocation29_spill] sm:$0xff] }
 0x158   : > { %v9077_v7 = vunpack.i.l.bf16 %v9076_v27 }
 0x15a   : > { %1817 = vmatpush1.bf16.msra.mxu0 %v1423_v48  ;;  %v401_v40 = vsel %vm394_vm0, %v4827_v3, %v9077_v7  ;;  %v498_v48 = vsel %vm491_vm1, %v4832_v11, %v9079_v47  ;;  %v692_v11 = vsel %vm685_vm3, %v4842_v9, %v9085_v51  ;;  %v9086_v3 = vunpack.i.l.bf16 %v9051_v62 }
 0x15b   : > { %1818 = vmatprep.subr.bf16.mxu0 %v1448_v17  ;;  %v1380_v63 = vpack.c.bf16 %v498_v48, %v401_v40  ;;  %v4847_v17 = vunpack.i.l.bf16 %v6591_v28  ;;  %v1404_v58 = vpack.c.bf16 %v692_v11, %v595_v21  ;;  %v9091_v40 = vld [vmem:[#allocation7_spill] sm:$0xff]  ;;  %v9092_v48 = vld [vmem:[#allocation38_spill] sm:$0xff]  ;;  %v9098_v21 = vld [vmem:[#allocation41_spill] sm:$0xff] }
 0x15c   : > { %v693_v59 = vsel %vm685_vm3, %v9086_v3, %v4842_v9  ;;  %v4861_v9 = vpop.permute.xlu1 %4860  ;;  %v9093_v2 = vunpack.i.l.bf16 %v9092_v48  ;;  %v9099_v26 = vunpack.i.l.bf16 %v9098_v21  ;;  %v9100_v11 = vld [vmem:[#allocation25_spill] sm:$0xff] }
 0x15d   : > { %v1403_v27 = vpack.c.bf16 %v693_v59, %v596_v5  ;;  %v813_v7 = vsel %vm806_vm4, %v9090_v41, %v4847_v17  ;;  %v4862_v47 = vunpack.i.l.bf16 %v4861_v9  ;;  %v9102_v59 = vunpack.i.l.bf16 %v9067_v1  ;;  %v9105_v1 = vld [vmem:[#allocation26_spill] sm:$0xff] }
 0x15e   : > { %1819 = vmatpush1.bf16.msra.mxu0 %v1447_v52  ;;  %v4857_v52 = vunpack.i.l.bf16 %v6622_v49  ;;  %v1427_v37 = vpack.c.bf16 %v813_v7, %v9094_v15  ;;  %v4848_v41 = vunpack.i.h.bf16 %v6591_v28  ;;  %v4863_v35 = vunpack.i.h.bf16 %v4861_v9  ;;  %v6901_v49 = vpop.permute.xlu0 %1486 }
 0x15f   : > { %4310 = vmatprep.subr.msk.bf16.mxu0 %vm1493_vm8, %v1472_v45  ;;  %v9088_v45 = vld [vmem:[#allocation34_spill] sm:$0xff]  ;;  %v1103_v51 = vsel %vm1097_vm7, %v4862_v47, %v9099_v26  ;;  %v910_v56 = vsel %vm903_vm5, %v9102_v59, %v4852_v6 }
 0x160   : > { %v9089_v10 = vunpack.i.l.bf16 %v9088_v45  ;;  %v1006_v19 = vsel %vm1000_vm6, %v4857_v52, %v9093_v2  ;;  %v1476_v5 = vpack.c.bf16 %v1103_v51, %v1103_v51  ;;  %v808_v23 = vsel %vm806_vm4, %v4848_v41, %v4767_v44  ;;  %v9115_v44 = vld [vmem:[#allocation8_spill] sm:$0xff] }
 0x161   : > { %v1099_v9 = vsel %vm1097_vm7, %v4863_v35, %v4763_v8 }
 0x162   : > { %1821 = vmatpush1.bf16.msra.mxu0 %v1531_v61  ;;  %v812_v62 = vsel %vm806_vm4, %v4847_v17, %v9089_v10  ;;  %v9095_v61 = vld [vmem:[#allocation39_spill] sm:$0xff]  ;;  %v1007_v17 = vsel %vm1000_vm6, %v9097_v22, %v4857_v52 }
 0x163   : > { %1894 = vmatprep.subr.bf16.mxu0 %v1380_v63  ;;  %v1428_v30 = vpack.c.bf16 %v812_v62, %v9091_v40  ;;  %v9096_v63 = vunpack.i.l.bf16 %v9095_v61  ;;  %v1451_v4 = vpack.c.bf16 %v1007_v17, %v910_v56  ;;  %v9103_v52 = vld [vmem:[#allocation27_spill] sm:$0xff]  ;;  %v9106_v62 = vunpack.i.h.bf16 %v9105_v1 }
 0x164   : > { %v9104_v45 = vunpack.i.h.bf16 %v9103_v52  ;;  %v1480_v17 = vpack.c.bf16 %v1099_v9, %v1099_v9 }
 0x165   : > { %4311 = vmatmul.mubr.msk.bf16.vlgmr.msra.gmra.mrb[12].mxu0 %vm1489_vm9, %v6566_v16  ;;  %v909_v32 = vsel %vm903_vm5, %v4852_v6, %v9096_v63  ;;  %v398_v6 = vsel %vm394_vm0, %v9106_v62, %v4828_v42  ;;  %v9109_v42 = vld [vmem:[#allocation31_spill] sm:$0xff]  ;;  %v9121_v63 = vunpack.i.h.bf16 %v9120_v31 }
 0x166   : > { %1895 = vmatpush1.bf16.msra.mxu0 %v1379_v36  ;;  %1926 = vmatprep.mubr.bf16.mxu0 %v8960_v38  ;;  %v1452_v43 = vpack.c.bf16 %v1006_v19, %v909_v32  ;;  %v9101_v36 = vunpack.i.h.bf16 %v9100_v11  ;;  %v495_v10 = vsel %vm491_vm1, %v9104_v45, %v4833_v24  ;;  %v9107_v24 = vld [vmem:[#allocation30_spill] sm:$0xff]  ;;  %v9110_v40 = vunpack.i.h.bf16 %v9109_v42  ;;  %v9118_v19 = vld [vmem:[#allocation40_spill] sm:$0xff] }
 0x167   : > { %1896 = vmatprep.subr.bf16.mxu0 %v1404_v58  ;;  %v1383_v18 = vpack.c.bf16 %v495_v10, %v398_v6  ;;  %v9108_v7 = vunpack.i.h.bf16 %v9107_v24  ;;  %v9119_v15 = vunpack.i.l.bf16 %v9118_v19  ;;  %v906_v8 = vsel %vm903_vm5, %v9121_v63, %v4853_v46 }
 0x168   : > { %v1104_v3 = vsel %vm1097_vm7, %v9101_v36, %v4862_v47  ;;  %v592_v28 = vsel %vm588_vm2, %v9110_v40, %v4838_v50 }
 0x169   : > { %v1475_v58 = vpack.c.bf16 %v1104_v3, %v1104_v3  ;;  %v689_v29 = vsel %vm685_vm3, %v9108_v7, %v4843_v54  ;;  %v9111_v54 = vld [vmem:[#allocation35_spill] sm:$0xff] }
 0x16a   : > { %1897 = vmatpush1.bf16.msra.mxu0 %v1403_v27  ;;  %v1407_v0 = vpack.c.bf16 %v689_v29, %v592_v28  ;;  %v9112_v20 = vunpack.i.h.bf16 %v9111_v54 }
 0x16b   : > { %1898 = vmatprep.subr.bf16.mxu0 %v1428_v30  ;;  %v1543_v27 = vsel %vm1493_vm8, %v1475_v58, 0  ;;  %v9114_v30 = vlaneseq }
 0x16c   : > { %v809_v50 = vsel %vm806_vm4, %v9112_v20, %v4848_v41 }
 0x16d   : > { %v6881_v47 = vshrl.u32 %v9114_v30, 7  ;;  %v1431_v48 = vpack.c.bf16 %v809_v50, %v9115_v44 }
 0x16e   : > { %1899 = vmatpush1.bf16.msra.mxu0 %v1427_v37  ;;  %v1100_v37 = vsel %vm1097_vm7, %v9119_v15, %v4863_v35 }
 0x16f   : > { %1900 = vmatprep.subr.bf16.mxu0 %v1452_v43  ;;  %v6891_v2 = vsub.s32 2, %v6881_v47  ;;  %v6909_v61 = vsub.s32 3, %v6881_v47  ;;  %v1479_v43 = vpack.c.bf16 %v1100_v37, %v1100_v37  ;;  %v6966_v42 = vsub.s32 0, %v6881_v47 }
 0x170   : > { %v6969_v40 = vsub.s32 1, %v6881_v47 }
 0x171   : > { %v1555_v36 = vsel %vm1493_vm8, %v1479_v43, 0 }
 0x172   : > { %1901 = vmatpush1.bf16.msra.mxu0 %v1451_v4 }
 0x173   : > { %4314 = vmatprep.subr.msk.bf16.mxu0 %vm1493_vm8, %v1476_v5 }
 0x176   : > { %1903 = vmatpush1.bf16.msra.mxu0 %v1543_v27 }
 0x177   : > { %1976 = vmatprep.subr.bf16.mxu0 %v1384_v13  ;;  %v1432_v13 = vpack.c.bf16 %v808_v23, %v9113_v53 }
 0x179   : > { %4315 = vmatmul.mubr.msk.bf16.vlgmr.msra.gmra.mrb[16].mxu0 %vm1489_vm9, %v6566_v16 }
 0x17a   : > { %1977 = vmatpush1.bf16.msra.mxu0 %v1383_v18  ;;  %2008 = vmatprep.mubr.bf16.mxu0 %v8960_v38 }
 0x17b   : > { %1978 = vmatprep.subr.bf16.mxu0 %v1408_v14  ;;  %v1003_v14 = vsel %vm1000_vm6, %v9117_v57, %v4858_v12  ;;  %v6906_v12 = vld [vmem:[%s8703_s7] sm:$0xff] }
 0x17c   : > { %v1455_v32 = vpack.c.bf16 %v1003_v14, %v906_v8  ;;  %v6923_v51 = vrot.slane %v6906_v12, %v6891_v2  ;;  %v6928_v46 = vrot.slane %v6906_v12, %v6909_v61  ;;  %v6979_v50 = vrot.slane %v6906_v12, %v6969_v40 }
 0x17e   : > { %1979 = vmatpush1.bf16.msra.mxu0 %v1407_v0  ;;  %9122 = vst [vmem:[#allocation18_spill] sm:$0xff] %v6923_v51  ;;  %9123 = vst [vmem:[#allocation19_spill] sm:$0xff] %v6928_v46  ;;  %v6974_v0 = vrot.slane %v6906_v12, %v6966_v42 }
 0x17f   : > { %1980 = vmatprep.subr.bf16.mxu0 %v1432_v13  ;;  %9125 = vst [vmem:[#allocation10_spill] sm:$0xff] %v6979_v50 }
 0x180   : > { %9124 = vst [vmem:[#allocation11_spill] sm:$0xff] %v6974_v0 }
 0x182   : > { %1981 = vmatpush1.bf16.msra.mxu0 %v1431_v48 }
 0x183   : > { %1982 = vmatprep.subr.bf16.mxu0 %v1456_v25  ;;  %v1641_v22 = vpop.f32.mrb[0].mxu1 }
 0x184   : > { %v1643_v21 = vpop.f32.mrb[1].mxu1  ;;  %v1642_v26 = vadd.f32 %v1641_v22, %v6901_v49 }
 0x185   : > { %v1645_v33 = vpop.f32.mrb[2].mxu1  ;;  %v1644_v11 = vadd.f32 %v1643_v21, %v6901_v49  ;;  %v7022_v21 = vsub.s32 4, %v6881_v47 }
 0x186   : > { %1983 = vmatpush1.bf16.msra.mxu0 %v1455_v32  ;;  %v1646_v39 = vpop.f32.mrb[3].mxu1  ;;  %v2060_v55 = vmax.f32 %v1642_v26, 0.0  ;;  %v7025_v26 = vsub.s32 5, %v6881_v47 }
 0x187   : > { %4318 = vmatprep.subr.msk.bf16.mxu0 %vm1493_vm8, %v1480_v17  ;;  %v2061_v25 = vmax.f32 %v1644_v11, 0.0 }
 0x188   : > { %v6933_v3 = vmul.f32 %v6923_v51, %v2060_v55 }
 0x189   : > { %v6936_v59 = vmul.f32 %v6928_v46, %v2061_v25 }
 0x18a   : > { %1985 = vmatpush1.bf16.msra.mxu0 %v1555_v36 }
 0x18b   : > { %v6940_v56 = vpack.i.bf16 %v6936_v59, %v6933_v3 }
 0x18d   : > { %4319 = vmatmul.mubr.msk.bf16.vlgmr.msra.gmra.mrb[20].mxu0 %vm1489_vm9, %v6566_v16  ;;  %4876 = vrot.lane.b32.xlu0 %v6940_v56, %s5332_s11 }
 0x18e   : > { %3483 = vmatprep.mubr.bf16.mxu0 %v8960_v38 }
 0x191   : > { %4881 = vrot.lane.b32.xlu0 %v6940_v56, %s5333_s12 }
 0x199   : > { %v6949_v4 = vpop.f32.mrb[4].mxu1 }
 0x19a   : > { %v6951_v5 = vpop.f32.mrb[5].mxu1 }
 0x19b   : > { %v1727_v58 = vpop.f32.mrb[6].mxu1 }
 0x19c   : > { %v1728_v52 = vpop.f32.mrb[7].mxu1 }
 0x19d   : > { %v7037_v52 = vrot.slane %v6906_v12, %v7022_v21 }
 0x19f   : > { %9126 = vst [vmem:[#allocation42_spill] sm:$0xff] %v7037_v52 }
 0x1b3   : > { %v6953_v45 = vpop.f32.mrb[8].mxu1 }
 0x1b4   : > { %v6955_v10 = vpop.f32.mrb[9].mxu1 }
 0x1b5   : > { %v1809_v1 = vpop.f32.mrb[10].mxu1 }
 0x1b6   : > { %v1810_v16 = vpop.f32.mrb[11].mxu1  ;;  %v7041_v1 = vrot.slane %v6906_v12, %v7025_v26 }
 0x1b8   : > { %9127 = vst [vmem:[#allocation20_spill] sm:$0xff] %v7041_v1 }
 0x1c7   : > { %v6957_v62 = vpop.f32.mrb[12].mxu1 }
 0x1c8   : > { %v6959_v6 = vpop.f32.mrb[13].mxu1 }
 0x1c9   : > { %v1891_v27 = vpop.f32.mrb[14].mxu1 }
 0x1ca   : > { %v1892_v41 = vpop.f32.mrb[15].mxu1 }
 0x1ec   : > { %v6961_v18 = vpop.f32.mrb[16].mxu1 }
 0x1ed   : > { %v6963_v24 = vpop.f32.mrb[17].mxu1 }
 0x1ee   : > { %v1973_v7 = vpop.f32.mrb[18].mxu1 }
 0x1ef   : > { %v1974_v29 = vpop.f32.mrb[19].mxu1 }
 0x1fb   : > { %v1600_v28 = vpop.f32.mrb[0].mxu0 }
 0x1fc   : > { %v1601_v23 = vadd.f32 %v1600_v28, %v6901_v49  ;;  %v1602_v54 = vpop.f32.mrb[1].mxu0 }
 0x1fd   : > { %v1603_v20 = vadd.f32 %v1602_v54, %v6901_v49  ;;  %v1604_v53 = vpop.f32.mrb[2].mxu0  ;;  %v7059_v54 = vsub.s32 6, %v6881_v47 }
 0x1fe   : > { %v2058_v13 = vmax.f32 %v1601_v23, 0.0  ;;  %v1605_v30 = vpop.f32.mrb[3].mxu0  ;;  %v1724_v23 = vadd.f32 %v6949_v4, %v6901_v49  ;;  %v7072_v4 = vsub.s32 7, %v6881_v47 }
 0x1ff   : > { %v2059_v35 = vmax.f32 %v1603_v20, 0.0  ;;  %v6981_v44 = vpop.permute.xlu0 %4876  ;;  %v7065_v53 = vrot.slane %v6906_v12, %v7059_v54 }
 0x200   : > { %v6984_v48 = vmul.f32 %v6974_v0, %v2058_v13  ;;  %v8834_v57 = vunpack.i.h.bf16 %v6981_v44  ;;  %v8837_v14 = vunpack.i.l.bf16 %v6981_v44  ;;  %v2064_v20 = vmax.f32 %v1724_v23, 0.0 }
 0x201   : > { %v6987_v34 = vmul.f32 %v6979_v50, %v2059_v35  ;;  %9130 = vst [vmem:[#allocation13_spill] sm:$0xff] %v7065_v53 }
 0x202   : > { %v2297_v31 = vsel %vm394_vm0, %v8837_v14, %v8834_v57  ;;  %v4910_v39 = vpack.i.bf16 %v6936_v59, %v6984_v48  ;;  %v7075_v35 = vmul.f32 %v7065_v53, %v2064_v20 }
 0x203   : > { %v4885_v9 = vpack.i.bf16 %v6987_v34, %v6984_v48  ;;  %v6993_v19 = vpop.permute.xlu0 %4881  ;;  %v4905_v11 = vpack.i.bf16 %v6933_v3, %v6987_v34 }
 0x204   : > { %v8835_v15 = vunpack.i.h.bf16 %v6993_v19  ;;  %v8836_v37 = vunpack.i.l.bf16 %v6993_v19 }
 0x205   : > { %4886 = vrot.lane.b32.xlu0 %v4885_v9, %s5334_s13  ;;  %4866 = vrot.lane.b32.xlu1 %v4885_v9, %s5332_s11 }
 0x206   : > { %v2393_v8 = vsel %vm491_vm1, %v8836_v37, %v8835_v15 }
 0x207   : > { %v3242_v22 = vpack.c.bf16 %v2393_v8, %v2297_v31 }
 0x208   : > { %v7005_v63 = vpop.f32.mrb[20].mxu1 }
 0x209   : > { %v7013_v32 = vpop.f32.mrb[21].mxu1  ;;  %4896 = vrot.lane.b32.xlu0 %v6940_v56, %s5334_s13  ;;  %4871 = vrot.lane.b32.xlu1 %v4885_v9, %s5333_s12 }
 0x20a   : > { %v2055_v17 = vpop.f32.mrb[22].mxu1  ;;  %3494 = vmatprep.subr.bf16.mxu1 %v3242_v22 }
 0x20b   : > { %v2056_v43 = vpop.f32.mrb[23].mxu1 }
 0x20c   : > { %v7094_v43 = vld [vmem:[%s8703_s7 + $0x8] sm:$0xff] }
 0x20d   : > { %4901 = vrot.lane.b32.xlu0 %v6940_v56, %s5335_s14  ;;  %4891 = vrot.lane.b32.xlu1 %v4885_v9, %s5335_s14 }
 0x210   : > { %v1682_v33 = vpop.f32.mrb[4].mxu0 }
 0x211   : > { %v1683_v55 = vadd.f32 %v1682_v33, %v6901_v49  ;;  %v1684_v25 = vpop.f32.mrb[5].mxu0  ;;  %4906 = vrot.lane.b32.xlu0 %v4905_v11, %s5336_s15  ;;  %4911 = vrot.lane.b32.xlu1 %v4910_v39, %s5336_s15  ;;  %v7098_v33 = vrot.slane %v7094_v43, %v6966_v42 }
 0x212   : > { %v1685_v36 = vadd.f32 %v1684_v25, %v6901_v49  ;;  %v1686_v58 = vpop.f32.mrb[6].mxu0 }
 0x213   : > { %v1687_v16 = vpop.f32.mrb[7].mxu0  ;;  %v2062_v27 = vmax.f32 %v1683_v55, 0.0  ;;  %9132 = vst [vmem:[#allocation22_spill] sm:$0xff] %v7098_v33 }
 0x214   : > { %v2063_v41 = vmax.f32 %v1685_v36, 0.0  ;;  %v7112_v36 = vrot.slane %v7094_v43, %v6969_v40 }
 0x215   : > { %4921 = vrot.lane.b32.xlu0 %v4905_v11, %s5338_s17  ;;  %4916 = vrot.lane.b32.xlu1 %v4905_v11, %s5337_s16  ;;  %v7046_v7 = vmul.f32 %v7037_v52, %v2062_v27 }
 0x216   : > { %v7049_v29 = vmul.f32 %v7041_v1, %v2063_v41  ;;  %9134 = vst [vmem:[#allocation5_spill] sm:$0xff] %v7112_v36 }
 0x217   : > { %9128 = vst [vmem:[#allocation21_spill] sm:$0xff] %v7046_v7 }
 0x218   : > { %9129 = vst [vmem:[#allocation43_spill] sm:$0xff] %v7049_v29  ;;  %v4945_v28 = vpack.i.bf16 %v7049_v29, %v7046_v7  ;;  %v4965_v47 = vpack.i.bf16 %v7075_v35, %v7049_v29 }
 0x219   : > { %4941 = vrot.lane.b32.xlu0 %v6940_v56, %s5340_s18  ;;  %4926 = vrot.lane.b32.xlu1 %v4910_v39, %s5337_s16  ;;  %v1726_v56 = vadd.f32 %v6951_v5, %v6901_v49 }
 0x21b   : > { %v2065_v8 = vmax.f32 %v1726_v56, 0.0  ;;  %v1806_v56 = vadd.f32 %v6953_v45, %v6901_v49  ;;  %v7140_v45 = vrot.slane %v7094_v43, %v7022_v21 }
 0x21d   : > { %4946 = vrot.lane.b32.xlu0 %v4945_v28, %s5336_s15  ;;  %4931 = vrot.lane.b32.xlu1 %v4910_v39, %s5338_s17  ;;  %9137 = vst [vmem:[#allocation23_spill] sm:$0xff] %v7140_v45 }
 0x221   : > { %4951 = vrot.lane.b32.xlu0 %v4945_v28, %s5337_s16  ;;  %4936 = vrot.lane.b32.xlu1 %v4885_v9, %s5340_s18  ;;  %v7081_v9 = vrot.slane %v6906_v12, %v7072_v4 }
 0x223   : > { %9131 = vst [vmem:[#allocation12_spill] sm:$0xff] %v7081_v9  ;;  %v7089_v17 = vmul.f32 %v7081_v9, %v2065_v8  ;;  %v1808_v8 = vadd.f32 %v6955_v10, %v6901_v49  ;;  %v2054_v10 = vadd.f32 %v7013_v32, %v6901_v49 }
 0x224   : > { %v1764_v13 = vpop.f32.mrb[8].mxu0 }
 0x225   : > { %v1766_v30 = vpop.f32.mrb[9].mxu0  ;;  %4956 = vrot.lane.b32.xlu0 %v4945_v28, %s5338_s17  ;;  %4961 = vrot.lane.b32.xlu1 %v4945_v28, %s5340_s18  ;;  %v1765_v5 = vadd.f32 %v1764_v13, %v6901_v49  ;;  %v4985_v55 = vpack.i.bf16 %v7089_v17, %v7075_v35 }
 0x226   : > { %v1768_v31 = vpop.f32.mrb[10].mxu0  ;;  %v1767_v39 = vadd.f32 %v1766_v30, %v6901_v49  ;;  %v2068_v30 = vmax.f32 %v1806_v56, 0.0 }
 0x227   : > { %v1769_v22 = vpop.f32.mrb[11].mxu0  ;;  %v2066_v12 = vmax.f32 %v1765_v5, 0.0  ;;  %v7132_v31 = vrot.slane %v7094_v43, %v6891_v2 }
 0x228   : > { %v2067_v25 = vmax.f32 %v1767_v39, 0.0 }
 0x229   : > { %4966 = vrot.lane.b32.xlu0 %v4965_v47, %s5332_s11  ;;  %4971 = vrot.lane.b32.xlu1 %v4965_v47, %s5333_s12  ;;  %v7103_v11 = vmul.f32 %v7098_v33, %v2066_v12  ;;  %9136 = vst [vmem:[#allocation4_spill] sm:$0xff] %v7132_v31  ;;  %v7143_v5 = vmul.f32 %v7132_v31, %v2068_v30 }
 0x22a   : > { %v7119_v16 = vmul.f32 %v7112_v36, %v2067_v25  ;;  %v7147_v12 = vrot.slane %v7094_v43, %v6909_v61  ;;  %v7161_v25 = vld [vmem:[%s8703_s7 + $0x10] sm:$0xff] }
 0x22b   : > { %9133 = vst [vmem:[#allocation14_spill] sm:$0xff] %v7103_v11  ;;  %v5010_v58 = vpack.i.bf16 %v7103_v11, %v7089_v17  ;;  %v7168_v32 = vrot.slane %v7161_v25, %v7072_v4 }
 0x22c   : > { %9135 = vst [vmem:[#allocation24_spill] sm:$0xff] %v7119_v16  ;;  %v5025_v20 = vpack.i.bf16 %v7119_v16, %v7103_v11  ;;  %9138 = vst [vmem:[#allocation16_spill] sm:$0xff] %v7147_v12 }
 0x22d   : > { %4976 = vrot.lane.b32.xlu0 %v4965_v47, %s5334_s13  ;;  %4981 = vrot.lane.b32.xlu1 %v4965_v47, %s5335_s14  ;;  %v2069_v47 = vmax.f32 %v1808_v8, 0.0  ;;  %9140 = vst [vmem:[#allocation15_spill] sm:$0xff] %v7168_v32 }
 0x231   : > { %4986 = vrot.lane.b32.xlu0 %v4985_v55, %s5336_s15  ;;  %4996 = vrot.lane.b32.xlu1 %v4985_v55, %s5338_s17 }
 0x235   : > { %4991 = vrot.lane.b32.xlu0 %v4985_v55, %s5337_s16  ;;  %5011 = vrot.lane.b32.xlu1 %v5010_v58, %s5333_s12 }
 0x238   : > { %v1846_v27 = vpop.f32.mrb[12].mxu0 }
 0x239   : > { %v1848_v41 = vpop.f32.mrb[13].mxu0  ;;  %5001 = vrot.lane.b32.xlu0 %v4985_v55, %s5340_s18  ;;  %5021 = vrot.lane.b32.xlu1 %v5010_v58, %s5335_s14  ;;  %v1847_v13 = vadd.f32 %v1846_v27, %v6901_v49  ;;  %v5045_v55 = vpack.i.bf16 %v7143_v5, %v7119_v16  ;;  %v2081_v27 = vmax.f32 %v2054_v10, 0.0  ;;  %v7188_v10 = vrot.slane %v7094_v43, %v7025_v26 }
 0x23a   : > { %v1850_v28 = vpop.f32.mrb[14].mxu0 }
 0x23b   : > { %v1851_v23 = vpop.f32.mrb[15].mxu0  ;;  %v2070_v22 = vmax.f32 %v1847_v13, 0.0  ;;  %v7175_v56 = vmul.f32 %v7168_v32, %v2081_v27  ;;  %9142 = vst [vmem:[#allocation28_spill] sm:$0xff] %v7188_v10  ;;  %v7216_v32 = vrot.slane %v7161_v25, %v6966_v42 }
 0x23d   : > { %5006 = vrot.lane.b32.xlu0 %v5010_v58, %s5332_s11  ;;  %5026 = vrot.lane.b32.xlu1 %v5025_v20, %s5336_s15  ;;  %v7154_v39 = vmul.f32 %v7140_v45, %v2070_v22  ;;  %9141 = vst [vmem:[#allocation29_spill] sm:$0xff] %v7175_v56  ;;  %v5070_v8 = vpack.i.bf16 %v7046_v7, %v7175_v56  ;;  %9145 = vst [vmem:[#allocation34_spill] sm:$0xff] %v7216_v32 }
 0x23e   : > { %v1849_v22 = vadd.f32 %v1848_v41, %v6901_v49  ;;  %v1888_v41 = vadd.f32 %v6957_v62, %v6901_v49  ;;  %v1890_v62 = vadd.f32 %v6959_v6, %v6901_v49  ;;  %v7223_v45 = vrot.slane %v7094_v43, %v7072_v4 }
 0x23f   : > { %9139 = vst [vmem:[#allocation17_spill] sm:$0xff] %v7154_v39 }
 0x240   : > { %v2072_v37 = vmax.f32 %v1888_v41, 0.0  ;;  %9147 = vst [vmem:[#allocation38_spill] sm:$0xff] %v7223_v45 }
 0x241   : > { %5016 = vrot.lane.b32.xlu0 %v5010_v58, %s5334_s13  ;;  %5036 = vrot.lane.b32.xlu1 %v5025_v20, %s5338_s17  ;;  %v7164_v58 = vmul.f32 %v7147_v12, %v2069_v47  ;;  %v2071_v47 = vmax.f32 %v1849_v22, 0.0 }
 0x243   : > { %v5065_v23 = vpack.i.bf16 %v7154_v39, %v7164_v58  ;;  %v5105_v27 = vpack.i.bf16 %v7164_v58, %v7143_v5 }
 0x245   : > { %5031 = vrot.lane.b32.xlu0 %v5025_v20, %s5337_s16  ;;  %5041 = vrot.lane.b32.xlu1 %v5025_v20, %s5340_s18 }
 0x249   : > { %5046 = vrot.lane.b32.xlu0 %v5045_v55, %s5332_s11  ;;  %5051 = vrot.lane.b32.xlu1 %v5045_v55, %s5333_s12 }
 0x24c   : > { %v1928_v28 = vpop.f32.mrb[16].mxu0 }
 0x24d   : > { %v1930_v20 = vpop.f32.mrb[17].mxu0  ;;  %5056 = vrot.lane.b32.xlu0 %v5045_v55, %s5334_s13  ;;  %5066 = vrot.lane.b32.xlu1 %v5065_v23, %s5333_s12 }
 0x24e   : > { %v1932_v13 = vpop.f32.mrb[18].mxu0 }
 0x24f   : > { %v1933_v30 = vpop.f32.mrb[19].mxu0  ;;  %v7195_v13 = vmul.f32 %v7188_v10, %v2071_v47  ;;  %v7208_v47 = vrot.slane %v7094_v43, %v7059_v54  ;;  %v2073_v10 = vmax.f32 %v1890_v62, 0.0  ;;  %v7252_v43 = vrot.slane %v7161_v25, %v6969_v40 }
 0x250   : > { %v1929_v30 = vadd.f32 %v1928_v28, %v6901_v49 }
 0x251   : > { %5061 = vrot.lane.b32.xlu0 %v5065_v23, %s5332_s11  ;;  %5071 = vrot.lane.b32.xlu1 %v5070_v8, %s5332_s11  ;;  %9143 = vst [vmem:[#allocation33_spill] sm:$0xff] %v7195_v13  ;;  %v5125_v57 = vpack.i.bf16 %v7195_v13, %v7154_v39  ;;  %9144 = vst [vmem:[#allocation32_spill] sm:$0xff] %v7208_v47  ;;  %v7219_v41 = vmul.f32 %v7208_v47, %v2072_v37 }
 0x252   : > { %v2074_v14 = vmax.f32 %v1929_v30, 0.0  ;;  %v7233_v42 = vmul.f32 %v7223_v45, %v2073_v10  ;;  %9150 = vst [vmem:[#allocation41_spill] sm:$0xff] %v7252_v43  ;;  %v1970_v30 = vadd.f32 %v6961_v18, %v6901_v49 }
 0x253   : > { %9146 = vst [vmem:[#allocation7_spill] sm:$0xff] %v7219_v41 }
 0x254   : > { %v7228_v6 = vmul.f32 %v7216_v32, %v2074_v14  ;;  %9149 = vst [vmem:[#allocation39_spill] sm:$0xff] %v7233_v42  ;;  %v1931_v14 = vadd.f32 %v1930_v20, %v6901_v49  ;;  %v7264_v20 = vrot.slane %v7161_v25, %v6891_v2 }
 0x255   : > { %5096 = vrot.lane.b32.xlu0 %v5065_v23, %s5334_s13  ;;  %5076 = vrot.lane.b32.xlu1 %v5070_v8, %s5333_s12 }
 0x256   : > { %9148 = vst [vmem:[#allocation6_spill] sm:$0xff] %v7228_v6  ;;  %v7239_v37 = vpack.i.bf16 %v7228_v6, %v7233_v42  ;;  %v2075_v4 = vmax.f32 %v1931_v14, 0.0  ;;  %9151 = vst [vmem:[#allocation25_spill] sm:$0xff] %v7264_v20  ;;  %v1972_v14 = vadd.f32 %v6963_v24, %v6901_v49  ;;  %v9155_v24 = vunpack.i.l.bf16 %v6981_v44 }
 0x258   : > { %v7274_v62 = vmul.f32 %v7252_v43, %v2075_v4 }
 0x259   : > { %5106 = vrot.lane.b32.xlu0 %v5105_v27, %s5336_s15  ;;  %5081 = vrot.lane.b32.xlu1 %v5070_v8, %s5334_s13 }
 0x25a   : > { %9152 = vst [vmem:[#allocation27_spill] sm:$0xff] %v7274_v62 }
 0x25d   : > { %5116 = vrot.lane.b32.xlu0 %v5105_v27, %s5337_s16  ;;  %5086 = vrot.lane.b32.xlu1 %v5070_v8, %s5335_s14 }
 0x260   : > { %v2010_v22 = vpop.f32.mrb[20].mxu0 }
 0x261   : > { %v7204_v15 = vpop.f32.mrb[21].mxu0  ;;  %5126 = vrot.lane.b32.xlu0 %v5125_v57, %s5337_s16  ;;  %5091 = vrot.lane.b32.xlu1 %v5045_v55, %s5335_s14  ;;  %v5145_v55 = vpack.i.bf16 %v7219_v41, %v7195_v13  ;;  %v2011_v33 = vadd.f32 %v2010_v22, %v6901_v49 }
 0x262   : > { %v2014_v8 = vpop.f32.mrb[22].mxu0 }
 0x263   : > { %v2015_v28 = vpop.f32.mrb[23].mxu0  ;;  %v7278_v8 = vrot.slane %v7161_v25, %v7022_v21 }
 0x265   : > { %5136 = vrot.lane.b32.xlu0 %v5105_v27, %s5340_s18  ;;  %5101 = vrot.lane.b32.xlu1 %v5065_v23, %s5335_s14  ;;  %9153 = vst [vmem:[#allocation26_spill] sm:$0xff] %v7278_v8 }
 0x269   : > { %5146 = vrot.lane.b32.xlu0 %v5145_v55, %s5332_s11  ;;  %5111 = vrot.lane.b32.xlu1 %v5125_v57, %s5336_s15 }
 0x26d   : > { %5156 = vrot.lane.b32.xlu0 %v7239_v37, %s5332_s11  ;;  %5121 = vrot.lane.b32.xlu1 %v5105_v27, %s5338_s17  ;;  %v7260_v27 = vpack.i.bf16 %v7233_v42, %v7219_v41 }
 0x271   : > { %5166 = vrot.lane.b32.xlu0 %v5145_v55, %s5334_s13  ;;  %5131 = vrot.lane.b32.xlu1 %v5125_v57, %s5338_s17 }
 0x275   : > { %5176 = vrot.lane.b32.xlu0 %v7239_v37, %s5334_s13  ;;  %5141 = vrot.lane.b32.xlu1 %v5125_v57, %s5340_s18  ;;  %v9156_v57 = vunpack.i.l.bf16 %v6993_v19 }
 0x277   : > { %v7254_v23 = vpop.permute.xlu0 %4886  ;;  %v7256_v10 = vpop.permute.xlu1 %4866 }
 0x278   : > { %v4869_v40 = vunpack.i.h.bf16 %v7256_v10  ;;  %v4889_v18 = vunpack.i.h.bf16 %v7254_v23  ;;  %v9157_v43 = vunpack.i.l.bf16 %v7256_v10  ;;  %v9161_v22 = vunpack.i.l.bf16 %v7254_v23 }
 0x279   : > { %5186 = vrot.lane.b32.xlu0 %v7260_v27, %s5336_s15  ;;  %5151 = vrot.lane.b32.xlu1 %v5145_v55, %s5333_s12 }
 0x27a   : > { %v2298_v45 = vsel %vm394_vm0, %v4869_v40, %v9155_v24  ;;  %v2299_v47 = vsel %vm394_vm0, %v9157_v43, %v4869_v40 }
 0x27b   : > { %v7280_v2 = vpop.permute.xlu0 %4896  ;;  %v7282_v28 = vpop.permute.xlu1 %4871 }
 0x27c   : > { %9154 = vst [vmem:[#allocation30_spill] sm:$0xff] %v7280_v2  ;;  %v4874_v32 = vunpack.i.h.bf16 %v7282_v28  ;;  %v4898_v21 = vunpack.i.l.bf16 %v7280_v2  ;;  %v9158_v36 = vunpack.i.l.bf16 %v7282_v28 }
 0x27d   : > { %5196 = vrot.lane.b32.xlu0 %v7260_v27, %s5337_s16  ;;  %5161 = vrot.lane.b32.xlu1 %v7239_v37, %s5333_s12 }
 0x27e   : > { %v2394_v4 = vsel %vm491_vm1, %v4874_v32, %v9156_v57  ;;  %v2395_v12 = vsel %vm491_vm1, %v9158_v36, %v4874_v32  ;;  %v5205_v57 = vpack.i.bf16 %v7274_v62, %v7228_v6  ;;  %v2076_v36 = vmax.f32 %v1970_v30, 0.0 }
 0x27f   : > { %v7313_v31 = vpop.permute.xlu0 %4901  ;;  %v7315_v24 = vpop.permute.xlu1 %4891  ;;  %v3240_v1 = vpack.c.bf16 %v2395_v12, %v2299_v47  ;;  %v3241_v52 = vpack.c.bf16 %v2394_v4, %v2298_v45  ;;  %v2490_v32 = vsel %vm588_vm2, %v4889_v18, %v4898_v21  ;;  %v9160_v12 = vunpack.i.h.bf16 %v7280_v2 }
 0x280   : > { %9159 = vst [vmem:[#allocation31_spill] sm:$0xff] %v7313_v31  ;;  %v8870_v46 = vunpack.i.h.bf16 %v7313_v31  ;;  %v4903_v43 = vunpack.i.l.bf16 %v7313_v31  ;;  %v4894_v40 = vunpack.i.h.bf16 %v7315_v24  ;;  %v8871_v51 = vunpack.i.l.bf16 %v7315_v24 }
 0x281   : > { %3451 = vmatprep.subr.bf16.mxu0 %v3240_v1  ;;  %5206 = vrot.lane.b32.xlu0 %v5205_v57, %s5337_s16  ;;  %v2489_v45 = vsel %vm588_vm2, %v4898_v21, %v9160_v12  ;;  %v7334_v47 = vsel %vm588_vm2, %v9161_v22, %v4889_v18  ;;  %v2078_v21 = vmax.f32 %v2011_v33, 0.0  ;;  %v7356_v50 = vmul.f32 %v7264_v20, %v2076_v36 }
 0x282   : > { %v2586_v30 = vsel %vm685_vm3, %v4894_v40, %v4903_v43  ;;  %3495 = vmatpush1.bf16.msra.mxu1 %v3241_v52  ;;  %5171 = vrot.lane.b32.xlu1 %v5145_v55, %s5335_s14  ;;  %v2585_v1 = vsel %vm685_vm3, %v4903_v43, %v8870_v46  ;;  %v7347_v4 = vsel %vm685_vm3, %v8871_v51, %v4894_v40  ;;  %v2077_v43 = vmax.f32 %v1972_v14, 0.0 }
 0x283   : > { %v7349_v18 = vpop.permute.xlu0 %4906  ;;  %v7351_v12 = vpop.permute.xlu1 %4911  ;;  %v3266_v22 = vpack.c.bf16 %v2585_v1, %v2489_v45  ;;  %v3265_v52 = vpack.c.bf16 %v2586_v30, %v2490_v32  ;;  %9162 = vst [vmem:[#allocation35_spill] sm:$0xff] %v7356_v50  ;;  %v7360_v46 = vrot.slane %v7161_v25, %v6909_v61  ;;  %v7367_v33 = vmul.f32 %v7278_v8, %v2078_v21 }
 0x284   : > { %v7375_v14 = vpack.i.bf16 %v7356_v50, %v7274_v62  ;;  %v8876_v30 = vunpack.i.h.bf16 %v7349_v18  ;;  %v4914_v1 = vunpack.i.h.bf16 %v7351_v12 }
 0x285   : > { %9163 = vst [vmem:[#allocation9_spill] sm:$0xff] %v7360_v46  ;;  %5216 = vrot.lane.b32.xlu0 %v7260_v27, %s5340_s18  ;;  %3496 = vmatprep.subr.bf16.mxu1 %v3266_v22  ;;  %9164 = vst [vmem:[#allocation8_spill] sm:$0xff] %v7367_v33  ;;  %v7378_v61 = vmul.f32 %v7360_v46, %v2077_v43 }
 0x286   : > { %5181 = vrot.lane.b32.xlu1 %v7239_v37, %s5335_s14  ;;  %3497 = vmatpush1.bf16.msra.mxu1 %v3265_v52  ;;  %v2705_v43 = vsel %vm806_vm4, %v8876_v30, %v4914_v1 }
 0x287   : > { %v7369_v40 = vpop.permute.xlu0 %4921  ;;  %v7371_v36 = vpop.permute.xlu1 %4916  ;;  %9165 = vst [vmem:[#allocation36_spill] sm:$0xff] %v7378_v61  ;;  %v5235_v45 = vpack.i.bf16 %v7367_v33, %v7378_v61  ;;  %v3289_v30 = vpack.c.bf16 %v2705_v43, %v6933_v3  ;;  %v7431_v43 = vpack.i.bf16 %v7378_v61, %v7356_v50 }
 0x288   : > { %v9175_v39 = vunpack.i.h.bf16 %v7371_v36 }
 0x289   : > { %5226 = vrot.lane.b32.xlu0 %v7375_v14, %s5332_s11 }
 0x28a   : > { %5191 = vrot.lane.b32.xlu1 %v5205_v57, %s5336_s15 }
 0x28b   : > { %v7383_v37 = vpop.permute.xlu0 %4941  ;;  %v7385_v32 = vpop.permute.xlu1 %4926 }
 0x28c   : > { %9166 = vst [vmem:[#allocation40_spill] sm:$0xff] %v7385_v32  ;;  %v4944_v46 = vunpack.i.h.bf16 %v7383_v37 }
 0x28d   : > { %5236 = vrot.lane.b32.xlu0 %v5235_v45, %s5332_s11 }
 0x28e   : > { %5201 = vrot.lane.b32.xlu1 %v7260_v27, %s5338_s17 }
 0x28f   : > { %v7394_v21 = vpop.permute.xlu0 %4946  ;;  %v7396_v22 = vpop.permute.xlu1 %4931 }
 0x290   : > { %v8885_v52 = vunpack.i.l.bf16 %v7394_v21  ;;  %v4934_v0 = vunpack.i.h.bf16 %v7396_v22 }
 0x291   : > { %5246 = vrot.lane.b32.xlu0 %v7375_v14, %s5334_s13 }
 0x292   : > { %5211 = vrot.lane.b32.xlu1 %v5205_v57, %s5338_s17  ;;  %v2704_v27 = vsel %vm806_vm4, %v4914_v1, %v8885_v52  ;;  %v4929_v1 = vunpack.i.h.bf16 %v7385_v32  ;;  %v9171_v52 = vunpack.i.l.bf16 %v7383_v37 }
 0x293   : > { %v7410_v51 = vpop.permute.xlu0 %4951  ;;  %v7412_v55 = vpop.permute.xlu1 %4936  ;;  %v3290_v8 = vpack.c.bf16 %v2704_v27, %v6936_v59  ;;  %v8889_v59 = vunpack.i.h.bf16 %v7369_v40 }
 0x294   : > { %9167 = vst [vmem:[#allocation37_spill] sm:$0xff] %v7410_v51  ;;  %v8888_v9 = vunpack.i.h.bf16 %v7410_v51  ;;  %v4953_v53 = vunpack.i.l.bf16 %v7410_v51  ;;  %v2993_v20 = vsel %vm1097_vm7, %v9171_v52, %v4944_v46 }
 0x295   : > { %3498 = vmatprep.subr.bf16.mxu1 %v3290_v8  ;;  %5256 = vrot.lane.b32.xlu0 %v5235_v45, %s5334_s13 }
 0x296   : > { %5221 = vrot.lane.b32.xlu1 %v5205_v57, %s5340_s18  ;;  %3499 = vmatpush1.bf16.msra.mxu1 %v3289_v30  ;;  %v2897_v30 = vsel %vm1000_vm6, %v8889_v59, %v4934_v0  ;;  %v7445_v6 = vsel %vm903_vm5, %v4953_v53, %v8888_v9  ;;  %v2800_v9 = vsel %vm903_vm5, %v4929_v1, %v4953_v53 }
 0x297   : > { %v7425_v27 = vpop.permute.xlu0 %4956  ;;  %v7427_v3 = vpop.permute.xlu1 %4961  ;;  %9170 = vst [vmem:[#allocation46_spill] sm:$0xff] %v7445_v6 }
 0x298   : > { %9168 = vst [vmem:[#allocation44_spill] sm:$0xff] %v7425_v27  ;;  %9169 = vst [vmem:[#allocation45_spill] sm:$0xff] %v7427_v3  ;;  %v4958_v8 = vunpack.i.l.bf16 %v7425_v27  ;;  %v9172_v57 = vunpack.i.h.bf16 %v7425_v27  ;;  %v9174_v50 = vunpack.i.l.bf16 %v7427_v3 }
 0x299   : > { %5261 = vrot.lane.b32.xlu0 %v7431_v43, %s5336_s15 }
 0x29a   : > { %v7457_v62 = vsel %vm1000_vm6, %v4958_v8, %v9172_v57  ;;  %5231 = vrot.lane.b32.xlu1 %v7375_v14, %s5333_s12  ;;  %v2896_v59 = vsel %vm1000_vm6, %v4934_v0, %v4958_v8  ;;  %v2992_v52 = vsel %vm1097_vm7, %v4944_v46, %v9174_v50  ;;  %v2801_v57 = vsel %vm903_vm5, %v9175_v39, %v4929_v1 }
 0x29b   : > { %9173 = vst [vmem:[#allocation47_spill] sm:$0xff] %v7457_v62  ;;  %v7473_v13 = vpop.permute.xlu0 %4966  ;;  %v7475_v41 = vpop.permute.xlu1 %4971  ;;  %v3314_v42 = vpack.c.bf16 %v2896_v59, %v2800_v9  ;;  %v3313_v11 = vpack.c.bf16 %v2897_v30, %v2801_v57  ;;  %v3338_v0 = vpack.c.bf16 %v2992_v52, %v2992_v52  ;;  %v3337_v46 = vpack.c.bf16 %v2993_v20, %v2993_v20 }
 0x29c   : > { %v2052_v50 = vadd.f32 %v7005_v63, %v6901_v49  ;;  %v2013_v39 = vadd.f32 %v7204_v15, %v6901_v49  ;;  %v7501_v63 = vrot.slane %v7161_v25, %v7059_v54  ;;  %v7507_v20 = vrot.slane %v7161_v25, %v7025_v26 }
 0x29d   : > { %3500 = vmatprep.subr.bf16.mxu1 %v3314_v42  ;;  %5266 = vrot.lane.b32.xlu0 %v7431_v43, %s5337_s16  ;;  %v3386_v42 = vsel %vm1493_vm8, %v3337_v46, 0  ;;  %v4969_v52 = vunpack.i.h.bf16 %v7473_v13  ;;  %v8905_v57 = vunpack.i.l.bf16 %v7473_v13 }
 0x29e   : > { %5241 = vrot.lane.b32.xlu1 %v5235_v45, %s5333_s12  ;;  %3501 = vmatpush1.bf16.msra.mxu1 %v3313_v11  ;;  %v7497_v11 = vld [vmem:[%s8699_s3] sm:$0xff]   ;;  %9176 = vst [vmem:[#allocation48_spill] sm:$0xff] %v7501_v63  ;;  %v2080_v49 = vmax.f32 %v2052_v50, 0.0  ;;  %v2079_v15 = vmax.f32 %v2013_v39, 0.0  ;;  %9177 = vst [vmem:[#allocation49_spill] sm:$0xff] %v7507_v20 }
 0x29f   : > { %v7486_v9 = vpop.permute.xlu0 %4976  ;;  %v7488_v59 = vpop.permute.xlu1 %4981  ;;  %4325 = vmatprep.subr.msk.bf16.mxu1 %vm1493_vm8, %v3338_v0  ;;  %v4974_v0 = vunpack.i.h.bf16 %v7475_v41 }
 0x2a0   : > { %v7521_v54 = vmul.f32 %v7501_v63, %v2080_v49  ;;  %v7524_v26 = vmul.f32 %v7507_v20, %v2079_v15  ;;  %v4979_v46 = vunpack.i.h.bf16 %v7486_v9  ;;  %v2294_v20 = vsel %vm394_vm0, %v8905_v57, %v4969_v52 }
 0x2a1   : > { %2773 = vrot.lane.b32.xlu0 %v7367_v33, %s5337_s16  ;;  %v9181_v63 = vunpack.i.l.bf16 %v7475_v41  ;;  %v9183_v7 = vunpack.i.l.bf16 %v7486_v9 }
 0x2a2   : > { %5251 = vrot.lane.b32.xlu1 %v7375_v14, %s5335_s14  ;;  %3503 = vmatpush1.bf16.msra.mxu1 %v3386_v42  ;;  %9178 = vst [vmem:[#allocation50_spill] sm:$0xff] %v7521_v54  ;;  %9179 = vst [vmem:[#allocation51_spill] sm:$0xff] %v7524_v26  ;;  %v7552_v49 = vpack.i.bf16 %v7521_v54, %v7524_v26 }
 0x2a3   : > { %v7509_v45 = vpop.permute.xlu0 %4986  ;;  %v7511_v1 = vpop.permute.xlu1 %4996 }
 0x2a5   : > { %4326 = vmatmul.mubr.msk.bf16.vlgmr.msra.gmra.mrb[24].mxu1 %vm1489_vm9, %v7497_v11  ;;  %5276 = vrot.lane.b32.xlu0 %v7431_v43, %s5340_s18 }
 0x2a6   : > { %2555 = vrot.lane.b32.xlu1 %v7378_v61, %s5335_s14  ;;  %3612 = vmatprep.mubr.bf16.mxu1 %v8960_v38 }
 0x2a7   : > { %v7526_v25 = vpop.permute.xlu0 %4991  ;;  %v7528_v14 = vpop.permute.xlu1 %5011 }
 0x2a8   : > { %v8896_v8 = vunpack.i.h.bf16 %v7528_v14  ;;  %v5013_v30 = vunpack.i.l.bf16 %v7528_v14 }
 0x2a9   : > { %2561 = vrot.lane.b32.xlu0 %v7521_v54, %s5335_s14  ;;  %v2390_v54 = vsel %vm491_vm1, %v9181_v63, %v4974_v0 }
 0x2aa   : > { %v7542_v50 = vsel %vm491_vm1, %v5013_v30, %v8896_v8  ;;  %2677 = vrot.lane.b32.xlu1 %v7367_v33, %s5336_s15  ;;  %v4984_v8 = vunpack.i.h.bf16 %v7488_v59  ;;  %v3245_v16 = vpack.c.bf16 %v2390_v54, %v2294_v20  ;;  %v2389_v20 = vsel %vm491_vm1, %v4974_v0, %v5013_v30 }
 0x2ab   : > { %9180 = vst [vmem:[#allocation52_spill] sm:$0xff] %v7542_v50  ;;  %v7546_v39 = vpop.permute.xlu0 %5001  ;;  %v7548_v42 = vpop.permute.xlu1 %5021  ;;  %v9186_v54 = vunpack.i.l.bf16 %v7488_v59 }
 0x2ac   : > { %v8908_v15 = vunpack.i.h.bf16 %v7548_v42  ;;  %v5023_v53 = vunpack.i.l.bf16 %v7548_v42 }
 0x2ad   : > { %5281 = vrot.lane.b32.xlu0 %v7552_v49, %s5332_s11 }
 0x2ae   : > { %v7572_v61 = vsel %vm685_vm3, %v5023_v53, %v8908_v15  ;;  %5271 = vrot.lane.b32.xlu1 %v7431_v43, %s5338_s17  ;;  %v2486_v43 = vsel %vm588_vm2, %v9183_v7, %v4979_v46 }
 0x2af   : > { %v7578_v6 = vpop.permute.xlu0 %5006  ;;  %v7580_v57 = vpop.permute.xlu1 %5026 }
 0x2b0   : > { %9182 = vst [vmem:[#allocation53_spill] sm:$0xff] %v7580_v57  ;;  %v8912_v62 = vunpack.i.h.bf16 %v7578_v6  ;;  %v5008_v63 = vunpack.i.l.bf16 %v7578_v6  ;;  %v8914_v27 = vunpack.i.h.bf16 %v7580_v57  ;;  %v5028_v15 = vunpack.i.l.bf16 %v7580_v57 }
 0x2b1   : > { %5291 = vrot.lane.b32.xlu0 %v7552_v49, %s5334_s13  ;;  %v4989_v57 = vunpack.i.h.bf16 %v7509_v45 }
 0x2b2   : > { %v7596_v51 = vsel %vm394_vm0, %v5008_v63, %v8912_v62  ;;  %v7602_v29 = vsel %vm806_vm4, %v5028_v15, %v8914_v27  ;;  %2869 = vrot.lane.b32.xlu1 %v7367_v33, %s5338_s17  ;;  %v2293_v7 = vsel %vm394_vm0, %v4969_v52, %v5008_v63  ;;  %v2582_v62 = vsel %vm685_vm3, %v9186_v54, %v4984_v8 }
 0x2b3   : > { %9184 = vst [vmem:[#allocation54_spill] sm:$0xff] %v7596_v51  ;;  %9185 = vst [vmem:[#allocation55_spill] sm:$0xff] %v7602_v29  ;;  %v7617_v29 = vpop.permute.xlu0 %5016  ;;  %v7619_v3 = vpop.permute.xlu1 %5036  ;;  %v3246_v2 = vpack.c.bf16 %v2389_v20, %v2293_v7  ;;  %v2581_v27 = vsel %vm685_vm3, %v4984_v8, %v5023_v53  ;;  %v2700_v7 = vsel %vm806_vm4, %v4989_v57, %v5028_v15  ;;  %v4994_v8 = vunpack.i.h.bf16 %v7526_v25 }
 0x2b4   : > { %9187 = vst [vmem:[#allocation56_spill] sm:$0xff] %v7619_v3  ;;  %v8918_v52 = vunpack.i.h.bf16 %v7617_v29  ;;  %v5018_v63 = vunpack.i.l.bf16 %v7617_v29  ;;  %v8921_v30 = vunpack.i.h.bf16 %v7619_v3  ;;  %v5038_v0 = vunpack.i.l.bf16 %v7619_v3 }
 0x2b5   : > { %3580 = vmatprep.subr.bf16.mxu1 %v3246_v2  ;;  %2683 = vrot.lane.b32.xlu0 %v7175_v56, %s5336_s15  ;;  %v3269_v50 = vpack.c.bf16 %v2582_v62, %v2486_v43  ;;  %v4999_v15 = vunpack.i.h.bf16 %v7511_v1  ;;  %v3294_v62 = vpack.c.bf16 %v2700_v7, %v7089_v17  ;;  %v5295_v43 = vpack.i.bf16 %v7524_v26, %v7367_v33 }
 0x2b6   : > { %v7636_v20 = vsel %vm588_vm2, %v5018_v63, %v8918_v52  ;;  %v7642_v2 = vsel %vm1000_vm6, %v5038_v0, %v8921_v30  ;;  %2965 = vrot.lane.b32.xlu1 %v7367_v33, %s5340_s18  ;;  %3581 = vmatpush1.bf16.msra.mxu1 %v3245_v16  ;;  %v2485_v53 = vsel %vm588_vm2, %v4979_v46, %v5018_v63  ;;  %v9189_v46 = vunpack.i.l.bf16 %v7509_v45 }
 0x2b7   : > { %9188 = vst [vmem:[#allocation57_spill] sm:$0xff] %v7636_v20  ;;  %v7651_v52 = vpop.permute.xlu0 %5031  ;;  %v7653_v54 = vpop.permute.xlu1 %5041  ;;  %v3270_v51 = vpack.c.bf16 %v2581_v27, %v2485_v53  ;;  %v5004_v27 = vunpack.i.h.bf16 %v7546_v39  ;;  %v9190_v17 = vunpack.i.l.bf16 %v7526_v25 }
 0x2b8   : > { %v8925_v30 = vunpack.i.h.bf16 %v7651_v52  ;;  %v5033_v31 = vunpack.i.l.bf16 %v7651_v52  ;;  %v8927_v16 = vunpack.i.h.bf16 %v7653_v54  ;;  %v5043_v3 = vunpack.i.l.bf16 %v7653_v54 }
 0x2b9   : > { %v2701_v63 = vsel %vm806_vm4, %v9189_v46, %v4989_v57  ;;  %3582 = vmatprep.subr.bf16.mxu1 %v3270_v51  ;;  %5311 = vrot.lane.b32.xlu0 %v7552_v49, %s5338_s17  ;;  %v2892_v57 = vsel %vm1000_vm6, %v4999_v15, %v5038_v0 }
 0x2ba   : > { %v7674_v53 = vsel %vm903_vm5, %v5033_v31, %v8925_v30  ;;  %5286 = vrot.lane.b32.xlu1 %v7552_v49, %s5333_s12  ;;  %3583 = vmatpush1.bf16.msra.mxu1 %v3269_v50  ;;  %v2796_v51 = vsel %vm903_vm5, %v4994_v8, %v5033_v31  ;;  %v7689_v30 = vsel %vm1097_vm7, %v5043_v3, %v8927_v16 }
 0x2bb   : > { %v5047_v7 = vpop.permute.xlu0 %5046  ;;  %v5052_v46 = vpop.permute.xlu1 %5051  ;;  %3584 = vmatprep.subr.bf16.mxu1 %v3294_v62  ;;  %v3293_v50 = vpack.c.bf16 %v2701_v63, %v7075_v35  ;;  %v2797_v62 = vsel %vm903_vm5, %v9190_v17, %v4994_v8  ;;  %v3318_v33 = vpack.c.bf16 %v2892_v57, %v2796_v51  ;;  %v2988_v16 = vsel %vm1097_vm7, %v5004_v27, %v5043_v3 }
 0x2bc   : > { %v5048_v31 = vunpack.i.l.bf16 %v5047_v7  ;;  %v5053_v20 = vunpack.i.l.bf16 %v5052_v46  ;;  %v9191_v35 = vunpack.i.l.bf16 %v7546_v39  ;;  %v9192_v63 = vunpack.i.h.bf16 %v7578_v6 }
 0x2bd   : > { %2875 = vrot.lane.b32.xlu0 %v7175_v56, %s5338_s17  ;;  %v9193_v17 = vunpack.i.l.bf16 %v7511_v1  ;;  %v9194_v57 = vunpack.i.h.bf16 %v7528_v14  ;;  %v3360_v14 = vld [vmem:[%s8700_s4 + $0x8] sm:$0xff] }
 0x2be   : > { %5296 = vrot.lane.b32.xlu1 %v5295_v43, %s5335_s14  ;;  %3585 = vmatpush1.bf16.msra.mxu1 %v3293_v50  ;;  %v2989_v0 = vsel %vm1097_vm7, %v9191_v35, %v5004_v27  ;;  %v7711_v8 = vsel %vm394_vm0, %v9192_v63, %v5048_v31  ;;  %v3342_v63 = vpack.c.bf16 %v2988_v16, %v2988_v16  ;;  %v5049_v16 = vunpack.i.h.bf16 %v5047_v7 }
 0x2bf   : > { %v2893_v51 = vsel %vm1000_vm6, %v9193_v17, %v4999_v15  ;;  %v7717_v3 = vpop.permute.xlu0 %5056  ;;  %v7719_v43 = vpop.permute.xlu1 %5066  ;;  %3586 = vmatprep.subr.bf16.mxu1 %v3318_v33  ;;  %v7725_v27 = vsel %vm491_vm1, %v9194_v57, %v5053_v20  ;;  %v3341_v15 = vpack.c.bf16 %v2989_v0, %v2989_v0 }
 0x2c0   : > { %v3317_v6 = vpack.c.bf16 %v2893_v51, %v2797_v62  ;;  %v8928_v50 = vunpack.i.h.bf16 %v7719_v43  ;;  %v5068_v35 = vunpack.i.l.bf16 %v7719_v43  ;;  %v5054_v62 = vunpack.i.h.bf16 %v5052_v46 }
 0x2c1   : > { %2971 = vrot.lane.b32.xlu0 %v7175_v56, %s5340_s18  ;;  %v3398_v17 = vsel %vm1493_vm8, %v3341_v15, 0  ;;  %v2290_v46 = vsel %vm394_vm0, %v5048_v31, %v5049_v16 }
 0x2c2   : > { %v7737_v33 = vsel %vm491_vm1, %v5068_v35, %v8928_v50  ;;  %5301 = vrot.lane.b32.xlu1 %v7552_v49, %s5336_s15  ;;  %3587 = vmatpush1.bf16.msra.mxu1 %v3317_v6 }
 0x2c3   : > { %9195 = vst [vmem:[#allocation58_spill] sm:$0xff] %v7737_v33  ;;  %v7744_v0 = vpop.permute.xlu0 %5061  ;;  %4329 = vmatprep.subr.msk.bf16.mxu1 %vm1493_vm8, %v3342_v63  ;;  %v7747_v51 = vpop.permute.xlu1 %5071  ;;  %v2386_v63 = vsel %vm491_vm1, %v5053_v20, %v5054_v62  ;;  %v9200_v33 = vunpack.i.l.bf16 %v7282_v28 }
 0x2c4   : > { %9196 = vst [vmem:[#allocation59_spill] sm:$0xff] %v7744_v0  ;;  %v8930_v57 = vunpack.i.h.bf16 %v7744_v0  ;;  %v5063_v50 = vunpack.i.l.bf16 %v7744_v0  ;;  %v3249_v20 = vpack.c.bf16 %v2386_v63, %v2290_v46  ;;  %v9198_v0 = vunpack.i.l.bf16 %v7256_v10 }
 0x2c5   : > { %3368 = vperm.xlu0 %4864, %v3360_v14   ;;  %v9199_v15 = vunpack.i.l.bf16 %v7747_v51  ;;  %v8938_v46 = vunpack.i.l.bf16 %v7351_v12 }
 0x2c6   : > { %v7756_v6 = vsel %vm394_vm0, %v5063_v50, %v8930_v57  ;;  %5306 = vrot.lane.b32.xlu1 %v7552_v49, %s5337_s16  ;;  %3589 = vmatpush1.bf16.msra.mxu1 %v3398_v17  ;;  %v2289_v57 = vsel %vm394_vm0, %v5049_v16, %v5063_v50  ;;  %v2385_v17 = vsel %vm491_vm1, %v5054_v62, %v5068_v35  ;;  %v4908_v62 = vunpack.i.l.bf16 %v7349_v18 }
 0x2c7   : > { %9197 = vst [vmem:[#allocation60_spill] sm:$0xff] %v7756_v6  ;;  %v7767_v14 = vpop.permute.xlu0 %5096  ;;  %v7769_v26 = vpop.permute.xlu1 %5076  ;;  %v3250_v31 = vpack.c.bf16 %v2385_v17, %v2289_v57  ;;  %v2300_v6 = vsel %vm394_vm0, %v9199_v15, %v9198_v0  ;;  %v4923_v15 = vunpack.i.l.bf16 %v7369_v40  ;;  %v9202_v17 = vunpack.i.h.bf16 %v7349_v18 }
 0x2c8   : > { %v8934_v7 = vunpack.i.l.bf16 %v7769_v26  ;;  %v4939_v18 = vunpack.i.h.bf16 %v7412_v55 }
 0x2c9   : > { %4330 = vmatmul.mubr.msk.bf16.vlgmr.msra.gmra.mrb[28].mxu1 %vm1489_vm9, %v7497_v11  ;;  %3666 = vmatprep.subr.bf16.mxu1 %v3250_v31  ;;  %v9203_v31 = vunpack.i.l.bf16 %v7254_v23 }
 0x2ca   : > { %v2396_v50 = vsel %vm491_vm1, %v8934_v7, %v9200_v33  ;;  %2779 = vrot.lane.b32.xlu1 %v7175_v56, %s5337_s16  ;;  %3698 = vmatprep.mubr.bf16.mxu1 %v8960_v38  ;;  %v9201_v33 = vpack.c.bf16 %v7347_v4, %v7334_v47  ;;  %v2706_v47 = vsel %vm806_vm4, %v4908_v62, %v9202_v17  ;;  %v5058_v4 = vunpack.i.l.bf16 %v7717_v3 }
 0x2cb   : > { %v3239_v35 = vpack.c.bf16 %v2396_v50, %v2300_v6  ;;  %v7792_v16 = vpop.permute.xlu0 %5106  ;;  %v7794_v10 = vpop.permute.xlu1 %5081  ;;  %3667 = vmatpush1.bf16.msra.mxu1 %v3249_v20  ;;  %v3359_v6 = vld [vmem:[%s8700_s4] sm:$0xff]  ;;  %v9204_v50 = vunpack.i.l.bf16 %v7315_v24  ;;  %v8940_v24 = vunpack.i.l.bf16 %v7396_v22  ;;  %v3288_v56 = vpack.c.bf16 %v2706_v47, %v6987_v34 }
 0x2cc   : > { %v8935_v28 = vunpack.i.l.bf16 %v7794_v10 }
 0x2cd   : > { %3452 = vmatpush1.bf16.msra.mxu0 %v3239_v35 }
 0x2ce   : > { %5316 = vrot.lane.b32.xlu1 %v7552_v49, %s5340_s18  ;;  %3453 = vmatprep.subr.bf16.mxu0 %v9201_v33  ;;  %v4918_v49 = vunpack.i.l.bf16 %v7371_v36  ;;  %v2492_v20 = vsel %vm588_vm2, %v8935_v28, %v9203_v31  ;;  %v2707_v31 = vsel %vm806_vm4, %v8938_v46, %v4908_v62  ;;  %v8939_v33 = vunpack.i.l.bf16 %v7385_v32 }
 0x2cf   : > { %v7804_v0 = vpop.permute.xlu0 %5116  ;;  %v7806_v57 = vpop.permute.xlu1 %5086  ;;  %v9207_v46 = vunpack.i.h.bf16 %v7617_v29  ;;  %v9209_v29 = vunpack.i.l.bf16 %v7412_v55  ;;  %v9212_v32 = vunpack.i.l.bf16 %v7792_v16 }
 0x2d0   : > { %v8937_v63 = vunpack.i.l.bf16 %v7806_v57 }
 0x2d1   : > { %v7856_v34 = vsel %vm588_vm2, %v9207_v46, %v5058_v4  ;;  %v2995_v46 = vsel %vm1097_vm7, %v9209_v29, %v4939_v18  ;;  %v5109_v29 = vunpack.i.h.bf16 %v7792_v16 }
 0x2d2   : > { %v2588_v35 = vsel %vm685_vm3, %v8937_v63, %v9204_v50  ;;  %3363 = vperm.xlu1 %5320, %v3359_v6   ;;  %v9205_v6 = vunpack.i.h.bf16 %v7371_v36  ;;  %v9208_v36 = vunpack.i.h.bf16 %v7548_v42 }
 0x2d3   : > { %v3263_v17 = vpack.c.bf16 %v2588_v35, %v2492_v20  ;;  %v7834_v7 = vpop.permute.xlu0 %5126  ;;  %v5092_v23 = vpop.permute.xlu1 %5091  ;;  %v9206_v35 = vunpack.i.h.bf16 %v7369_v40  ;;  %v5059_v40 = vunpack.i.h.bf16 %v7717_v3 }
 0x2d4   : > { %v5093_v28 = vunpack.i.l.bf16 %v5092_v23  ;;  %v5094_v50 = vunpack.i.h.bf16 %v5092_v23  ;;  %v2802_v20 = vsel %vm903_vm5, %v4918_v49, %v9205_v6  ;;  %v2899_v6 = vsel %vm1000_vm6, %v8940_v24, %v4923_v15 }
 0x2d5   : > { %3454 = vmatpush1.bf16.msra.mxu0 %v3263_v17  ;;  %v2898_v63 = vsel %vm1000_vm6, %v4923_v15, %v9206_v35 }
 0x2d6   : > { %3455 = vmatprep.subr.bf16.mxu0 %v3288_v56  ;;  %v7862_v47 = vsel %vm685_vm3, %v9208_v36, %v5093_v28  ;;  %v3287_v56 = vpack.c.bf16 %v2707_v31, %v6984_v48  ;;  %v3312_v35 = vpack.c.bf16 %v2898_v63, %v2802_v20  ;;  %v9210_v36 = vunpack.i.l.bf16 %v7383_v37 }
 0x2d7   : > { %v7865_v17 = vpop.permute.xlu0 %5136  ;;  %v7867_v23 = vpop.permute.xlu1 %5101  ;;  %v5079_v31 = vunpack.i.h.bf16 %v7769_v26  ;;  %v2578_v42 = vsel %vm685_vm3, %v5093_v28, %v5094_v50  ;;  %v2803_v63 = vsel %vm903_vm5, %v8939_v33, %v4918_v49  ;;  %v9211_v37 = vunpack.i.l.bf16 %v7767_v14 }
 0x2d8   : > { %v5103_v3 = vunpack.i.l.bf16 %v7867_v23  ;;  %v2994_v48 = vsel %vm1097_vm7, %v4939_v18, %v9210_v36  ;;  %v3335_v20 = vpack.c.bf16 %v2995_v46, %v2995_v46  ;;  %v2482_v28 = vsel %vm588_vm2, %v5058_v4, %v5059_v40 }
 0x2d9   : > { %3456 = vmatpush1.bf16.msra.mxu0 %v3287_v56  ;;  %v2481_v15 = vsel %vm588_vm2, %v5059_v40, %v9211_v37  ;;  %v5074_v56 = vunpack.i.h.bf16 %v7747_v51  ;;  %v3273_v24 = vpack.c.bf16 %v2578_v42, %v2482_v28  ;;  %v3336_v62 = vpack.c.bf16 %v2994_v48, %v2994_v48 }
 0x2da   : > { %3457 = vmatprep.subr.bf16.mxu0 %v3312_v35  ;;  %v2577_v18 = vsel %vm685_vm3, %v5094_v50, %v5103_v3  ;;  %v3311_v35 = vpack.c.bf16 %v2899_v6, %v2803_v63  ;;  %v2697_v50 = vsel %vm806_vm4, %v9212_v32, %v5109_v29  ;;  %v5089_v46 = vunpack.i.h.bf16 %v7806_v57 }
 0x2db   : > { %v7905_v36 = vpop.permute.xlu0 %5146  ;;  %v7907_v49 = vpop.permute.xlu1 %5111  ;;  %v3274_v33 = vpack.c.bf16 %v2577_v18, %v2481_v15  ;;  %v9213_v4 = vunpack.i.l.bf16 %v7475_v41  ;;  %v3380_v42 = vsel %vm1493_vm8, %v3335_v20, 0  ;;  %v9214_v32 = vunpack.i.h.bf16 %v6993_v19 }
 0x2dc   : > { %v8949_v37 = vunpack.i.l.bf16 %v7907_v49  ;;  %v5084_v41 = vunpack.i.h.bf16 %v7794_v10  ;;  %v3297_v18 = vpack.c.bf16 %v2697_v50, %v7143_v5  ;;  %v8942_v5 = vunpack.i.l.bf16 %v7834_v7 }
 0x2dd   : > { %3458 = vmatpush1.bf16.msra.mxu0 %v3311_v35  ;;  %3668 = vmatprep.subr.bf16.mxu1 %v3274_v33  ;;  %v2391_v40 = vsel %vm491_vm1, %v5079_v31, %v9213_v4  ;;  %v2392_v33 = vsel %vm491_vm1, %v9214_v32, %v5079_v31  ;;  %v4949_v31 = vunpack.i.h.bf16 %v7394_v21  ;;  %v9216_v35 = vunpack.i.l.bf16 %v7488_v59 }
 0x2de   : > { %4323 = vmatprep.subr.msk.bf16.mxu0 %vm1493_vm8, %v3336_v62  ;;  %3669 = vmatpush1.bf16.msra.mxu1 %v3273_v24  ;;  %v2696_v6 = vsel %vm806_vm4, %v5109_v29, %v8949_v37  ;;  %v9215_v24 = vunpack.i.l.bf16 %v7473_v13  ;;  %v5118_v29 = vunpack.i.l.bf16 %v7804_v0  ;;  %v9217_v13 = vunpack.i.h.bf16 %v6981_v44 }
 0x2df   : > { %v7930_v48 = vpop.permute.xlu0 %5156  ;;  %v5122_v63 = vpop.permute.xlu1 %5121  ;;  %v3298_v62 = vpack.c.bf16 %v2696_v6, %v7164_v58  ;;  %v2583_v58 = vsel %vm685_vm3, %v5089_v46, %v9216_v35  ;;  %v5139_v50 = vunpack.i.h.bf16 %v7865_v17  ;;  %v5119_v6 = vunpack.i.h.bf16 %v7804_v0 }
 0x2e0   : > { %v2295_v15 = vsel %vm394_vm0, %v5074_v56, %v9215_v24  ;;  %v5123_v19 = vunpack.i.l.bf16 %v5122_v63  ;;  %v5124_v28 = vunpack.i.h.bf16 %v5122_v63  ;;  %v2296_v4 = vsel %vm394_vm0, %v9217_v13, %v5074_v56  ;;  %v9219_v63 = vld [vmem:[#allocation56_spill] sm:$0xff] }
 0x2e1   : > { %v3244_v20 = vpack.c.bf16 %v2391_v40, %v2295_v15  ;;  %3460 = vmatpush1.bf16.msra.mxu0 %v3380_v42  ;;  %3670 = vmatprep.subr.bf16.mxu1 %v3298_v62  ;;  %v5138_v40 = vunpack.i.l.bf16 %v7865_v17  ;;  %v3243_v42 = vpack.c.bf16 %v2392_v33, %v2296_v4  ;;  %v9218_v44 = vunpack.i.l.bf16 %v7486_v9  ;;  %v9221_v15 = vld [vmem:[#allocation31_spill] sm:$0xff] }
 0x2e2   : > { %3671 = vmatpush1.bf16.msra.mxu1 %v3297_v18  ;;  %v9220_v62 = vunpack.i.h.bf16 %v9219_v63  ;;  %v9222_v18 = vunpack.i.h.bf16 %v9221_v15  ;;  %v2889_v13 = vsel %vm1000_vm6, %v5123_v19, %v5124_v28  ;;  %v9224_v4 = vunpack.i.l.bf16 %v7509_v45 }
 0x2e3   : > { %3537 = vmatprep.subr.bf16.mxu0 %v3244_v20  ;;  %v7952_v59 = vpop.permute.xlu0 %5166  ;;  %v7954_v32 = vpop.permute.xlu1 %5131  ;;  %v2487_v56 = vsel %vm588_vm2, %v5084_v41, %v9218_v44  ;;  %v9223_v20 = vunpack.i.h.bf16 %v7651_v52  ;;  %v9225_v44 = vld [vmem:[#allocation30_spill] sm:$0xff]  ;;  %v9227_v63 = vunpack.i.l.bf16 %v7394_v21  ;;  %v9230_v21 = vunpack.i.l.bf16 %v7526_v25 }
 0x2e4   : > { %v7964_v24 = vsel %vm1000_vm6, %v9220_v62, %v5123_v19  ;;  %v2584_v0 = vsel %vm685_vm3, %v9222_v18, %v5089_v46  ;;  %v8943_v33 = vunpack.i.l.bf16 %v7954_v32  ;;  %4324 = vmatmul.mubr.msk.bf16.vlgmr.msra.gmra.mrb[24].mxu0 %vm1489_vm9, %v7497_v11  ;;  %v3268_v9 = vpack.c.bf16 %v2583_v58, %v2487_v56 }
 0x2e5   : > { %v7977_v35 = vsel %vm903_vm5, %v9223_v20, %v5118_v29  ;;  %3538 = vmatpush1.bf16.msra.mxu0 %v3243_v42  ;;  %v2702_v46 = vsel %vm806_vm4, %v4949_v31, %v9224_v4  ;;  %3569 = vmatprep.mubr.bf16.mxu0 %v8960_v38  ;;  %v9226_v52 = vunpack.i.h.bf16 %v9225_v44  ;;  %v2792_v19 = vsel %vm903_vm5, %v5119_v6, %v8942_v5  ;;  %v9229_v5 = vld [vmem:[#allocation43_spill] sm:$0xff] }
 0x2e6   : > { %v3320_v58 = vpack.c.bf16 %v7964_v24, %v7977_v35  ;;  %3539 = vmatprep.subr.bf16.mxu0 %v3268_v9  ;;  %v2888_v45 = vsel %vm1000_vm6, %v5124_v28, %v8943_v33  ;;  %v2985_v42 = vsel %vm1097_vm7, %v5138_v40, %v5139_v50  ;;  %v2793_v62 = vsel %vm903_vm5, %v5118_v29, %v5119_v6  ;;  %v9228_v28 = vld [vmem:[#allocation45_spill] sm:$0xff] }
 0x2e7   : > { %v2488_v56 = vsel %vm588_vm2, %v9226_v52, %v5084_v41  ;;  %v2703_v41 = vsel %vm806_vm4, %v9227_v63, %v4949_v31  ;;  %v8010_v18 = vpop.permute.xlu0 %5176  ;;  %v8012_v9 = vpop.permute.xlu1 %5141  ;;  %v3322_v20 = vpack.c.bf16 %v2888_v45, %v2792_v19  ;;  %v4964_v4 = vunpack.i.h.bf16 %v9228_v28  ;;  %v9231_v31 = vld [vmem:[#allocation37_spill] sm:$0xff]  ;;  %v9235_v45 = vld [vmem:[#allocation44_spill] sm:$0xff] }
 0x2e8   : > { %v3267_v15 = vpack.c.bf16 %v2584_v0, %v2488_v56  ;;  %v3321_v44 = vpack.c.bf16 %v2889_v13, %v2793_v62  ;;  %v8947_v52 = vunpack.i.l.bf16 %v8012_v9  ;;  %v3292_v33 = vpack.c.bf16 %v2702_v46, %v9229_v5  ;;  %v9233_v46 = vld [vmem:[#allocation21_spill] sm:$0xff] }
 0x2e9   : > { %3672 = vmatprep.subr.bf16.mxu1 %v3322_v20  ;;  %v9232_v63 = vunpack.i.h.bf16 %v9231_v31  ;;  %v3345_v6 = vpack.c.bf16 %v2985_v42, %v2985_v42  ;;  %v3291_v25 = vpack.c.bf16 %v2703_v41, %v9233_v46  ;;  %v9234_v19 = vunpack.i.l.bf16 %v7511_v1 }
 0x2ea   : > { %3540 = vmatpush1.bf16.msra.mxu0 %v3267_v15  ;;  %v2984_v0 = vsel %vm1097_vm7, %v5139_v50, %v8947_v52  ;;  %3673 = vmatpush1.bf16.msra.mxu1 %v3321_v44  ;;  %v9236_v62 = vunpack.i.h.bf16 %v9235_v45  ;;  %v9237_v20 = vunpack.i.l.bf16 %v9228_v28  ;;  %v8944_v31 = vunpack.i.l.bf16 %v7930_v48 }
 0x2eb   : > { %v2798_v29 = vsel %vm903_vm5, %v9232_v63, %v9230_v21  ;;  %3541 = vmatprep.subr.bf16.mxu0 %v3292_v33  ;;  %v3346_v13 = vpack.c.bf16 %v2984_v0, %v2984_v0  ;;  %v8027_v56 = vpop.permute.xlu0 %5186  ;;  %v8029_v5 = vpop.permute.xlu1 %5151  ;;  %v9238_v33 = vunpack.i.l.bf16 %v7546_v39  ;;  %v3410_v21 = vsel %vm1493_vm8, %v3345_v6, 0 }
 0x2ec   : > { %v2894_v42 = vsel %vm1000_vm6, %v9236_v62, %v9234_v19  ;;  %v2991_v50 = vsel %vm1097_vm7, %v9237_v20, %v4964_v4  ;;  %v5154_v41 = vunpack.i.h.bf16 %v8029_v5  ;;  %v5153_v1 = vunpack.i.l.bf16 %v8029_v5 }
 0x2ed   : > { %v3316_v15 = vpack.c.bf16 %v2894_v42, %v2798_v29  ;;  %v2990_v44 = vsel %vm1097_vm7, %v4964_v4, %v9238_v33  ;;  %4333 = vmatprep.subr.msk.bf16.mxu1 %vm1493_vm8, %v3346_v13  ;;  %v5149_v28 = vunpack.i.h.bf16 %v7905_v36  ;;  %v5148_v39 = vunpack.i.l.bf16 %v7905_v36  ;;  %v9239_v13 = vld [vmem:[#allocation47_spill] sm:$0xff] }
 0x2ee   : > { %3542 = vmatpush1.bf16.msra.mxu0 %v3291_v25  ;;  %3675 = vmatpush1.bf16.msra.mxu1 %v3410_v21  ;;  %v3340_v29 = vpack.c.bf16 %v2990_v44, %v2990_v44  ;;  %v3339_v46 = vpack.c.bf16 %v2991_v50, %v2991_v50  ;;  %v2382_v6 = vsel %vm491_vm1, %v5153_v1, %v5154_v41  ;;  %v9240_v25 = vld [vmem:[#allocation46_spill] sm:$0xff] }
 0x2ef   : > { %3543 = vmatprep.subr.bf16.mxu0 %v3316_v15  ;;  %v8053_v63 = vpop.permute.xlu0 %5196  ;;  %v8055_v4 = vpop.permute.xlu1 %5161  ;;  %v9241_v19 = vpack.c.bf16 %v9239_v13, %v9240_v25  ;;  %v2285_v45 = vsel %vm394_vm0, %v5149_v28, %v8944_v31  ;;  %v2286_v42 = vsel %vm394_vm0, %v5148_v39, %v5149_v28  ;;  %v8946_v28 = vunpack.i.l.bf16 %v8010_v18 }
 0x2f0   : > { %v8945_v0 = vunpack.i.l.bf16 %v8055_v4  ;;  %v3253_v50 = vpack.c.bf16 %v2382_v6, %v2286_v42  ;;  %v3392_v44 = vsel %vm1493_vm8, %v3339_v46, 0  ;;  %v5169_v6 = vunpack.i.h.bf16 %v7952_v59  ;;  %v9247_v42 = vld [vmem:[#allocation53_spill] sm:$0xff] }
 0x2f1   : > { %4334 = vmatmul.mubr.msk.bf16.vlgmr.msra.gmra.mrb[32].mxu1 %vm1489_vm9, %v7497_v11  ;;  %v5168_v25 = vunpack.i.l.bf16 %v7952_v59  ;;  %v3343_v24 = vpack.c.bf16 %v7689_v30, %v7689_v30 }
 0x2f2   : > { %3544 = vmatpush1.bf16.msra.mxu0 %v9241_v19  ;;  %v2381_v62 = vsel %vm491_vm1, %v5154_v41, %v8945_v0  ;;  %3784 = vmatprep.mubr.bf16.mxu1 %v8960_v38 }
 0x2f3   : > { %4327 = vmatprep.subr.msk.bf16.mxu0 %vm1493_vm8, %v3340_v29  ;;  %v8081_v15 = vpop.permute.xlu0 %5206  ;;  %v3254_v20 = vpack.c.bf16 %v2381_v62, %v2285_v45  ;;  %v9242_v29 = vpack.c.bf16 %v7725_v27, %v7711_v8  ;;  %v9243_v45 = vld [vmem:[#allocation52_spill] sm:$0xff]  ;;  %v9244_v62 = vld [vmem:[#allocation54_spill] sm:$0xff]  ;;  %v9246_v27 = vunpack.i.l.bf16 %v7792_v16 }
 0x2f4   : > { %v8083_v33 = vpop.permute.xlu1 %5171  ;;  %v9245_v8 = vpack.c.bf16 %v9243_v45, %v9244_v62  ;;  %v9249_v45 = vpack.c.bf16 %v7862_v47, %v7856_v34  ;;  %v2477_v62 = vsel %vm588_vm2, %v5169_v6, %v8946_v28  ;;  %v9250_v47 = vld [vmem:[#allocation24_spill] sm:$0xff]  ;;  %v9251_v28 = vld [vmem:[#allocation57_spill] sm:$0xff] }
 0x2f5   : > { %3752 = vmatprep.subr.bf16.mxu1 %v3254_v20  ;;  %v5174_v21 = vunpack.i.h.bf16 %v8083_v33  ;;  %v5173_v41 = vunpack.i.l.bf16 %v8083_v33  ;;  %v9248_v20 = vunpack.i.h.bf16 %v9247_v42  ;;  %v9252_v52 = vpack.c.bf16 %v7572_v61, %v9251_v28 }
 0x2f6   : > { %3546 = vmatpush1.bf16.msra.mxu0 %v3392_v44  ;;  %3753 = vmatpush1.bf16.msra.mxu1 %v3253_v50  ;;  %v5189_v44 = vunpack.i.h.bf16 %v8027_v56 }
 0x2f7   : > { %3623 = vmatprep.subr.bf16.mxu0 %v9242_v29  ;;  %v8092_v13 = vpop.permute.xlu0 %5216  ;;  %v2698_v50 = vsel %vm806_vm4, %v9248_v20, %v9246_v27  ;;  %v5188_v29 = vunpack.i.l.bf16 %v8027_v56  ;;  %v2574_v31 = vsel %vm685_vm3, %v5173_v41, %v5174_v21  ;;  %v2478_v27 = vsel %vm588_vm2, %v5168_v25, %v5169_v6  ;;  %v9253_v6 = vld [vmem:[#allocation14_spill] sm:$0xff] }
 0x2f8   : > { %v8096_v46 = vpop.permute.xlu1 %5181  ;;  %v3296_v20 = vpack.c.bf16 %v2698_v50, %v9250_v47  ;;  %v9256_v50 = vunpack.i.h.bf16 %v7653_v54  ;;  %v5219_v17 = vunpack.i.h.bf16 %v8092_v13  ;;  %v5218_v54 = vunpack.i.l.bf16 %v8092_v13 }
 0x2f9   : > { %4328 = vmatmul.mubr.msk.bf16.vlgmr.msra.gmra.mrb[28].mxu0 %vm1489_vm9, %v7497_v11  ;;  %v8948_v19 = vunpack.i.l.bf16 %v8096_v46 }
 0x2fa   : > { %3624 = vmatpush1.bf16.msra.mxu0 %v9245_v8  ;;  %3655 = vmatprep.mubr.bf16.mxu0 %v8960_v38 }
 0x2fb   : > { %3625 = vmatprep.subr.bf16.mxu0 %v9249_v45  ;;  %v8120_v16 = vpop.permute.xlu0 %5226  ;;  %v2573_v8 = vsel %vm685_vm3, %v5174_v21, %v8948_v19  ;;  %v3277_v45 = vpack.c.bf16 %v2574_v31, %v2478_v27  ;;  %v2693_v21 = vsel %vm806_vm4, %v5188_v29, %v5189_v44  ;;  %v9254_v19 = vld [vmem:[#allocation55_spill] sm:$0xff] }
 0x2fc   : > { %v8134_v42 = vpop.permute.xlu1 %5191  ;;  %v3278_v34 = vpack.c.bf16 %v2573_v8, %v2477_v62  ;;  %v3295_v37 = vpack.c.bf16 %v9254_v19, %v9253_v6  ;;  %v2986_v8 = vsel %vm1097_vm7, %v9256_v50, %v5138_v40  ;;  %v9257_v19 = vld [vmem:[#allocation7_spill] sm:$0xff]  ;;  %v9259_v6 = vunpack.i.h.bf16 %v7719_v43 }
 0x2fd   : > { %v5193_v0 = vunpack.i.l.bf16 %v8134_v42  ;;  %v3301_v27 = vpack.c.bf16 %v2693_v21, %v9257_v19  ;;  %v9260_v43 = vld [vmem:[#allocation59_spill] sm:$0xff]  ;;  %v2981_v50 = vsel %vm1097_vm7, %v5218_v54, %v5219_v17 }
 0x2fe   : > { %3626 = vmatpush1.bf16.msra.mxu0 %v9252_v52  ;;  %3754 = vmatprep.subr.bf16.mxu1 %v3278_v34  ;;  %v9255_v52 = vld [vmem:[#allocation39_spill] sm:$0xff]  ;;  %v9261_v5 = vunpack.i.h.bf16 %v9260_v43  ;;  %v5114_v43 = vunpack.i.h.bf16 %v7907_v49 }
 0x2ff   : > { %3627 = vmatprep.subr.bf16.mxu0 %v3296_v20  ;;  %3755 = vmatpush1.bf16.msra.mxu1 %v3277_v45  ;;  %v8147_v62 = vpop.permute.xlu0 %5236  ;;  %v2692_v31 = vsel %vm806_vm4, %v5189_v44, %v5193_v0  ;;  %v5208_v44 = vunpack.i.l.bf16 %v8081_v15  ;;  %v3344_v20 = vpack.c.bf16 %v2986_v8, %v2986_v8  ;;  %v5198_v45 = vunpack.i.l.bf16 %v8053_v63 }
 0x300   : > { %v8153_v61 = vpop.permute.xlu1 %5201  ;;  %v3302_v28 = vpack.c.bf16 %v2692_v31, %v9255_v52  ;;  %v2383_v31 = vsel %vm491_vm1, %v9259_v6, %v5153_v1  ;;  %v5104_v52 = vunpack.i.h.bf16 %v7867_v23  ;;  %v2287_v1 = vsel %vm394_vm0, %v9261_v5, %v5148_v39  ;;  %v9263_v5 = vld [vmem:[#allocation58_spill] sm:$0xff] }
 0x301   : > { %v5204_v34 = vunpack.i.h.bf16 %v8153_v61  ;;  %v5203_v47 = vunpack.i.l.bf16 %v8153_v61  ;;  %v2694_v23 = vsel %vm806_vm4, %v5114_v43, %v5188_v29  ;;  %v5144_v29 = vunpack.i.h.bf16 %v8012_v9 }
 0x302   : > { %3628 = vmatpush1.bf16.msra.mxu0 %v3295_v37  ;;  %3756 = vmatprep.subr.bf16.mxu1 %v3302_v28  ;;  %v5199_v37 = vunpack.i.h.bf16 %v8053_v63  ;;  %v2575_v6 = vsel %vm685_vm3, %v5104_v52, %v5173_v41  ;;  %v2576_v41 = vsel %vm685_vm3, %v5103_v3, %v5104_v52  ;;  %v5134_v3 = vunpack.i.h.bf16 %v7954_v32 }
 0x303   : > { %3629 = vmatprep.subr.bf16.mxu0 %v3320_v58  ;;  %3757 = vmatpush1.bf16.msra.mxu1 %v3301_v27  ;;  %v8171_v40 = vpop.permute.xlu0 %5246  ;;  %v9258_v58 = vpack.c.bf16 %v7642_v2, %v7674_v53  ;;  %v2885_v30 = vsel %vm1000_vm6, %v5203_v47, %v5204_v34  ;;  %v3404_v27 = vsel %vm1493_vm8, %v3343_v24, 0 }
 0x304   : > { %v8175_v21 = vpop.permute.xlu1 %5211  ;;  %v2788_v2 = vsel %vm903_vm5, %v5199_v37, %v5208_v44  ;;  %v2789_v8 = vsel %vm903_vm5, %v5198_v45, %v5199_v37  ;;  %v3349_v37 = vpack.c.bf16 %v2981_v50, %v2981_v50 }
 0x305   : > { %v5213_v35 = vunpack.i.l.bf16 %v8175_v21 }
 0x306   : > { %3630 = vmatpush1.bf16.msra.mxu0 %v9258_v58  ;;  %v3325_v58 = vpack.c.bf16 %v2885_v30, %v2789_v8  ;;  %v3422_v50 = vsel %vm1493_vm8, %v3349_v37, 0  ;;  %v9267_v37 = vld [vmem:[#allocation33_spill] sm:$0xff] }
 0x307   : > { %4331 = vmatprep.subr.msk.bf16.mxu0 %vm1493_vm8, %v3344_v20  ;;  %v8195_v28 = vpop.permute.xlu0 %5256  ;;  %v2884_v53 = vsel %vm1000_vm6, %v5204_v34, %v5213_v35  ;;  %v3252_v34 = vpack.c.bf16 %v2383_v31, %v2287_v1  ;;  %v5099_v20 = vunpack.i.h.bf16 %v7767_v14  ;;  %v9264_v1 = vld [vmem:[#allocation60_spill] sm:$0xff] }
 0x308   : > { %v8219_v19 = vpop.permute.xlu1 %5221  ;;  %v3326_v36 = vpack.c.bf16 %v2884_v53, %v2788_v2  ;;  %v9262_v53 = vunpack.i.l.bf16 %v7767_v14 }
 0x309   : > { %v5223_v39 = vunpack.i.l.bf16 %v8219_v19  ;;  %v2479_v33 = vsel %vm588_vm2, %v5099_v20, %v5168_v25  ;;  %v9265_v25 = vpack.c.bf16 %v9263_v5, %v9264_v1  ;;  %v2982_v5 = vsel %vm1097_vm7, %v5144_v29, %v5218_v54 }
 0x30a   : > { %3632 = vmatpush1.bf16.msra.mxu0 %v3404_v27  ;;  %3758 = vmatprep.subr.bf16.mxu1 %v3326_v36  ;;  %v2480_v59 = vsel %vm588_vm2, %v9262_v53, %v5099_v20  ;;  %v9266_v27 = vunpack.i.l.bf16 %v7907_v49  ;;  %v5238_v36 = vunpack.i.l.bf16 %v8147_v62  ;;  %v5229_v20 = vunpack.i.h.bf16 %v8120_v16 }
 0x30b   : > { %3709 = vmatprep.subr.bf16.mxu0 %v3252_v34  ;;  %v2980_v24 = vsel %vm1097_vm7, %v5219_v17, %v5223_v39  ;;  %3759 = vmatpush1.bf16.msra.mxu1 %v3325_v58  ;;  %v8233_v31 = vpop.permute.xlu0 %5261  ;;  %v3276_v17 = vpack.c.bf16 %v2575_v6, %v2479_v33  ;;  %v3275_v8 = vpack.c.bf16 %v2576_v41, %v2480_v59  ;;  %v5228_v58 = vunpack.i.l.bf16 %v8120_v16  ;;  %v9268_v41 = vld [vmem:[#allocation17_spill] sm:$0xff] }
 0x30c   : > { %v3350_v30 = vpack.c.bf16 %v2980_v24, %v2980_v24  ;;  %v8243_v2 = vpop.permute.xlu1 %5231  ;;  %v2695_v56 = vsel %vm806_vm4, %v9266_v27, %v5114_v43  ;;  %v3300_v24 = vpack.c.bf16 %v2694_v23, %v9267_v37  ;;  %v5129_v49 = vunpack.i.h.bf16 %v7834_v7 }
 0x30d   : > { %4332 = vmatmul.mubr.msk.bf16.vlgmr.msra.gmra.mrb[32].mxu0 %vm1489_vm9, %v7497_v11  ;;  %v5234_v52 = vunpack.i.h.bf16 %v8243_v2  ;;  %v5233_v14 = vunpack.i.l.bf16 %v8243_v2  ;;  %v2886_v43 = vsel %vm1000_vm6, %v5134_v3, %v5203_v47  ;;  %v9269_v2 = vunpack.i.l.bf16 %v7954_v32 }
 0x30e   : > { %3710 = vmatpush1.bf16.msra.mxu0 %v9265_v25  ;;  %3741 = vmatprep.mubr.bf16.mxu0 %v8960_v38  ;;  %v2281_v61 = vsel %vm394_vm0, %v5229_v20, %v5238_v36  ;;  %v2790_v47 = vsel %vm903_vm5, %v5129_v49, %v5198_v45  ;;  %v2282_v1 = vsel %vm394_vm0, %v5228_v58, %v5229_v20  ;;  %v5258_v45 = vunpack.i.l.bf16 %v8195_v28 }
 0x30f   : > { %4337 = vmatprep.subr.msk.bf16.mxu1 %vm1493_vm8, %v3350_v30  ;;  %3711 = vmatprep.subr.bf16.mxu0 %v3276_v17  ;;  %v8270_v34 = vpop.permute.xlu0 %5266  ;;  %v3299_v30 = vpack.c.bf16 %v2695_v56, %v9268_v41  ;;  %v2887_v16 = vsel %vm1000_vm6, %v9269_v2, %v5134_v3  ;;  %v2378_v17 = vsel %vm491_vm1, %v5233_v14, %v5234_v52  ;;  %v5248_v54 = vunpack.i.l.bf16 %v8171_v40 }
 0x310   : > { %3761 = vmatpush1.bf16.msra.mxu1 %v3422_v50  ;;  %v8274_v6 = vpop.permute.xlu1 %5241  ;;  %v3324_v23 = vpack.c.bf16 %v2886_v43, %v2790_v47  ;;  %v3257_v3 = vpack.c.bf16 %v2378_v17, %v2282_v1  ;;  %v9271_v50 = vunpack.i.l.bf16 %v7834_v7  ;;  %v5164_v56 = vunpack.i.h.bf16 %v8055_v4 }
 0x311   : > { %v5243_v33 = vunpack.i.l.bf16 %v8274_v6  ;;  %v3348_v37 = vpack.c.bf16 %v2982_v5, %v2982_v5  ;;  %v5263_v7 = vunpack.i.l.bf16 %v8233_v31  ;;  %v5184_v17 = vunpack.i.h.bf16 %v8096_v46 }
 0x312   : > { %3712 = vmatpush1.bf16.msra.mxu0 %v3275_v8  ;;  %v2791_v13 = vsel %vm903_vm5, %v9271_v50, %v5129_v49  ;;  %v5249_v8 = vunpack.i.h.bf16 %v8171_v40  ;;  %v5159_v40 = vunpack.i.h.bf16 %v7930_v48  ;;  %v9274_v50 = vld [vmem:[#allocation36_spill] sm:$0xff] }
 0x313   : > { %4338 = vmatmul.mubr.msk.bf16.vlgmr.msra.gmra.mrb[36].mxu1 %vm1489_vm9, %v7497_v11  ;;  %3713 = vmatprep.subr.bf16.mxu0 %v3300_v24  ;;  %v8292_v53 = vpop.permute.xlu0 %2773  ;;  %v2377_v32 = vsel %vm491_vm1, %v5234_v52, %v5243_v33  ;;  %v9270_v11 = vunpack.i.l.bf16 %v8012_v9  ;;  %v3323_v27 = vpack.c.bf16 %v2887_v16, %v2791_v13  ;;  %v5264_v24 = vunpack.i.h.bf16 %v8233_v31 }
 0x314   : > { %3870 = vmatprep.mubr.bf16.mxu1 %v8960_v38  ;;  %v5252_v25 = vpop.permute.xlu1 %5251  ;;  %v3258_v63 = vpack.c.bf16 %v2377_v32, %v2281_v61  ;;  %v2473_v41 = vsel %vm588_vm2, %v5249_v8, %v5258_v45  ;;  %v2379_v31 = vsel %vm491_vm1, %v5164_v56, %v5233_v14  ;;  %v2474_v2 = vsel %vm588_vm2, %v5248_v54, %v5249_v8 }
 0x315   : > { %v2983_v59 = vsel %vm1097_vm7, %v9270_v11, %v5144_v29  ;;  %v5254_v9 = vunpack.i.h.bf16 %v5252_v25  ;;  %v5253_v52 = vunpack.i.l.bf16 %v5252_v25  ;;  %v2283_v47 = vsel %vm394_vm0, %v5159_v40, %v5228_v58 }
 0x316   : > { %3714 = vmatpush1.bf16.msra.mxu0 %v3299_v30  ;;  %3838 = vmatprep.subr.bf16.mxu1 %v3258_v63  ;;  %v3347_v20 = vpack.c.bf16 %v2983_v59, %v2983_v59  ;;  %v9272_v11 = vunpack.i.l.bf16 %v8055_v4  ;;  %v2689_v14 = vsel %vm806_vm4, %v5263_v7, %v5264_v24  ;;  %v3256_v25 = vpack.c.bf16 %v2379_v31, %v2283_v47 }
 0x317   : > { %3715 = vmatprep.subr.bf16.mxu0 %v3324_v23  ;;  %3839 = vmatpush1.bf16.msra.mxu1 %v3257_v3  ;;  %v8325_v29 = vpop.permute.xlu0 %5276  ;;  %v2570_v49 = vsel %vm685_vm3, %v5253_v52, %v5254_v9  ;;  %v5179_v63 = vunpack.i.h.bf16 %v8010_v18  ;;  %v2571_v4 = vsel %vm685_vm3, %v5184_v17, %v5253_v52  ;;  %v9273_v23 = vunpack.i.l.bf16 %v7930_v48 }
 0x318   : > { %v8331_v43 = vpop.permute.xlu1 %2555  ;;  %v3281_v61 = vpack.c.bf16 %v2570_v49, %v2474_v2  ;;  %v2380_v59 = vsel %vm491_vm1, %v9272_v11, %v5164_v56  ;;  %v3416_v1 = vsel %vm1493_vm8, %v3347_v20, 0  ;;  %v9276_v52 = vunpack.i.l.bf16 %v8096_v46  ;;  %v8384_v49 = vld [vmem:[%s8699_s3] sm:$0xff]  }
 0x319   : > { %v2569_v30 = vsel %vm685_vm3, %v5254_v9, %v8331_v43  ;;  %v2284_v3 = vsel %vm394_vm0, %v9273_v23, %v5159_v40  ;;  %v5194_v9 = vunpack.i.h.bf16 %v8134_v42  ;;  %v5278_v46 = vunpack.i.l.bf16 %v8325_v29 }
 0x31a   : > { %3716 = vmatpush1.bf16.msra.mxu0 %v3323_v27  ;;  %v3282_v16 = vpack.c.bf16 %v2569_v30, %v2473_v41  ;;  %v3255_v8 = vpack.c.bf16 %v2380_v59, %v2284_v3  ;;  %v9275_v27 = vld [vmem:[#allocation35_spill] sm:$0xff]  ;;  %v2572_v48 = vsel %vm685_vm3, %v9276_v52, %v5184_v17  ;;  %v9277_v2 = vunpack.i.l.bf16 %v8010_v18  ;;  %v9279_v3 = vld [vmem:[#allocation6_spill] sm:$0xff] }
 0x31b   : > { %4335 = vmatprep.subr.msk.bf16.mxu0 %vm1493_vm8, %v3348_v37  ;;  %v8347_v32 = vpop.permute.xlu0 %2561  ;;  %v3305_v56 = vpack.c.bf16 %v2689_v14, %v9275_v27  ;;  %v2475_v37 = vsel %vm588_vm2, %v5179_v63, %v5248_v54  ;;  %v2690_v41 = vsel %vm806_vm4, %v5194_v9, %v5263_v7  ;;  %v5279_v54 = vunpack.i.h.bf16 %v8325_v29 }
 0x31c   : > { %v8357_v5 = vpop.permute.xlu1 %2677  ;;  %3840 = vmatprep.subr.bf16.mxu1 %v3282_v16  ;;  %v3280_v40 = vpack.c.bf16 %v2571_v4, %v2475_v37  ;;  %v2476_v16 = vsel %vm588_vm2, %v9277_v2, %v5179_v63  ;;  %v5269_v17 = vunpack.i.h.bf16 %v8270_v34  ;;  %v5209_v7 = vunpack.i.h.bf16 %v8081_v15 }
 0x31d   : > { %v2688_v58 = vsel %vm806_vm4, %v5264_v24, %v8357_v5  ;;  %3841 = vmatpush1.bf16.msra.mxu1 %v3281_v61  ;;  %v5268_v61 = vunpack.i.l.bf16 %v8270_v34  ;;  %v3279_v47 = vpack.c.bf16 %v2572_v48, %v2476_v16  ;;  %v5214_v29 = vunpack.i.h.bf16 %v8175_v21 }
 0x31e   : > { %3718 = vmatpush1.bf16.msra.mxu0 %v3416_v1  ;;  %v3306_v13 = vpack.c.bf16 %v2688_v58, %v9274_v50  ;;  %v2691_v18 = vsel %vm806_vm4, %v5193_v0, %v5194_v9  ;;  %v5224_v59 = vunpack.i.h.bf16 %v8219_v19  ;;  %v9278_v1 = vld [vmem:[#allocation27_spill] sm:$0xff]  ;;  %v2784_v63 = vsel %vm903_vm5, %v5269_v17, %v8292_v53 }
 0x31f   : > { %3795 = vmatprep.subr.bf16.mxu0 %v3256_v25  ;;  %v8373_v20 = vpop.permute.xlu0 %5281  ;;  %v3304_v25 = vpack.c.bf16 %v2690_v41, %v9278_v1  ;;  %v2977_v58 = vsel %vm1097_vm7, %v5278_v46, %v5279_v54  ;;  %v2785_v4 = vsel %vm903_vm5, %v5268_v61, %v5269_v17  ;;  %v3303_v9 = vpack.c.bf16 %v2691_v18, %v9279_v3 }
 0x320   : > { %v5272_v24 = vpop.permute.xlu1 %5271  ;;  %3842 = vmatprep.subr.bf16.mxu1 %v3306_v13  ;;  %v2786_v13 = vsel %vm903_vm5, %v5209_v7, %v5268_v61  ;;  %v2883_v27 = vsel %vm1000_vm6, %v5213_v35, %v5214_v29  ;;  %v3353_v48 = vpack.c.bf16 %v2977_v58, %v2977_v58  ;;  %v2978_v15 = vsel %vm1097_vm7, %v5224_v59, %v5278_v46 }
 0x321   : > { %4336 = vmatmul.mubr.msk.bf16.vlgmr.msra.gmra.mrb[36].mxu0 %vm1489_vm9, %v8384_v49  ;;  %v5274_v30 = vunpack.i.h.bf16 %v5272_v24  ;;  %v5273_v31 = vunpack.i.l.bf16 %v5272_v24  ;;  %3843 = vmatpush1.bf16.msra.mxu1 %v3305_v56  ;;  %v5239_v24 = vunpack.i.h.bf16 %v8147_v62  ;;  %v2979_v21 = vsel %vm1097_vm7, %v5223_v39, %v5224_v59 }
 0x322   : > { %3796 = vmatpush1.bf16.msra.mxu0 %v3255_v8  ;;  %3827 = vmatprep.mubr.bf16.mxu0 %v8960_v38  ;;  %v2787_v8 = vsel %vm903_vm5, %v5208_v44, %v5209_v7  ;;  %v5244_v35 = vunpack.i.h.bf16 %v8274_v6  ;;  %v5283_v41 = vunpack.i.l.bf16 %v8373_v20  ;;  %v3352_v2 = vpack.c.bf16 %v2978_v15, %v2978_v15 }
 0x323   : > { %3797 = vmatprep.subr.bf16.mxu0 %v3280_v40  ;;  %v8401_v11 = vpop.permute.xlu0 %5291  ;;  %v2881_v34 = vsel %vm1000_vm6, %v5273_v31, %v5274_v30  ;;  %v2882_v0 = vsel %vm1000_vm6, %v5214_v29, %v5273_v31  ;;  %v5284_v40 = vunpack.i.h.bf16 %v8373_v20  ;;  %v3327_v46 = vpack.c.bf16 %v2883_v27, %v2787_v8 }
 0x324   : > { %v8410_v14 = vpop.permute.xlu1 %2869  ;;  %v3329_v50 = vpack.c.bf16 %v2881_v34, %v2785_v4  ;;  %v3328_v52 = vpack.c.bf16 %v2882_v0, %v2786_v13  ;;  %v5294_v31 = vunpack.i.h.bf16 %v8401_v11  ;;  %v3434_v19 = vsel %vm1493_vm8, %v3353_v48, 0 }
 0x325   : > { %v2880_v42 = vsel %vm1000_vm6, %v5274_v30, %v8410_v14  ;;  %v3351_v16 = vpack.c.bf16 %v2979_v21, %v2979_v21  ;;  %v2280_v39 = vsel %vm394_vm0, %v5238_v36, %v5239_v24  ;;  %v2376_v20 = vsel %vm491_vm1, %v5243_v33, %v5244_v35 }
 0x326   : > { %3798 = vmatpush1.bf16.msra.mxu0 %v3279_v47  ;;  %v3330_v23 = vpack.c.bf16 %v2880_v42, %v2784_v63  ;;  %v2278_v7 = vsel %vm394_vm0, %v5283_v41, %v5284_v40  ;;  %v5293_v47 = vunpack.i.l.bf16 %v8401_v11  ;;  %v9280_v62 = vunpack.i.l.bf16 %v7747_v51 }
 0x327   : > { %3799 = vmatprep.subr.bf16.mxu0 %v3304_v25  ;;  %v8438_v37 = vpop.permute.xlu0 %2683  ;;  %v9281_v18 = vunpack.i.l.bf16 %v7769_v26  ;;  %v9282_v59 = vunpack.i.l.bf16 %v7794_v10  ;;  %v3428_v25 = vsel %vm1493_vm8, %v3351_v16, 0  ;;  %v2279_v26 = vsel %vm394_vm0, %v5239_v24, %v5283_v41 }
 0x328   : > { %v8436_v56 = vpop.permute.xlu1 %2965  ;;  %3844 = vmatprep.subr.bf16.mxu1 %v3330_v23  ;;  %v2277_v36 = vsel %vm394_vm0, %v5284_v40, %v9280_v62  ;;  %v9283_v42 = vunpack.i.l.bf16 %v7806_v57  ;;  %v5259_v23 = vunpack.i.h.bf16 %v8195_v28  ;;  %v3259_v3 = vpack.c.bf16 %v2376_v20, %v2280_v39 }
 0x329   : > { %v2976_v44 = vsel %vm1097_vm7, %v5279_v54, %v8436_v56  ;;  %3845 = vmatpush1.bf16.msra.mxu1 %v3329_v50  ;;  %v2469_v34 = vsel %vm588_vm2, %v5294_v31, %v9282_v59  ;;  %v9284_v57 = vunpack.i.l.bf16 %v7351_v12  ;;  %vm4126_vm0 = vcmask 48168  }
 0x32a   : > { %3800 = vmatpush1.bf16.msra.mxu0 %v3303_v9  ;;  %v3354_v30 = vpack.c.bf16 %v2976_v44, %v2976_v44  ;;  %v2565_v10 = vsel %vm685_vm3, %v8347_v32, %v9283_v42  ;;  %v2470_v9 = vsel %vm588_vm2, %v5293_v47, %v5294_v31  ;;  %v2471_v15 = vsel %vm588_vm2, %v5259_v23, %v5293_v47 }
 0x32b   : > { %3801 = vmatprep.subr.bf16.mxu0 %v3328_v52  ;;  %v8467_v29 = vpop.permute.xlu0 %5311  ;;  %v3286_v50 = vpack.c.bf16 %v2565_v10, %v2469_v34  ;;  %v2708_v13 = vsel %vm806_vm4, %v8438_v37, %v9284_v57  ;;  %v9291_v34 = vld [vmem:[#allocation40_spill] sm:$0xff] }
 0x32c   : > { %v5287_v54 = vpop.permute.xlu1 %5286  ;;  %4341 = vmatprep.subr.msk.bf16.mxu1 %vm1493_vm8, %v3354_v30  ;;  %v5314_v41 = vunpack.i.h.bf16 %v8467_v29  ;;  %v5313_v30 = vunpack.i.l.bf16 %v8467_v29 }
 0x32d   : > { %v5289_v17 = vunpack.i.h.bf16 %v5287_v54  ;;  %v5288_v61 = vunpack.i.l.bf16 %v5287_v54  ;;  %3847 = vmatpush1.bf16.msra.mxu1 %v3434_v19  ;;  %v9287_v19 = vld [vmem:[#allocation51_spill] sm:$0xff] }
 0x32e   : > { %3802 = vmatpush1.bf16.msra.mxu0 %v3327_v46 }
 0x32f   : > { %4339 = vmatprep.subr.msk.bf16.mxu0 %vm1493_vm8, %v3352_v2  ;;  %v2374_v6 = vsel %vm491_vm1, %v5288_v61, %v5289_v17  ;;  %v2373_v33 = vsel %vm491_vm1, %v5289_v17, %v9281_v18  ;;  %v2375_v11 = vsel %vm491_vm1, %v5244_v35, %v5288_v61  ;;  %v2876_v24 = vpop.permute.xlu0 %2875  ;;  %v9285_v35 = vld [vmem:[#allocation29_spill] sm:$0xff]  ;;  %vm4137_vm1 = vcmask 56368  }
 0x330   : > { %v3261_v51 = vpack.c.bf16 %v2374_v6, %v2278_v7  ;;  %v5297_v1 = vpop.permute.xlu1 %5296  ;;  %4342 = vmatmul.mubr.msk.bf16.vlgmr.msra.gmra.mrb[40].mxu1 %vm1489_vm9, %v8384_v49  ;;  %v3262_v63 = vpack.c.bf16 %v2373_v33, %v2277_v36  ;;  %v3260_v4 = vpack.c.bf16 %v2375_v11, %v2279_v26  ;;  %v3310_v40 = vpack.c.bf16 %v2708_v13, %v9285_v35 }
 0x331   : > { %v5299_v0 = vunpack.i.h.bf16 %v5297_v1  ;;  %v5298_v58 = vunpack.i.l.bf16 %v5297_v1  ;;  %3956 = vmatprep.mubr.bf16.mxu1 %v8960_v38  ;;  %v2877_v47 = vsel %vm1000_vm6, %v5314_v41, %v2876_v24  ;;  %v9289_v6 = vunpack.i.l.bf16 %v7396_v22 }
 0x332   : > { %3804 = vmatpush1.bf16.msra.mxu0 %v3428_v25  ;;  %3924 = vmatprep.subr.bf16.mxu1 %v3262_v63  ;;  %v9290_v33 = vunpack.i.l.bf16 %v7412_v55  ;;  %v2879_v22 = vsel %vm1000_vm6, %v8410_v14, %v5313_v30 }
 0x333   : > { %v2566_v8 = vsel %vm685_vm3, %v5299_v0, %v8347_v32  ;;  %3881 = vmatprep.subr.bf16.mxu0 %v3260_v4  ;;  %3925 = vmatpush1.bf16.msra.mxu1 %v3261_v51  ;;  %v2567_v27 = vsel %vm685_vm3, %v5298_v58, %v5299_v0  ;;  %v2568_v52 = vsel %vm685_vm3, %v8331_v43, %v5298_v58  ;;  %v2972_v61 = vpop.permute.xlu0 %2971  ;;  %v9292_v51 = vunpack.i.l.bf16 %v9291_v34 }
 0x334   : > { %v3285_v48 = vpack.c.bf16 %v2566_v8, %v2470_v9  ;;  %v5302_v12 = vpop.permute.xlu1 %5301  ;;  %3926 = vmatprep.subr.bf16.mxu1 %v3286_v50  ;;  %v3284_v21 = vpack.c.bf16 %v2567_v27, %v2471_v15  ;;  %v2472_v43 = vsel %vm588_vm2, %v5258_v45, %v5259_v23  ;;  %v9286_v45 = vld [vmem:[#allocation50_spill] sm:$0xff]  ;;  %v2900_v18 = vsel %vm1000_vm6, %v2876_v24, %v9289_v6  ;;  %v9295_v6 = vld [vmem:[#allocation11_spill] sm:$0xff] }
 0x335   : > { %4340 = vmatmul.mubr.msk.bf16.vlgmr.msra.gmra.mrb[40].mxu0 %vm1489_vm9, %v8384_v49  ;;  %v5304_v32 = vunpack.i.h.bf16 %v5302_v12  ;;  %v5303_v44 = vunpack.i.l.bf16 %v5302_v12  ;;  %v3283_v46 = vpack.c.bf16 %v2568_v52, %v2472_v43  ;;  %v2996_v11 = vsel %vm1097_vm7, %v2972_v61, %v9290_v33 }
 0x336   : > { %3882 = vmatpush1.bf16.msra.mxu0 %v3259_v3  ;;  %3913 = vmatprep.mubr.bf16.mxu0 %v8960_v38  ;;  %v3358_v63 = vpack.c.bf16 %v2996_v11, %v2996_v11  ;;  %vm4148_vm2 = vcmask 64568   ;;  %vm4162_vm3 = vcmask 130048  }
 0x337   : > { %v2685_v31 = vsel %vm806_vm4, %v5304_v32, %v8438_v37  ;;  %3883 = vmatprep.subr.bf16.mxu0 %v3284_v21  ;;  %3927 = vmatpush1.bf16.msra.mxu1 %v3285_v48  ;;  %v2686_v38 = vsel %vm806_vm4, %v5303_v44, %v5304_v32  ;;  %v2687_v28 = vsel %vm806_vm4, %v8357_v5, %v5303_v44  ;;  %v9288_v37 = vld [vmem:[#allocation8_spill] sm:$0xff]  ;;  %vm4236_vm4 = vcmask 64512  }
 0x338   : > { %v3309_v2 = vpack.c.bf16 %v2685_v31, %v9286_v45  ;;  %v5307_v54 = vpop.permute.xlu1 %5306  ;;  %3928 = vmatprep.subr.bf16.mxu1 %v3310_v40  ;;  %v3308_v16 = vpack.c.bf16 %v2686_v38, %v9287_v19  ;;  %v3307_v20 = vpack.c.bf16 %v2687_v28, %v9288_v37  ;;  %v2878_v5 = vsel %vm1000_vm6, %v5313_v30, %v5314_v41  ;;  %v9293_v40 = vld [vmem:[#allocation13_spill] sm:$0xff] }
 0x339   : > { %v5309_v39 = vunpack.i.h.bf16 %v5307_v54  ;;  %v5308_v17 = vunpack.i.l.bf16 %v5307_v54 }
 0x33a   : > { %3884 = vmatpush1.bf16.msra.mxu0 %v3283_v46  ;;  %v9294_v46 = vld [vmem:[#allocation12_spill] sm:$0xff] }
 0x33b   : > { %3885 = vmatprep.subr.bf16.mxu0 %v3308_v16  ;;  %3929 = vmatpush1.bf16.msra.mxu1 %v3309_v2  ;;  %v2782_v7 = vsel %vm903_vm5, %v5308_v17, %v5309_v39  ;;  %v2783_v29 = vsel %vm903_vm5, %v8292_v53, %v5308_v17 }
 0x33c   : > { %v2780_v62 = vpop.permute.xlu1 %2779  ;;  %v3332_v36 = vpack.c.bf16 %v2878_v5, %v2782_v7  ;;  %v3331_v55 = vpack.c.bf16 %v2879_v22, %v2783_v29 }
 0x33d   : > { %v2781_v59 = vsel %vm903_vm5, %v5309_v39, %v2780_v62  ;;  %v2804_v53 = vsel %vm903_vm5, %v2780_v62, %v9292_v51  ;;  %v9297_v51 = vld [vmem:[#allocation18_spill] sm:$0xff] }
 0x33e   : > { %3886 = vmatpush1.bf16.msra.mxu0 %v3307_v20  ;;  %v3333_v1 = vpack.c.bf16 %v2877_v47, %v2781_v59  ;;  %v3334_v25 = vpack.c.bf16 %v2900_v18, %v2804_v53  ;;  %v9296_v59 = vld [vmem:[#allocation10_spill] sm:$0xff] }
 0x33f   : > { %3887 = vmatprep.subr.bf16.mxu0 %v3332_v36 }
 0x340   : > { %v5317_v26 = vpop.permute.xlu1 %5316  ;;  %3930 = vmatprep.subr.bf16.mxu1 %v3334_v25 }
 0x341   : > { %v5319_v42 = vunpack.i.h.bf16 %v5317_v26  ;;  %v5318_v10 = vunpack.i.l.bf16 %v5317_v26  ;;  %3931 = vmatpush1.bf16.msra.mxu1 %v3333_v1 }
 0x342   : > { %3888 = vmatpush1.bf16.msra.mxu0 %v3331_v55  ;;  %4345 = vmatprep.subr.msk.bf16.mxu1 %vm1493_vm8, %v3358_v63 }
 0x343   : > { %v2974_v0 = vsel %vm1097_vm7, %v5318_v10, %v5319_v42  ;;  %v2975_v14 = vsel %vm1097_vm7, %v8436_v56, %v5318_v10  ;;  %v2973_v58 = vsel %vm1097_vm7, %v5319_v42, %v2972_v61 }
 0x344   : > { %v3356_v4 = vpack.c.bf16 %v2974_v0, %v2974_v0  ;;  %v3355_v23 = vpack.c.bf16 %v2975_v14, %v2975_v14  ;;  %v3357_v3 = vpack.c.bf16 %v2973_v58, %v2973_v58  ;;  %v8580_v24 = vpop.permute.xlu0 %3368 }
 0x346   : > { %4343 = vmatprep.subr.msk.bf16.mxu0 %vm1493_vm8, %v3356_v4  ;;  %v3440_v9 = vsel %vm1493_vm8, %v3355_v23, 0  ;;  %v3446_v50 = vsel %vm1493_vm8, %v3357_v3, 0 }
 0x347   : > { %3890 = vmatpush1.bf16.msra.mxu0 %v3440_v9  ;;  %3933 = vmatpush1.bf16.msra.mxu1 %v3446_v50 }
 0x34a   : > { %4344 = vmatmul.mubr.msk.bf16.vlgmr.msra.gmra.mrb[44].mxu0 %vm1489_vm9, %v8384_v49  ;;  %4346 = vmatmul.mubr.msk.bf16.vlgmr.msra.gmra.mrb[44].mxu1 %vm1489_vm9, %v8384_v49 }
 0x351   : > { %v8577_v27 = vpop.permute.xlu1 %3363 }
 0x378   : > { %v3528_v56 = vpop.f32.mrb[24].mxu1 }
 0x379   : > { %v3530_v60 = vpop.f32.mrb[25].mxu1  ;;  %v3529_v54 = vadd.f32 %v3528_v56, %v8577_v27 }
 0x37a   : > { %v3532_v57 = vpop.f32.mrb[26].mxu1  ;;  %v3531_v4 = vadd.f32 %v3530_v60, %v8577_v27 }
 0x37b   : > { %v3534_v13 = vpop.f32.mrb[27].mxu1  ;;  %v3533_v17 = vadd.f32 %v3532_v57, %v8580_v24  ;;  %v3969_v20 = vmax.f32 %v3529_v54, 0.0 }
 0x37c   : > { %v3535_v23 = vadd.f32 %v3534_v13, %v8580_v24  ;;  %v3970_v50 = vmax.f32 %v3531_v4, 0.0 }
 0x37d   : > { %v3993_v33 = vmax.f32 %v3533_v17, 0.0  ;;  %v4017_v53 = vmul.f32 %v3969_v20, %v9297_v51 }
 0x37f   : > { %v4041_v55 = vmul.f32 %v3993_v33, %v9297_v51  ;;  %v9301_v33 = vld [vmem:[#allocation4_spill] sm:$0xff] }
 0x39c   : > { %v3614_v8 = vpop.f32.mrb[28].mxu1 }
 0x39d   : > { %v3616_v52 = vpop.f32.mrb[29].mxu1  ;;  %v3615_v48 = vadd.f32 %v3614_v8, %v8577_v27 }
 0x39e   : > { %v3618_v12 = vpop.f32.mrb[30].mxu1  ;;  %v3617_v15 = vadd.f32 %v3616_v52, %v8577_v27  ;;  %v3994_v52 = vmax.f32 %v3535_v23, 0.0 }
 0x39f   : > { %v3619_v32 = vadd.f32 %v3618_v12, %v8580_v24  ;;  %v3620_v44 = vpop.f32.mrb[31].mxu1  ;;  %v3973_v21 = vmax.f32 %v3615_v48, 0.0 }
 0x3a0   : > { %v3621_v49 = vadd.f32 %v3620_v44, %v8580_v24  ;;  %v3974_v43 = vmax.f32 %v3617_v15, 0.0 }
 0x3a1   : > { %v3997_v35 = vmax.f32 %v3619_v32, 0.0  ;;  %v4021_v41 = vmul.f32 %v3973_v21, %v9293_v40  ;;  %v9298_v21 = vld [vmem:[#allocation19_spill] sm:$0xff] }
 0x3a2   : > { %v3998_v30 = vmax.f32 %v3621_v49, 0.0  ;;  %v4022_v31 = vmul.f32 %v3974_v43, %v9294_v46  ;;  %v4018_v60 = vmul.f32 %v3970_v50, %v9298_v21  ;;  %v9299_v49 = vld [vmem:[#allocation42_spill] sm:$0xff] }
 0x3a3   : > { %v4045_v38 = vmul.f32 %v3997_v35, %v9293_v40  ;;  %v9300_v35 = vld [vmem:[#allocation20_spill] sm:$0xff] }
 0x3a4   : > { %v4046_v28 = vmul.f32 %v3998_v30, %v9294_v46  ;;  %v8589_v45 = vadd.f32 %v4022_v31, %v4021_v41  ;;  %v4042_v30 = vmul.f32 %v3994_v52, %v9298_v21 }
 0x3a6   : > { %v8591_v2 = vadd.f32 %v4046_v28, %v4045_v38 }
 0x3b7   : > { %v3485_v19 = vpop.f32.mrb[24].mxu0 }
 0x3b8   : > { %v3487_v16 = vpop.f32.mrb[25].mxu0  ;;  %v3486_v39 = vadd.f32 %v3485_v19, %v8577_v27 }
 0x3b9   : > { %v3489_v61 = vpop.f32.mrb[26].mxu0  ;;  %v3488_v37 = vadd.f32 %v3487_v16, %v8577_v27 }
 0x3ba   : > { %v3490_v7 = vadd.f32 %v3489_v61, %v8580_v24  ;;  %v3491_v5 = vpop.f32.mrb[27].mxu0  ;;  %v3967_v47 = vmax.f32 %v3486_v39, 0.0 }
 0x3bb   : > { %v3492_v29 = vadd.f32 %v3491_v5, %v8580_v24  ;;  %v3968_v62 = vmax.f32 %v3488_v37, 0.0 }
 0x3bc   : > { %v3991_v36 = vmax.f32 %v3490_v7, 0.0  ;;  %v4015_v18 = vmul.f32 %v3967_v47, %v9295_v6 }
 0x3bd   : > { %v3992_v11 = vmax.f32 %v3492_v29, 0.0  ;;  %v4016_v34 = vmul.f32 %v3968_v62, %v9296_v59 }
 0x3be   : > { %v4039_v22 = vmul.f32 %v3991_v36, %v9295_v6 }
 0x3bf   : > { %v4040_v1 = vmul.f32 %v3992_v11, %v9296_v59  ;;  %v4063_v25 = vadd.f32 %v4016_v34, %v4015_v18 }
 0x3c1   : > { %v4067_v63 = vadd.f32 %v4040_v1, %v4039_v22  ;;  %v4064_v26 = vadd.f32 %v4063_v25, %v4017_v53  ;;  %v9302_v53 = vld [vmem:[#allocation22_spill] sm:$0xff]  ;;  %v9303_v25 = vld [vmem:[#allocation16_spill] sm:$0xff] }
 0x3c3   : > { %4065 = vadd.xlane.f32.xlu1 %v4064_v26  ;;  %v4068_v42 = vadd.f32 %v4067_v63, %v4041_v55  ;;  %v9304_v26 = vld [vmem:[#allocation5_spill] sm:$0xff] }
 0x3c4   : > { %v3700_v10 = vpop.f32.mrb[32].mxu1 }
 0x3c5   : > { %v3702_v0 = vpop.f32.mrb[33].mxu1  ;;  %4069 = vadd.xlane.f32.xlu0 %v4068_v42  ;;  %v3701_v16 = vadd.f32 %v3700_v10, %v8577_v27 }
 0x3c6   : > { %v3704_v14 = vpop.f32.mrb[34].mxu1  ;;  %v3703_v39 = vadd.f32 %v3702_v0, %v8577_v27 }
 0x3c7   : > { %v3706_v58 = vpop.f32.mrb[35].mxu1  ;;  %v3977_v17 = vmax.f32 %v3701_v16, 0.0  ;;  %v3705_v61 = vadd.f32 %v3704_v14, %v8580_v24 }
 0x3c8   : > { %v3978_v5 = vmax.f32 %v3703_v39, 0.0  ;;  %v3707_v47 = vadd.f32 %v3706_v58, %v8580_v24 }
 0x3c9   : > { %v4025_v11 = vmul.f32 %v3977_v17, %v9301_v33  ;;  %v4001_v59 = vmax.f32 %v3705_v61, 0.0 }
 0x3ca   : > { %v4026_v55 = vmul.f32 %v3978_v5, %v9303_v25  ;;  %v4002_v63 = vmax.f32 %v3707_v47, 0.0 }
 0x3cb   : > { %v4049_v23 = vmul.f32 %v4001_v59, %v9301_v33 }
 0x3cc   : > { %v3571_v3 = vpop.f32.mrb[28].mxu0 }
 0x3cd   : > { %v3572_v9 = vadd.f32 %v3571_v3, %v8577_v27  ;;  %v3573_v56 = vpop.f32.mrb[29].mxu0 }
 0x3ce   : > { %v3574_v57 = vadd.f32 %v3573_v56, %v8577_v27  ;;  %v3575_v8 = vpop.f32.mrb[30].mxu0 }
 0x3cf   : > { %v3971_v48 = vmax.f32 %v3572_v9, 0.0  ;;  %v3576_v12 = vadd.f32 %v3575_v8, %v8580_v24  ;;  %v3577_v15 = vpop.f32.mrb[31].mxu0  ;;  %v4050_v8 = vmul.f32 %v4002_v63, %v9303_v25 }
 0x3d0   : > { %v3972_v32 = vmax.f32 %v3574_v57, 0.0  ;;  %v3578_v44 = vadd.f32 %v3577_v15, %v8580_v24 }
 0x3d1   : > { %v4019_v13 = vmul.f32 %v3971_v48, %v9299_v49  ;;  %v3995_v43 = vmax.f32 %v3576_v12, 0.0 }
 0x3d2   : > { %v4020_v40 = vmul.f32 %v3972_v32, %v9300_v35  ;;  %v3996_v41 = vmax.f32 %v3578_v44, 0.0 }
 0x3d3   : > { %v4074_v46 = vadd.f32 %v4019_v13, %v4018_v60  ;;  %v4043_v31 = vmul.f32 %v3995_v43, %v9299_v49 }
 0x3d4   : > { %v4044_v38 = vmul.f32 %v3996_v41, %v9300_v35 }
 0x3d5   : > { %v4078_v28 = vadd.f32 %v4043_v31, %v4042_v30  ;;  %v4075_v54 = vadd.f32 %v4074_v46, %v4020_v40  ;;  %v9305_v30 = vld [vmem:[#allocation23_spill] sm:$0xff] }
 0x3d7   : > { %4076 = vadd.xlane.f32.xlu0 %v4075_v54  ;;  %v4079_v19 = vadd.f32 %v4078_v28, %v4044_v38  ;;  %v9306_v38 = vld [vmem:[#allocation32_spill] sm:$0xff] }
 0x3d9   : > { %4080 = vadd.xlane.f32.xlu1 %v4079_v19  ;;  %v9307_v19 = vld [vmem:[#allocation28_spill] sm:$0xff] }
 0x3e0   : > { %v3657_v37 = vpop.f32.mrb[32].mxu0 }
 0x3e1   : > { %v3658_v20 = vadd.f32 %v3657_v37, %v8577_v27  ;;  %v3659_v7 = vpop.f32.mrb[33].mxu0 }
 0x3e2   : > { %v3660_v29 = vadd.f32 %v3659_v7, %v8577_v27  ;;  %v3661_v62 = vpop.f32.mrb[34].mxu0 }
 0x3e3   : > { %v3975_v36 = vmax.f32 %v3658_v20, 0.0  ;;  %v3662_v6 = vadd.f32 %v3661_v62, %v8580_v24  ;;  %v3663_v18 = vpop.f32.mrb[35].mxu0 }
 0x3e4   : > { %v3976_v34 = vmax.f32 %v3660_v29, 0.0  ;;  %v3664_v51 = vadd.f32 %v3663_v18, %v8580_v24 }
 0x3e5   : > { %v4023_v22 = vmul.f32 %v3975_v36, %v9302_v53  ;;  %v3999_v1 = vmax.f32 %v3662_v6, 0.0 }
 0x3e6   : > { %v4024_v42 = vmul.f32 %v3976_v34, %v9304_v26  ;;  %v4000_v10 = vmax.f32 %v3664_v51, 0.0  ;;  %v3786_v0 = vpop.f32.mrb[36].mxu1 }
 0x3e7   : > { %v4047_v14 = vmul.f32 %v3999_v1, %v9302_v53  ;;  %v3788_v58 = vpop.f32.mrb[37].mxu1  ;;  %v4086_v4 = vadd.f32 %v8589_v45, %v4023_v22  ;;  %v3787_v45 = vadd.f32 %v3786_v0, %v8577_v27  ;;  %v9309_v0 = vld [vmem:[#allocation9_spill] sm:$0xff] }
 0x3e8   : > { %v4096_v3 = vadd.f32 %v4025_v11, %v4024_v42  ;;  %v4048_v9 = vmul.f32 %v4000_v10, %v9304_v26  ;;  %v3790_v50 = vpop.f32.mrb[38].mxu1  ;;  %v3789_v62 = vadd.f32 %v3788_v58, %v8577_v27 }
 0x3e9   : > { %v3792_v56 = vpop.f32.mrb[39].mxu1  ;;  %4087 = vadd.xlane.f32.xlu0 %v4086_v4  ;;  %v4090_v57 = vadd.f32 %v8591_v2, %v4047_v14  ;;  %v3981_v21 = vmax.f32 %v3787_v45, 0.0  ;;  %v3791_v60 = vadd.f32 %v3790_v50, %v8580_v24  ;;  %v9310_v45 = vld [vmem:[#allocation38_spill] sm:$0xff] }
 0x3ea   : > { %v4100_v52 = vadd.f32 %v4049_v23, %v4048_v9  ;;  %v4097_v48 = vadd.f32 %v4096_v3, %v4026_v55  ;;  %v3793_v11 = vadd.f32 %v3792_v56, %v8580_v24  ;;  %v3982_v25 = vmax.f32 %v3789_v62, 0.0  ;;  %v9308_v55 = vld [vmem:[#allocation25_spill] sm:$0xff] }
 0x3eb   : > { %4091 = vadd.xlane.f32.xlu1 %v4090_v57  ;;  %v4029_v28 = vmul.f32 %v3981_v21, %v9306_v38  ;;  %v4005_v54 = vmax.f32 %v3791_v60, 0.0 }
 0x3ec   : > { %v4101_v12 = vadd.f32 %v4100_v52, %v4050_v8  ;;  %v4006_v3 = vmax.f32 %v3793_v11, 0.0 }
 0x3ed   : > { %4098 = vadd.xlane.f32.xlu0 %v4097_v48  ;;  %v4053_v20 = vmul.f32 %v4005_v54, %v9306_v38 }
 0x3ef   : > { %4102 = vadd.xlane.f32.xlu1 %v4101_v12 }
 0x3f4   : > { %v3743_v15 = vpop.f32.mrb[36].mxu0 }
 0x3f5   : > { %v3744_v32 = vadd.f32 %v3743_v15, %v8577_v27  ;;  %v3745_v44 = vpop.f32.mrb[37].mxu0  ;;  %v4030_v15 = vmul.f32 %v3982_v25, %v9310_v45 }
 0x3f6   : > { %v3746_v49 = vadd.f32 %v3745_v44, %v8577_v27  ;;  %v3747_v2 = vpop.f32.mrb[38].mxu0 }
 0x3f7   : > { %v3979_v13 = vmax.f32 %v3744_v32, 0.0  ;;  %v3748_v43 = vadd.f32 %v3747_v2, %v8580_v24  ;;  %v3749_v35 = vpop.f32.mrb[39].mxu0  ;;  %v9311_v32 = vld [vmem:[#allocation34_spill] sm:$0xff] }
 0x3f8   : > { %v3980_v40 = vmax.f32 %v3746_v49, 0.0  ;;  %v3750_v41 = vadd.f32 %v3749_v35, %v8580_v24  ;;  %v9312_v49 = vld [vmem:[#allocation41_spill] sm:$0xff] }
 0x3f9   : > { %v4027_v46 = vmul.f32 %v3979_v13, %v9305_v30  ;;  %v4003_v31 = vmax.f32 %v3748_v43, 0.0  ;;  %v4054_v43 = vmul.f32 %v4006_v3, %v9310_v45 }
 0x3fa   : > { %v4028_v16 = vmul.f32 %v3980_v40, %v9307_v19  ;;  %v4004_v39 = vmax.f32 %v3750_v41, 0.0 }
 0x3fb   : > { %v4051_v17 = vmul.f32 %v4003_v31, %v9305_v30 }
 0x3fc   : > { %v4107_v61 = vadd.f32 %v4028_v16, %v4027_v46  ;;  %v4052_v37 = vmul.f32 %v4004_v39, %v9307_v19 }
 0x3fe   : > { %v4111_v7 = vadd.f32 %v4052_v37, %v4051_v17  ;;  %v4108_v5 = vadd.f32 %v4107_v61, %v4029_v28 }
 0x400   : > { %4109 = vadd.xlane.f32.xlu0 %v4108_v5  ;;  %v4112_v47 = vadd.f32 %v4111_v7, %v4053_v20 }
 0x402   : > { %4113 = vadd.xlane.f32.xlu1 %v4112_v47 }
 0x403   : > { %v3872_v29 = vpop.f32.mrb[40].mxu1 }
 0x404   : > { %v3873_v36 = vadd.f32 %v3872_v29, %v8577_v27  ;;  %v3874_v6 = vpop.f32.mrb[41].mxu1 }
 0x405   : > { %v3875_v18 = vadd.f32 %v3874_v6, %v8577_v27  ;;  %v3876_v33 = vpop.f32.mrb[42].mxu1 }
 0x406   : > { %v3985_v59 = vmax.f32 %v3873_v36, 0.0  ;;  %v3877_v34 = vadd.f32 %v3876_v33, %v8580_v24  ;;  %v3878_v51 = vpop.f32.mrb[43].mxu1 }
 0x407   : > { %v3986_v53 = vmax.f32 %v3875_v18, 0.0  ;;  %v3879_v22 = vadd.f32 %v3878_v51, %v8580_v24  ;;  %v9314_v51 = vld [vmem:[#allocation48_spill] sm:$0xff] }
 0x408   : > { %v3829_v1 = vpop.f32.mrb[40].mxu0  ;;  %v4033_v63 = vmul.f32 %v3985_v59, %v9308_v55  ;;  %v4009_v26 = vmax.f32 %v3877_v34, 0.0  ;;  %v9313_v59 = vld [vmem:[#allocation26_spill] sm:$0xff] }
 0x409   : > { %v3830_v42 = vadd.f32 %v3829_v1, %v8577_v27  ;;  %v3831_v10 = vpop.f32.mrb[41].mxu0  ;;  %v4034_v14 = vmul.f32 %v3986_v53, %v9309_v0  ;;  %v4010_v58 = vmax.f32 %v3879_v22, 0.0  ;;  %v9315_v1 = vld [vmem:[#allocation49_spill] sm:$0xff] }
 0x40a   : > { %v3832_v4 = vadd.f32 %v3831_v10, %v8577_v27  ;;  %v3833_v23 = vpop.f32.mrb[42].mxu0  ;;  %v4057_v9 = vmul.f32 %v4009_v26, %v9308_v55 }
 0x40b   : > { %v3983_v50 = vmax.f32 %v3830_v42, 0.0  ;;  %v3834_v56 = vadd.f32 %v3833_v23, %v8580_v24  ;;  %v3835_v57 = vpop.f32.mrb[43].mxu0  ;;  %v4129_v8 = vadd.f32 %v4034_v14, %v4033_v63  ;;  %v4058_v52 = vmul.f32 %v4010_v58, %v9309_v0  ;;  %v9316_v14 = vld [vmem:[#allocation15_spill] sm:$0xff] }
 0x40c   : > { %v3984_v48 = vmax.f32 %v3832_v4, 0.0  ;;  %v3836_v12 = vadd.f32 %v3835_v57, %v8580_v24  ;;  %v5341_v57 = vmov 0.0|0.0  }
 0x40d   : > { %v4031_v44 = vmul.f32 %v3983_v50, %v9311_v32  ;;  %v4007_v21 = vmax.f32 %v3834_v56, 0.0  ;;  %v4133_v60 = vadd.f32 %v4058_v52, %v4057_v9  ;;  %v4156_v56 = vld [vmem:[%s8702_s6] sm:$0xff]  ;;  %4360 = vmatprep.subr.bf16.mxu0 %v5341_v57 }
 0x40e   : > { %v4032_v2 = vmul.f32 %v3984_v48, %v9312_v49  ;;  %v4008_v13 = vmax.f32 %v3836_v12, 0.0 }
 0x40f   : > { %v4118_v35 = vadd.f32 %v4031_v44, %v4030_v15  ;;  %v4055_v40 = vmul.f32 %v4007_v21, %v9311_v32 }
 0x410   : > { %v4056_v41 = vmul.f32 %v4008_v13, %v9312_v49 }
 0x411   : > { %v4122_v30 = vadd.f32 %v4055_v40, %v4054_v43  ;;  %v4119_v46 = vadd.f32 %v4118_v35, %v4032_v2 }
 0x413   : > { %4120 = vadd.xlane.f32.xlu0 %v4119_v46  ;;  %v4123_v31 = vadd.f32 %v4122_v30, %v4056_v41 }
 0x415   : > { %4124 = vadd.xlane.f32.xlu1 %v4123_v31 }
 0x41d   : > { %v3915_v38 = vpop.f32.mrb[44].mxu0  ;;  %v3958_v28 = vpop.f32.mrb[44].mxu1 }
 0x41e   : > { %v3916_v54 = vadd.f32 %v3915_v38, %v8577_v27  ;;  %v3959_v19 = vadd.f32 %v3958_v28, %v8577_v27  ;;  %v3917_v16 = vpop.f32.mrb[45].mxu0  ;;  %v3960_v39 = vpop.f32.mrb[45].mxu1 }
 0x41f   : > { %v3918_v17 = vadd.f32 %v3917_v16, %v8577_v27  ;;  %v3961_v61 = vadd.f32 %v3960_v39, %v8577_v27  ;;  %v3919_v37 = vpop.f32.mrb[46].mxu0  ;;  %v3962_v20 = vpop.f32.mrb[46].mxu1 }
 0x420   : > { %v3987_v7 = vmax.f32 %v3916_v54, 0.0  ;;  %v3989_v5 = vmax.f32 %v3959_v19, 0.0  ;;  %v3920_v47 = vadd.f32 %v3919_v37, %v8580_v24  ;;  %v3963_v29 = vadd.f32 %v3962_v20, %v8580_v24  ;;  %v3921_v62 = vpop.f32.mrb[47].mxu0  ;;  %v3964_v36 = vpop.f32.mrb[47].mxu1  ;;  %v4155_v54 = vld [vmem:[%s8701_s5] sm:$0xff] }
 0x421   : > { %v3988_v6 = vmax.f32 %v3918_v17, 0.0  ;;  %v3990_v18 = vmax.f32 %v3961_v61, 0.0  ;;  %v3922_v33 = vadd.f32 %v3921_v62, %v8580_v24  ;;  %v3965_v11 = vadd.f32 %v3964_v36, %v8580_v24 }
 0x422   : > { %v4035_v34 = vmul.f32 %v3987_v7, %v9313_v59  ;;  %v4037_v27 = vmul.f32 %v3989_v5, %v9314_v51  ;;  %v4011_v53 = vmax.f32 %v3920_v47, 0.0  ;;  %v4013_v22 = vmax.f32 %v3963_v29, 0.0 }
 0x423   : > { %v4036_v25 = vmul.f32 %v3988_v6, %v9315_v1  ;;  %v4012_v55 = vmax.f32 %v3922_v33, 0.0  ;;  %v4014_v63 = vmax.f32 %v3965_v11, 0.0  ;;  %v4038_v58 = vmul.f32 %v3990_v18, %v9316_v14 }
 0x424   : > { %v4059_v26 = vmul.f32 %v4011_v53, %v9313_v59  ;;  %v4061_v42 = vmul.f32 %v4013_v22, %v9314_v51  ;;  %v4130_v10 = vadd.f32 %v4129_v8, %v4035_v34  ;;  %v5343_v8 = vmov 0.0  }
 0x425   : > { %v4140_v0 = vadd.f32 %v4037_v27, %v4036_v25  ;;  %v4060_v24 = vmul.f32 %v4012_v55, %v9315_v1  ;;  %v4062_v3 = vmul.f32 %v4014_v63, %v9316_v14  ;;  %4357 = vmatprep.mubr.msk.f32.mxu0 %vm5342_vm10, %v5343_v8 }
 0x426   : > { %4131 = vadd.xlane.f32.xlu0 %v4130_v10  ;;  %v4134_v4 = vadd.f32 %v4133_v60, %v4059_v26 }
 0x427   : > { %v4144_v23 = vadd.f32 %v4061_v42, %v4060_v24  ;;  %v4141_v9 = vadd.f32 %v4140_v0, %v4038_v58 }
 0x428   : > { %4135 = vadd.xlane.f32.xlu1 %v4134_v4 }
 0x429   : > { %v4145_v50 = vadd.f32 %v4144_v23, %v4062_v3 }
 0x42a   : > { %4142 = vadd.xlane.f32.xlu0 %v4141_v9 }
 0x42c   : > { %4146 = vadd.xlane.f32.xlu1 %v4145_v50 }
 0x440   : > { %4159 = vperm.xlu0 %4864, %v4156_v56  }
 0x450   : > { %v4066_v52 = vpop.xlane.xlu1 %4065 }
 0x451   : > { %4072 = vst.msk [vmem:[#allocation3] sm:$0xff] %vm4071_vm11, %v4066_v52 }
 0x452   : > { %v4070_v48 = vpop.xlane.xlu0 %4069 }
 0x453   : > { %4073 = vst.msk [vmem:[#allocation3 + $0x8] sm:$0xff] %vm4071_vm11, %v4070_v48 }
 0x464   : > { %v4077_v12 = vpop.xlane.xlu0 %4076 }
 0x465   : > { %4083 = vst.msk [vmem:[#allocation3] sm:$0xff] %vm4082_vm12, %v4077_v12 }
 0x466   : > { %v4081_v45 = vpop.xlane.xlu1 %4080 }
 0x467   : > { %4084 = vst.msk [vmem:[#allocation3 + $0x8] sm:$0xff] %vm4082_vm12, %v4081_v45 }
 0x476   : > { %v4088_v15 = vpop.xlane.xlu0 %4087 }
 0x477   : > { %4094 = vst.msk [vmem:[#allocation3] sm:$0xff] %vm4093_vm13, %v4088_v15 }
 0x478   : > { %v4092_v32 = vpop.xlane.xlu1 %4091 }
 0x479   : > { %4095 = vst.msk [vmem:[#allocation3 + $0x8] sm:$0xff] %vm4093_vm13, %v4092_v32 }
 0x47a   : > { %v4099_v44 = vpop.xlane.xlu0 %4098 }
 0x47b   : > { %4105 = vst.msk [vmem:[#allocation3] sm:$0xff] %vm4104_vm14, %v4099_v44 }
 0x47c   : > { %v4103_v21 = vpop.xlane.xlu1 %4102 }
 0x47d   : > { %4106 = vst.msk [vmem:[#allocation3 + $0x8] sm:$0xff] %vm4104_vm14, %v4103_v21 }
 0x48d   : > { %v4110_v60 = vpop.xlane.xlu0 %4109 }
 0x48e   : > { %4116 = vst.msk [vmem:[#allocation3] sm:$0xff] %vm4115_vm15, %v4110_v60 }
 0x48f   : > { %v4114_v49 = vpop.xlane.xlu1 %4113 }
 0x490   : > { %4117 = vst.msk [vmem:[#allocation3 + $0x8] sm:$0xff] %vm4115_vm15, %v4114_v49 }
 0x4a0   : > { %v4121_v2 = vpop.xlane.xlu0 %4120 }
 0x4a1   : > { %4127 = vst.msk [vmem:[#allocation3] sm:$0xff] %vm4126_vm0, %v4121_v2 }
 0x4a2   : > { %v4125_v13 = vpop.xlane.xlu1 %4124 }
 0x4a3   : > { %4128 = vst.msk [vmem:[#allocation3 + $0x8] sm:$0xff] %vm4126_vm0, %v4125_v13 }
 0x4b3   : > { %v4132_v43 = vpop.xlane.xlu0 %4131 }
 0x4b4   : > { %4138 = vst.msk [vmem:[#allocation3] sm:$0xff] %vm4137_vm1, %v4132_v43 }
 0x4b5   : > { %v4136_v35 = vpop.xlane.xlu1 %4135 }
 0x4b6   : > { %4139 = vst.msk [vmem:[#allocation3 + $0x8] sm:$0xff] %vm4137_vm1, %v4136_v35 }
 0x4b7   : > { %v4143_v40 = vpop.xlane.xlu0 %4142 }
 0x4b8   : > { %4149 = vst.msk [vmem:[#allocation3] sm:$0xff] %vm4148_vm2, %v4143_v40 }
 0x4b9   : > { %v4147_v41 = vpop.xlane.xlu1 %4146 }
 0x4ba   : > { %4150 = vst.msk [vmem:[#allocation3 + $0x8] sm:$0xff] %vm4148_vm2, %v4147_v41 }
 0x4bf   : > { %v4151_v30 = vld [vmem:[#allocation3] sm:$0xff]  ;;  %v4160_v19 = vpop.permute.xlu0 %4159 }
 0x4c0   : > { %v4153_v31 = vmul.f32 0.00390625, %v4151_v30 }
 0x4c1   : > { %v4152_v46 = vld [vmem:[#allocation3 + $0x8] sm:$0xff] }
 0x4c2   : > { %v4154_v38 = vmul.f32 0.00390625, %v4152_v46 }
 0x4c4   : > { %v4361_v28 = vpack.c.bf16 %v4154_v38, %v4153_v31 }
 0x4c6   : > { %4362 = vmatpush3.bf16.msra.mxu0 %v4361_v28 }
 0x4c9   : > { %4358 = vmatmul.mubr.msk.f32.vlgmr.msra.gmra.mrb[48].mxu0 %vm4162_vm3, %v4155_v54 }
 0x59c   : > { %v4232_v16 = vpop.f32.mrb[48].mxu0 }
 0x59d   : > { %v4233_v39 = vadd.f32 %v4232_v16, %v4160_v19  ;;  %v4359_v17 = vpop.f32.mrb[49].mxu0 }
 0x59f   : > { %4237 = vst.msk [vmem:[%s303_s26] sm:$0xff] %vm4236_vm4, %v4233_v39 }
 0x5a0 PF: > { %s18_s27 = sadd.s32 1, %s5330_s27  }
 0x5a1   : > { %p15_p4 = scmp.ge.s32.totalorder %s18_s27, 4  }
 0x5a3   :  { %17 = sbr.rel (!%p15_p4) target bundleno = 1 (0x1), region = 82 }

</bundles_post_ra>
